<compile_context>
chip_gen: v7x
topology: tpu7x:2x2x1
jax: 0.10.0
libtpu: 0.0.40
codegen_flags: <defaults>
</compile_context>

<pallas_src>
import functools

import jax
import jax.numpy as jnp
from jax.experimental import pallas as pl
from jax.experimental.pallas import tpu as pltpu


def _fpn_head_kernel(x_ref, w0_ref, w1_ref, o_ref,
                     xpad_ref, col0_ref, midpad_ref, col1_ref):
    # x_ref   : (1, H, W, Cin)        one batch element, NHWC, unpadded
    # w0_ref  : (9*Cin, Cmid)         layer-0 weights, K index = (kh*3+kw)*Cin+cin
    # w1_ref  : (Cout, 9*Cmid)        layer-1 weights, K index = (kh*3+kw)*Cmid+cm
    # o_ref   : (1, Cout, H*W)        NCHW-flat output (lane-dense last dim)
    # scratch : padded input, im2col0, padded mid, im2col1  (all VMEM)
    H = x_ref.shape[1]
    W = x_ref.shape[2]
    Cin = x_ref.shape[3]
    Cmid = w0_ref.shape[1]
    M = H * W
    cdtype = xpad_ref.dtype

    # ---------------- layer 0: conv3x3(pad=1) + relu ----------------
    # Zero-pad in VMEM only.
    xpad_ref[...] = jnp.zeros_like(xpad_ref)
    xpad_ref[1:H + 1, 1:W + 1, :] = x_ref[0].astype(cdtype)

    # im2col: col0[h*W+w, (kh*3+kw)*Cin + cin] = xpad[h+kh, w+kw, cin]
    for kh in range(3):
        for kw in range(3):
            t = kh * 3 + kw
            col0_ref[:, t * Cin:(t + 1) * Cin] = (
                xpad_ref[kh:kh + H, kw:kw + W, :].reshape(M, Cin))

    # Single MXU matmul, f32 accumulation: (M, 9*Cin) x (9*Cin, Cmid)
    a0 = jnp.dot(col0_ref[...], w0_ref[...],
                 preferred_element_type=jnp.float32)
    mid = jnp.maximum(a0, 0.0)                       # (M, Cmid), stays in VMEM/vregs

    # ---------------- layer 1: conv3x3(pad=1) + relu ----------------
    midpad_ref[...] = jnp.zeros_like(midpad_ref)
    midpad_ref[1:H + 1, 1:W + 1, :] = mid.reshape(H, W, Cmid).astype(cdtype)

    for kh in range(3):
        for kw in range(3):
            t = kh * 3 + kw
            col1_ref[:, t * Cmid:(t + 1) * Cmid] = (
                midpad_ref[kh:kh + H, kw:kw + W, :].reshape(M, Cmid))

    # Transposed-output matmul (same dim-numbers pattern as q @ k^T in flash
    # attention): (Cout, 9*Cmid) x (M, 9*Cmid)^T -> (Cout, M).  Output is
    # lane-dense and already channel-first.
    a1 = jax.lax.dot_general(
        w1_ref[...], col1_ref[...],
        dimension_numbers=(((1,), (1,)), ((), ())),
        preferred_element_type=jnp.float32)
    o_ref[0] = jnp.maximum(a1, 0.0).astype(o_ref.dtype)


def prepare_weights(w0_oihw, w1_oihw, compute_dtype=None):
    """Repack PyTorch OIHW conv weights into flat matmul layouts (do this once)."""
    cmid, cin, kh, kw = w0_oihw.shape
    cout, cmid2, _, _ = w1_oihw.shape
    assert (kh, kw) == (3, 3) and cmid2 == cmid
    dt0 = compute_dtype or w0_oihw.dtype
    dt1 = compute_dtype or w1_oihw.dtype
    # layer 0: (9*Cin, Cmid), row index = (kh*3+kw)*Cin + cin
    w0mat = jnp.transpose(w0_oihw, (2, 3, 1, 0)).reshape(9 * cin, cmid).astype(dt0)
    # layer 1: (Cout, 9*Cmid), col index = (kh*3+kw)*Cmid + cmid
    w1mat = jnp.transpose(w1_oihw, (0, 2, 3, 1)).reshape(cout, 9 * cmid).astype(dt1)
    return w0mat, w1mat


def fpn_head_apply(x_nhwc, w0mat, w1mat):
    """Fused relu(conv0) -> relu(conv1). NHWC input, NCHW output (N, Cout, H, W)."""
    N, H, W, Cin = x_nhwc.shape
    Cmid = w0mat.shape[1]
    Cout = w1mat.shape[0]
    assert w0mat.shape[0] == 9 * Cin and w1mat.shape[1] == 9 * Cmid
    cdtype = x_nhwc.dtype

    out_flat = pl.pallas_call(
        _fpn_head_kernel,
        out_shape=jax.ShapeDtypeStruct((N, Cout, H * W), x_nhwc.dtype),
        grid=(N,),
        in_specs=[
            pl.BlockSpec((1, H, W, Cin), lambda n: (n, 0, 0, 0)),
            pl.BlockSpec((9 * Cin, Cmid), lambda n: (0, 0)),     # resident
            pl.BlockSpec((Cout, 9 * Cmid), lambda n: (0, 0)),    # resident
        ],
        out_specs=pl.BlockSpec((1, Cout, H * W), lambda n: (n, 0, 0)),
        scratch_shapes=[
            pltpu.VMEM((H + 2, W + 2, Cin), cdtype),    # padded input
            pltpu.VMEM((H * W, 9 * Cin), cdtype),       # im2col layer 0
            pltpu.VMEM((H + 2, W + 2, Cmid), cdtype),   # padded mid activation
            pltpu.VMEM((H * W, 9 * Cmid), cdtype),      # im2col layer 1
        ],
        compiler_params=pltpu.CompilerParams(
            dimension_semantics=("parallel",)),
    )(x_nhwc, w0mat, w1mat)

    # Trailing-dim split: free reshape, no transpose / extra HBM pass on output.
    return out_flat.reshape(N, Cout, H, W)


@functools.partial(jax.jit, static_argnames=("compute_dtype",))
def fpn_head_forward(x_nchw, w0_oihw, w1_oihw, compute_dtype=None):
    """PyTorch-compatible FPNHead.forward: NCHW in / NCHW out.

    compute_dtype=jnp.bfloat16 feeds bf16 to the MXU (f32 accumulation) on
    v6e/v7x; default keeps f32 end-to-end.
    """
    w0mat, w1mat = prepare_weights(w0_oihw, w1_oihw, compute_dtype)
    x = jnp.transpose(x_nchw, (0, 2, 3, 1))          # NCHW -> NHWC (input only)
    if compute_dtype is not None:
        x = x.astype(compute_dtype)
    y = fpn_head_apply(x, w0mat, w1mat)              # already NCHW
    return y.astype(x_nchw.dtype)


def _reference_forward(x_nchw, w0_oihw, w1_oihw):
    """Pure-JAX reference (matches PyTorch semantics)."""
    dn = ("NCHW", "OIHW", "NCHW")
    y = jax.lax.conv_general_dilated(x_nchw, w0_oihw, (1, 1), "SAME",
                                     dimension_numbers=dn)
    y = jnp.maximum(y, 0.0)
    y = jax.lax.conv_general_dilated(y, w1_oihw, (1, 1), "SAME",
                                     dimension_numbers=dn)
    return jnp.maximum(y, 0.0)


if __name__ == "__main__":
    # FPNHead(num_in=4, num_mid=8, num_out=4)
    N, C_in, H, W = 2, 4, 16, 16
    C_mid, C_out = 8, 4

    key = jax.random.PRNGKey(0)
    kx, k0, k1 = jax.random.split(key, 3)
    x = jax.random.normal(kx, (N, C_in, H, W), dtype=jnp.float32)
    w0 = 0.1 * jax.random.normal(k0, (C_mid, C_in, 3, 3), dtype=jnp.float32)
    w1 = 0.1 * jax.random.normal(k1, (C_out, C_mid, 3, 3), dtype=jnp.float32)

    out = jax.block_until_ready(fpn_head_forward(x, w0, w1))
    ref = jax.block_until_ready(_reference_forward(x, w0, w1))

    assert out.shape == (N, C_out, H, W)
    assert jnp.allclose(out, ref, atol=1e-4, rtol=1e-4)

    print("KERNEL_OK")
</pallas_src>

<mosaic_0001>
module attributes {stable_mosaic.version = 11 : i64} {
  func.func @_fpn_head_kernel(%arg0: i32, %arg1: memref<1x16x16x4xf32, #tpu.memory_space<vmem>>, %arg2: memref<36x8xf32, #tpu.memory_space<vmem>>, %arg3: memref<4x72xf32, #tpu.memory_space<vmem>>, %arg4: memref<1x4x256xf32, #tpu.memory_space<vmem>>, %arg5: memref<18x18x4xf32, #tpu.memory_space<vmem>>, %arg6: memref<256x36xf32, #tpu.memory_space<vmem>>, %arg7: memref<18x18x8xf32, #tpu.memory_space<vmem>>, %arg8: memref<256x72xf32, #tpu.memory_space<vmem>>) attributes {dimension_semantics = [#tpu.dimension_semantics<parallel>], iteration_bounds = array<i64: 2>, scalar_prefetch = 0 : i64, scratch_operands = 4 : i64, tpu.core_type = #tpu.core_type<tc>, window_params = [{transform_indices = @transform_0, window_bounds = array<i64: 1, 16, 16, 4>}, {pipeline_mode = #tpu.pipeline_mode<synchronous>, transform_indices = @transform_1, window_bounds = array<i64: 36, 8>}, {pipeline_mode = #tpu.pipeline_mode<synchronous>, transform_indices = @transform_2, window_bounds = array<i64: 4, 72>}, {transform_indices = @transform_3, window_bounds = array<i64: 1, 4, 256>}]} {
    %cst = arith.constant 0.000000e+00 : f32
    %0 = vector.broadcast %cst : f32 to vector<18x18x4xf32>
    %c0 = arith.constant 0 : index
    %c0_0 = arith.constant 0 : index
    %c0_1 = arith.constant 0 : index
    %1 = vector.load %arg5[%c0, %c0_0, %c0_1] : memref<18x18x4xf32, #tpu.memory_space<vmem>>, vector<18x18x4xf32>
    tpu.vector_store %arg5[%c0, %c0_0, %c0_1], %0 {strides = array<i32>} : memref<18x18x4xf32, #tpu.memory_space<vmem>>, vector<18x18x4xf32>,
    %c0_2 = arith.constant 0 : index
    %c0_3 = arith.constant 0 : index
    %c0_4 = arith.constant 0 : index
    %c0_5 = arith.constant 0 : index
    %2 = vector.load %arg1[%c0_2, %c0_3, %c0_4, %c0_5] : memref<1x16x16x4xf32, #tpu.memory_space<vmem>>, vector<1x16x16x4xf32>
    %3 = vector.shape_cast %2 : vector<1x16x16x4xf32> to vector<16x16x4xf32>
    %c1 = arith.constant 1 : index
    %c1_6 = arith.constant 1 : index
    %c0_7 = arith.constant 0 : index
    %4 = vector.load %arg5[%c1, %c1_6, %c0_7] : memref<18x18x4xf32, #tpu.memory_space<vmem>>, vector<16x16x4xf32>
    tpu.vector_store %arg5[%c1, %c1_6, %c0_7], %3 {strides = array<i32>} : memref<18x18x4xf32, #tpu.memory_space<vmem>>, vector<16x16x4xf32>,
    %c0_8 = arith.constant 0 : index
    %c0_9 = arith.constant 0 : index
    %c0_10 = arith.constant 0 : index
    %5 = vector.load %arg5[%c0_8, %c0_9, %c0_10] : memref<18x18x4xf32, #tpu.memory_space<vmem>>, vector<16x16x4xf32>
    %6 = vector.shape_cast %5 : vector<16x16x4xf32> to vector<256x4xf32>
    %c0_11 = arith.constant 0 : index
    %c0_12 = arith.constant 0 : index
    %7 = vector.load %arg6[%c0_11, %c0_12] : memref<256x36xf32, #tpu.memory_space<vmem>>, vector<256x4xf32>
    tpu.vector_store %arg6[%c0_11, %c0_12], %6 {strides = array<i32>} : memref<256x36xf32, #tpu.memory_space<vmem>>, vector<256x4xf32>,
    %c0_13 = arith.constant 0 : index
    %c1_14 = arith.constant 1 : index
    %c0_15 = arith.constant 0 : index
    %8 = vector.load %arg5[%c0_13, %c1_14, %c0_15] : memref<18x18x4xf32, #tpu.memory_space<vmem>>, vector<16x16x4xf32>
    %9 = vector.shape_cast %8 : vector<16x16x4xf32> to vector<256x4xf32>
    %c0_16 = arith.constant 0 : index
    %c4 = arith.constant 4 : index
    %10 = vector.load %arg6[%c0_16, %c4] : memref<256x36xf32, #tpu.memory_space<vmem>>, vector<256x4xf32>
    tpu.vector_store %arg6[%c0_16, %c4], %9 {strides = array<i32>} : memref<256x36xf32, #tpu.memory_space<vmem>>, vector<256x4xf32>,
    %c0_17 = arith.constant 0 : index
    %c2 = arith.constant 2 : index
    %c0_18 = arith.constant 0 : index
    %11 = vector.load %arg5[%c0_17, %c2, %c0_18] : memref<18x18x4xf32, #tpu.memory_space<vmem>>, vector<16x16x4xf32>
    %12 = vector.shape_cast %11 : vector<16x16x4xf32> to vector<256x4xf32>
    %c0_19 = arith.constant 0 : index
    %c8 = arith.constant 8 : index
    %13 = vector.load %arg6[%c0_19, %c8] : memref<256x36xf32, #tpu.memory_space<vmem>>, vector<256x4xf32>
    tpu.vector_store %arg6[%c0_19, %c8], %12 {strides = array<i32>} : memref<256x36xf32, #tpu.memory_space<vmem>>, vector<256x4xf32>,
    %c1_20 = arith.constant 1 : index
    %c0_21 = arith.constant 0 : index
    %c0_22 = arith.constant 0 : index
    %14 = vector.load %arg5[%c1_20, %c0_21, %c0_22] : memref<18x18x4xf32, #tpu.memory_space<vmem>>, vector<16x16x4xf32>
    %15 = vector.shape_cast %14 : vector<16x16x4xf32> to vector<256x4xf32>
    %c0_23 = arith.constant 0 : index
    %c12 = arith.constant 12 : index
    %16 = vector.load %arg6[%c0_23, %c12] : memref<256x36xf32, #tpu.memory_space<vmem>>, vector<256x4xf32>
    tpu.vector_store %arg6[%c0_23, %c12], %15 {strides = array<i32>} : memref<256x36xf32, #tpu.memory_space<vmem>>, vector<256x4xf32>,
    %c1_24 = arith.constant 1 : index
    %c1_25 = arith.constant 1 : index
    %c0_26 = arith.constant 0 : index
    %17 = vector.load %arg5[%c1_24, %c1_25, %c0_26] : memref<18x18x4xf32, #tpu.memory_space<vmem>>, vector<16x16x4xf32>
    %18 = vector.shape_cast %17 : vector<16x16x4xf32> to vector<256x4xf32>
    %c0_27 = arith.constant 0 : index
    %c16 = arith.constant 16 : index
    %19 = vector.load %arg6[%c0_27, %c16] : memref<256x36xf32, #tpu.memory_space<vmem>>, vector<256x4xf32>
    tpu.vector_store %arg6[%c0_27, %c16], %18 {strides = array<i32>} : memref<256x36xf32, #tpu.memory_space<vmem>>, vector<256x4xf32>,
    %c1_28 = arith.constant 1 : index
    %c2_29 = arith.constant 2 : index
    %c0_30 = arith.constant 0 : index
    %20 = vector.load %arg5[%c1_28, %c2_29, %c0_30] : memref<18x18x4xf32, #tpu.memory_space<vmem>>, vector<16x16x4xf32>
    %21 = vector.shape_cast %20 : vector<16x16x4xf32> to vector<256x4xf32>
    %c0_31 = arith.constant 0 : index
    %c20 = arith.constant 20 : index
    %22 = vector.load %arg6[%c0_31, %c20] : memref<256x36xf32, #tpu.memory_space<vmem>>, vector<256x4xf32>
    tpu.vector_store %arg6[%c0_31, %c20], %21 {strides = array<i32>} : memref<256x36xf32, #tpu.memory_space<vmem>>, vector<256x4xf32>,
    %c2_32 = arith.constant 2 : index
    %c0_33 = arith.constant 0 : index
    %c0_34 = arith.constant 0 : index
    %23 = vector.load %arg5[%c2_32, %c0_33, %c0_34] : memref<18x18x4xf32, #tpu.memory_space<vmem>>, vector<16x16x4xf32>
    %24 = vector.shape_cast %23 : vector<16x16x4xf32> to vector<256x4xf32>
    %c0_35 = arith.constant 0 : index
    %c24 = arith.constant 24 : index
    %25 = vector.load %arg6[%c0_35, %c24] : memref<256x36xf32, #tpu.memory_space<vmem>>, vector<256x4xf32>
    tpu.vector_store %arg6[%c0_35, %c24], %24 {strides = array<i32>} : memref<256x36xf32, #tpu.memory_space<vmem>>, vector<256x4xf32>,
    %c2_36 = arith.constant 2 : index
    %c1_37 = arith.constant 1 : index
    %c0_38 = arith.constant 0 : index
    %26 = vector.load %arg5[%c2_36, %c1_37, %c0_38] : memref<18x18x4xf32, #tpu.memory_space<vmem>>, vector<16x16x4xf32>
    %27 = vector.shape_cast %26 : vector<16x16x4xf32> to vector<256x4xf32>
    %c0_39 = arith.constant 0 : index
    %c28 = arith.constant 28 : index
    %28 = vector.load %arg6[%c0_39, %c28] : memref<256x36xf32, #tpu.memory_space<vmem>>, vector<256x4xf32>
    tpu.vector_store %arg6[%c0_39, %c28], %27 {strides = array<i32>} : memref<256x36xf32, #tpu.memory_space<vmem>>, vector<256x4xf32>,
    %c2_40 = arith.constant 2 : index
    %c2_41 = arith.constant 2 : index
    %c0_42 = arith.constant 0 : index
    %29 = vector.load %arg5[%c2_40, %c2_41, %c0_42] : memref<18x18x4xf32, #tpu.memory_space<vmem>>, vector<16x16x4xf32>
    %30 = vector.shape_cast %29 : vector<16x16x4xf32> to vector<256x4xf32>
    %c0_43 = arith.constant 0 : index
    %c32 = arith.constant 32 : index
    %31 = vector.load %arg6[%c0_43, %c32] : memref<256x36xf32, #tpu.memory_space<vmem>>, vector<256x4xf32>
    tpu.vector_store %arg6[%c0_43, %c32], %30 {strides = array<i32>} : memref<256x36xf32, #tpu.memory_space<vmem>>, vector<256x4xf32>,
    %c0_44 = arith.constant 0 : index
    %c0_45 = arith.constant 0 : index
    %32 = vector.load %arg6[%c0_44, %c0_45] : memref<256x36xf32, #tpu.memory_space<vmem>>, vector<256x36xf32>
    %c0_46 = arith.constant 0 : index
    %c0_47 = arith.constant 0 : index
    %33 = vector.load %arg2[%c0_46, %c0_47] : memref<36x8xf32, #tpu.memory_space<vmem>>, vector<36x8xf32>
    %cst_48 = arith.constant dense<0.000000e+00> : vector<256x8xf32>
    %34 = tpu.matmul %32, %33, %cst_48 {dimension_numbers = #tpu.dot_dimension_numbers<[1], [0], [0], [1], [0, 0, 1, 1], [], []>} : vector<256x36xf32>, vector<36x8xf32>, vector<256x8xf32> -> vector<256x8xf32>
    %cst_49 = arith.constant 0.000000e+00 : f32
    %35 = vector.broadcast %cst_49 : f32 to vector<256x8xf32>
    %36 = arith.maximumf %34, %35 : vector<256x8xf32>
    %cst_50 = arith.constant 0.000000e+00 : f32
    %37 = vector.broadcast %cst_50 : f32 to vector<18x18x8xf32>
    %c0_51 = arith.constant 0 : index
    %c0_52 = arith.constant 0 : index
    %c0_53 = arith.constant 0 : index
    %38 = vector.load %arg7[%c0_51, %c0_52, %c0_53] : memref<18x18x8xf32, #tpu.memory_space<vmem>>, vector<18x18x8xf32>
    tpu.vector_store %arg7[%c0_51, %c0_52, %c0_53], %37 {strides = array<i32>} : memref<18x18x8xf32, #tpu.memory_space<vmem>>, vector<18x18x8xf32>,
    %39 = vector.shape_cast %36 : vector<256x8xf32> to vector<16x16x8xf32>
    %c1_54 = arith.constant 1 : index
    %c1_55 = arith.constant 1 : index
    %c0_56 = arith.constant 0 : index
    %40 = vector.load %arg7[%c1_54, %c1_55, %c0_56] : memref<18x18x8xf32, #tpu.memory_space<vmem>>, vector<16x16x8xf32>
    tpu.vector_store %arg7[%c1_54, %c1_55, %c0_56], %39 {strides = array<i32>} : memref<18x18x8xf32, #tpu.memory_space<vmem>>, vector<16x16x8xf32>,
    %c0_57 = arith.constant 0 : index
    %c0_58 = arith.constant 0 : index
    %c0_59 = arith.constant 0 : index
    %41 = vector.load %arg7[%c0_57, %c0_58, %c0_59] : memref<18x18x8xf32, #tpu.memory_space<vmem>>, vector<16x16x8xf32>
    %42 = vector.shape_cast %41 : vector<16x16x8xf32> to vector<256x8xf32>
    %c0_60 = arith.constant 0 : index
    %c0_61 = arith.constant 0 : index
    %43 = vector.load %arg8[%c0_60, %c0_61] : memref<256x72xf32, #tpu.memory_space<vmem>>, vector<256x8xf32>
    tpu.vector_store %arg8[%c0_60, %c0_61], %42 {strides = array<i32>} : memref<256x72xf32, #tpu.memory_space<vmem>>, vector<256x8xf32>,
    %c0_62 = arith.constant 0 : index
    %c1_63 = arith.constant 1 : index
    %c0_64 = arith.constant 0 : index
    %44 = vector.load %arg7[%c0_62, %c1_63, %c0_64] : memref<18x18x8xf32, #tpu.memory_space<vmem>>, vector<16x16x8xf32>
    %45 = vector.shape_cast %44 : vector<16x16x8xf32> to vector<256x8xf32>
    %c0_65 = arith.constant 0 : index
    %c8_66 = arith.constant 8 : index
    %46 = vector.load %arg8[%c0_65, %c8_66] : memref<256x72xf32, #tpu.memory_space<vmem>>, vector<256x8xf32>
    tpu.vector_store %arg8[%c0_65, %c8_66], %45 {strides = array<i32>} : memref<256x72xf32, #tpu.memory_space<vmem>>, vector<256x8xf32>,
    %c0_67 = arith.constant 0 : index
    %c2_68 = arith.constant 2 : index
    %c0_69 = arith.constant 0 : index
    %47 = vector.load %arg7[%c0_67, %c2_68, %c0_69] : memref<18x18x8xf32, #tpu.memory_space<vmem>>, vector<16x16x8xf32>
    %48 = vector.shape_cast %47 : vector<16x16x8xf32> to vector<256x8xf32>
    %c0_70 = arith.constant 0 : index
    %c16_71 = arith.constant 16 : index
    %49 = vector.load %arg8[%c0_70, %c16_71] : memref<256x72xf32, #tpu.memory_space<vmem>>, vector<256x8xf32>
    tpu.vector_store %arg8[%c0_70, %c16_71], %48 {strides = array<i32>} : memref<256x72xf32, #tpu.memory_space<vmem>>, vector<256x8xf32>,
    %c1_72 = arith.constant 1 : index
    %c0_73 = arith.constant 0 : index
    %c0_74 = arith.constant 0 : index
    %50 = vector.load %arg7[%c1_72, %c0_73, %c0_74] : memref<18x18x8xf32, #tpu.memory_space<vmem>>, vector<16x16x8xf32>
    %51 = vector.shape_cast %50 : vector<16x16x8xf32> to vector<256x8xf32>
    %c0_75 = arith.constant 0 : index
    %c24_76 = arith.constant 24 : index
    %52 = vector.load %arg8[%c0_75, %c24_76] : memref<256x72xf32, #tpu.memory_space<vmem>>, vector<256x8xf32>
    tpu.vector_store %arg8[%c0_75, %c24_76], %51 {strides = array<i32>} : memref<256x72xf32, #tpu.memory_space<vmem>>, vector<256x8xf32>,
    %c1_77 = arith.constant 1 : index
    %c1_78 = arith.constant 1 : index
    %c0_79 = arith.constant 0 : index
    %53 = vector.load %arg7[%c1_77, %c1_78, %c0_79] : memref<18x18x8xf32, #tpu.memory_space<vmem>>, vector<16x16x8xf32>
    %54 = vector.shape_cast %53 : vector<16x16x8xf32> to vector<256x8xf32>
    %c0_80 = arith.constant 0 : index
    %c32_81 = arith.constant 32 : index
    %55 = vector.load %arg8[%c0_80, %c32_81] : memref<256x72xf32, #tpu.memory_space<vmem>>, vector<256x8xf32>
    tpu.vector_store %arg8[%c0_80, %c32_81], %54 {strides = array<i32>} : memref<256x72xf32, #tpu.memory_space<vmem>>, vector<256x8xf32>,
    %c1_82 = arith.constant 1 : index
    %c2_83 = arith.constant 2 : index
    %c0_84 = arith.constant 0 : index
    %56 = vector.load %arg7[%c1_82, %c2_83, %c0_84] : memref<18x18x8xf32, #tpu.memory_space<vmem>>, vector<16x16x8xf32>
    %57 = vector.shape_cast %56 : vector<16x16x8xf32> to vector<256x8xf32>
    %c0_85 = arith.constant 0 : index
    %c40 = arith.constant 40 : index
    %58 = vector.load %arg8[%c0_85, %c40] : memref<256x72xf32, #tpu.memory_space<vmem>>, vector<256x8xf32>
    tpu.vector_store %arg8[%c0_85, %c40], %57 {strides = array<i32>} : memref<256x72xf32, #tpu.memory_space<vmem>>, vector<256x8xf32>,
    %c2_86 = arith.constant 2 : index
    %c0_87 = arith.constant 0 : index
    %c0_88 = arith.constant 0 : index
    %59 = vector.load %arg7[%c2_86, %c0_87, %c0_88] : memref<18x18x8xf32, #tpu.memory_space<vmem>>, vector<16x16x8xf32>
    %60 = vector.shape_cast %59 : vector<16x16x8xf32> to vector<256x8xf32>
    %c0_89 = arith.constant 0 : index
    %c48 = arith.constant 48 : index
    %61 = vector.load %arg8[%c0_89, %c48] : memref<256x72xf32, #tpu.memory_space<vmem>>, vector<256x8xf32>
    tpu.vector_store %arg8[%c0_89, %c48], %60 {strides = array<i32>} : memref<256x72xf32, #tpu.memory_space<vmem>>, vector<256x8xf32>,
    %c2_90 = arith.constant 2 : index
    %c1_91 = arith.constant 1 : index
    %c0_92 = arith.constant 0 : index
    %62 = vector.load %arg7[%c2_90, %c1_91, %c0_92] : memref<18x18x8xf32, #tpu.memory_space<vmem>>, vector<16x16x8xf32>
    %63 = vector.shape_cast %62 : vector<16x16x8xf32> to vector<256x8xf32>
    %c0_93 = arith.constant 0 : index
    %c56 = arith.constant 56 : index
    %64 = vector.load %arg8[%c0_93, %c56] : memref<256x72xf32, #tpu.memory_space<vmem>>, vector<256x8xf32>
    tpu.vector_store %arg8[%c0_93, %c56], %63 {strides = array<i32>} : memref<256x72xf32, #tpu.memory_space<vmem>>, vector<256x8xf32>,
    %c2_94 = arith.constant 2 : index
    %c2_95 = arith.constant 2 : index
    %c0_96 = arith.constant 0 : index
    %65 = vector.load %arg7[%c2_94, %c2_95, %c0_96] : memref<18x18x8xf32, #tpu.memory_space<vmem>>, vector<16x16x8xf32>
    %66 = vector.shape_cast %65 : vector<16x16x8xf32> to vector<256x8xf32>
    %c0_97 = arith.constant 0 : index
    %c64 = arith.constant 64 : index
    %67 = vector.load %arg8[%c0_97, %c64] : memref<256x72xf32, #tpu.memory_space<vmem>>, vector<256x8xf32>
    tpu.vector_store %arg8[%c0_97, %c64], %66 {strides = array<i32>} : memref<256x72xf32, #tpu.memory_space<vmem>>, vector<256x8xf32>,
    %c0_98 = arith.constant 0 : index
    %c0_99 = arith.constant 0 : index
    %68 = vector.load %arg3[%c0_98, %c0_99] : memref<4x72xf32, #tpu.memory_space<vmem>>, vector<4x72xf32>
    %c0_100 = arith.constant 0 : index
    %c0_101 = arith.constant 0 : index
    %69 = vector.load %arg8[%c0_100, %c0_101] : memref<256x72xf32, #tpu.memory_space<vmem>>, vector<256x72xf32>
    %cst_102 = arith.constant dense<0.000000e+00> : vector<4x256xf32>
    %70 = tpu.matmul %68, %69, %cst_102 {dimension_numbers = #tpu.dot_dimension_numbers<[1], [1], [0], [0], [0, 0, 1, 0], [], []>} : vector<4x72xf32>, vector<256x72xf32>, vector<4x256xf32> -> vector<4x256xf32>
    %cst_103 = arith.constant 0.000000e+00 : f32
    %71 = vector.broadcast %cst_103 : f32 to vector<4x256xf32>
    %72 = arith.maximumf %70, %71 : vector<4x256xf32>
    %c0_104 = arith.constant 0 : index
    %c0_105 = arith.constant 0 : index
    %c0_106 = arith.constant 0 : index
    %73 = vector.load %arg4[%c0_104, %c0_105, %c0_106] : memref<1x4x256xf32, #tpu.memory_space<vmem>>, vector<1x4x256xf32>
    %74 = vector.shape_cast %73 : vector<1x4x256xf32> to vector<4x256xf32>
    %75 = vector.shape_cast %72 : vector<4x256xf32> to vector<1x4x256xf32>
    tpu.vector_store %arg4[%c0_104, %c0_105, %c0_106], %75 {strides = array<i32>} : memref<1x4x256xf32, #tpu.memory_space<vmem>>, vector<1x4x256xf32>,
    return
  }
  func.func @transform_0(%arg0: i32) -> (i32, i32, i32, i32) {
    %c0_i32 = arith.constant 0 : i32
    %c0_i32_0 = arith.constant 0 : i32
    %c0_i32_1 = arith.constant 0 : i32
    %c0_i32_2 = arith.constant 0 : i32
    return %arg0, %c0_i32, %c0_i32_0, %c0_i32_1 : i32, i32, i32, i32
  }
  func.func @transform_1(%arg0: i32) -> (i32, i32) {
    %c0_i32 = arith.constant 0 : i32
    %c0_i32_0 = arith.constant 0 : i32
    %c0_i32_1 = arith.constant 0 : i32
    return %c0_i32, %c0_i32_0 : i32, i32
  }
  func.func @transform_2(%arg0: i32) -> (i32, i32) {
    %c0_i32 = arith.constant 0 : i32
    %c0_i32_0 = arith.constant 0 : i32
    %c0_i32_1 = arith.constant 0 : i32
    return %c0_i32, %c0_i32_0 : i32, i32
  }
  func.func @transform_3(%arg0: i32) -> (i32, i32, i32) {
    %c0_i32 = arith.constant 0 : i32
    %c0_i32_0 = arith.constant 0 : i32
    %c0_i32_1 = arith.constant 0 : i32
    return %arg0, %c0_i32, %c0_i32_0 : i32, i32, i32
  }
}

</mosaic_0001>

<bundles_post_ra>
// kernel: fpn_head_forward.1
= control target key start
LH: loop header
LB: loop body
LE: loop exit
PB: predicated region body
PF: predicated region fallthrough
CT: control target
= control target key end

     0   :  { %s4586_s12 = smov 0   ;;  %s6789_s0 = inlined_call_operand.vmem [shape: f32[2,16,16,4], index: 0, kind: input, shape index: {}]   ;;  %s6790_s1 = inlined_call_operand.vmem [shape: f32[36,8], index: 1, kind: input, shape index: {}]   ;;  %s6791_s2 = inlined_call_operand.vmem [shape: f32[4,72], index: 2, kind: input, shape index: {}]   ;;  %s6792_s3 = inlined_call_operand.vmem [shape: f32[2,4,256], index: 3, kind: output, shape index: {}]  }
   0x1 LB: > { %s4260_s13 = sadd.s32 4294967295, %s4551_s12   ;;  %p4264_p0 = scmp.ge.s32.totalorder %s4551_s12, 1  ;;  %s4551_s12 = sphi %s4586_s12, %s13_s12  }
   0x2   : > { %p137_p1 = scmp.lt.s32.totalorder %s4551_s12, 3 }
   0x4   : > { %p138_p2 = pnand %p4264_p0, %p137_p1 }
   0x6   : > { %141 = sbr.rel (%p138_p2) target bundleno = 1690 (0x69a), region = 32 }
   0xd   : > { %vm171_vm0 = vcmask 31744   ;;  %p4596_p3 = scmp.lt.s32.totalorder %s4260_s13, 1  ;;  %vm174_vm1 = vcmask 25600   ;;  %v6793_v0 = vmov 0.0   ;;  %s4554_s19 = smov 4   ;;  %vm516_vm2 = vcmask 64544  }
   0xe   : > { %172 = vst.msk [vmem:[#allocation2] sm:$0xff] %vm171_vm0, %v6793_v0  ;;  %173 = vst.msk [vmem:[#allocation2 + $0x8] sm:$0xff] %vm171_vm0, %v6793_v0  ;;  %s4555_s20 = smov 8   ;;  %s4556_s21 = smov 12   ;;  %vm709_vm3 = vcmask 97344   ;;  %vm902_vm4 = vcmask 130144  }
   0xf   : > { %176 = vst.msk [vmem:[#allocation2 + $0x18] sm:$0xff] %vm171_vm0, %v6793_v0  ;;  %177 = vst.msk [vmem:[#allocation2 + $0x20] sm:$0xff] %vm171_vm0, %v6793_v0  ;;  %s6907_s13 = smov (!%p4596_p3, %s4260_s13), 1  ;;  %s4557_s22 = smov 16   ;;  %vm1095_vm5 = vcmask 162944   ;;  %vm2035_vm6 = vcmask 1043456  }
  0x10   : > { %179 = vst.msk [vmem:[#allocation2 + $0x30] sm:$0xff] %vm171_vm0, %v6793_v0  ;;  %180 = vst.msk [vmem:[#allocation2 + $0x38] sm:$0xff] %vm171_vm0, %v6793_v0  ;;  %s4337_s15 = sshll.u32 %s6907_s13, 8  ;;  %s4558_s23 = smov 20   ;;  %vm1288_vm7 = vcmask 195744   ;;  %vm1482_vm8 = vcmask 228544  }
  0x11   : > { %182 = vst.msk [vmem:[#allocation2 + $0x48] sm:$0xff] %vm171_vm0, %v6793_v0  ;;  %183 = vst.msk [vmem:[#allocation2 + $0x50] sm:$0xff] %vm171_vm0, %v6793_v0  ;;  %s4718_s18 = scalar_lea.vmem %s6789_s0, %s4337_s15  ;;  %s4559_s24 = smov 24   ;;  %vm1675_vm9 = vcmask 261344   ;;  %vm1868_vm10 = vcmask 294144   ;;  %vm1938_vm11 = vcmask 293888  }
  0x12   : > { %185 = vst.msk [vmem:[#allocation2 + $0x60] sm:$0xff] %vm171_vm0, %v6793_v0  ;;  %186 = vst.msk [vmem:[#allocation2 + $0x68] sm:$0xff] %vm171_vm0, %v6793_v0  ;;  %v227_v1 = vld [vmem:[%s4718_s18] sm:$0xff]  ;;  %v228_v2 = vld [vmem:[%s4718_s18 + $0x8] sm:$0xff]  ;;  %s4560_s6 = smov 28   ;;  %s4561_s9 = smov 32  }
  0x13   : > { %188 = vst.msk [vmem:[#allocation2 + $0x78] sm:$0xff] %vm171_vm0, %v6793_v0  ;;  %189 = vst.msk [vmem:[#allocation2 + $0x80] sm:$0xff] %vm171_vm0, %v6793_v0  ;;  %v229_v3 = vld [vmem:[%s4718_s18 + $0x10] sm:$0xff]  ;;  %v230_v4 = vld [vmem:[%s4718_s18 + $0x18] sm:$0xff]  ;;  %vm2296_vm12 = vcmask 64512   ;;  %vm2299_vm13 = vcmask 58368  }
  0x14   : > { %191 = vst.msk [vmem:[#allocation2 + $0x90] sm:$0xff] %vm171_vm0, %v6793_v0  ;;  %192 = vst.msk [vmem:[#allocation2 + $0x98] sm:$0xff] %vm171_vm0, %v6793_v0  ;;  %v231_v5 = vld [vmem:[%s4718_s18 + $0x20] sm:$0xff]  ;;  %v232_v6 = vld [vmem:[%s4718_s18 + $0x28] sm:$0xff]  ;;  %vm2609_vm14 = vcmask 130112   ;;  %s4562_s10 = smov 40  }
  0x15   : > { %194 = vst.msk [vmem:[#allocation2 + $0xa8] sm:$0xff] %vm171_vm0, %v6793_v0  ;;  %195 = vst.msk [vmem:[#allocation2 + $0xb0] sm:$0xff] %vm171_vm0, %v6793_v0  ;;  %v356_v7 = vld [vmem:[#allocation2 + $0x1] sm:$0xff]  ;;  %v233_v9 = vld [vmem:[%s4718_s18 + $0x30] sm:$0xff]  ;;  %s4563_s11 = smov 48   ;;  %vm2802_vm15 = vcmask 195712  }
  0x16   : > { %197 = vst.msk [vmem:[#allocation2 + $0xc0] sm:$0xff] %vm171_vm0, %v6793_v0  ;;  %198 = vst.msk [vmem:[#allocation2 + $0xc8] sm:$0xff] %vm171_vm0, %v6793_v0  ;;  %420 = vrot.lane.b32.xlu0 %v356_v7, %s4554_s19  ;;  %v234_v10 = vld [vmem:[%s4718_s18 + $0x38] sm:$0xff]  ;;  %v235_v11 = vld [vmem:[%s4718_s18 + $0x40] sm:$0xff]  ;;  %s4564_s14 = smov 56   ;;  %s4565_s15 = smov 64  }
  0x17   : > { %200 = vst.msk [vmem:[#allocation2 + $0xd8] sm:$0xff] %vm171_vm0, %v6793_v0  ;;  %201 = vst.msk [vmem:[#allocation2 + $0xe0] sm:$0xff] %vm171_vm0, %v6793_v0  ;;  %v236_v12 = vld [vmem:[%s4718_s18 + $0x48] sm:$0xff]  ;;  %v237_v13 = vld [vmem:[%s4718_s18 + $0x50] sm:$0xff] }
  0x18   : > { %203 = vst.msk [vmem:[#allocation2 + $0xf0] sm:$0xff] %vm171_vm0, %v6793_v0  ;;  %204 = vst.msk [vmem:[#allocation2 + $0xf8] sm:$0xff] %vm171_vm0, %v6793_v0  ;;  %v238_v14 = vld [vmem:[%s4718_s18 + $0x58] sm:$0xff]  ;;  %v239_v15 = vld [vmem:[%s4718_s18 + $0x60] sm:$0xff] }
  0x19   : > { %206 = vst.msk [vmem:[#allocation2 + $0x108] sm:$0xff] %vm171_vm0, %v6793_v0  ;;  %207 = vst.msk [vmem:[#allocation2 + $0x110] sm:$0xff] %vm171_vm0, %v6793_v0  ;;  %v240_v16 = vld [vmem:[%s4718_s18 + $0x68] sm:$0xff]  ;;  %v241_v17 = vld [vmem:[%s4718_s18 + $0x70] sm:$0xff] }
  0x1a   : > { %209 = vst.msk [vmem:[#allocation2 + $0x120] sm:$0xff] %vm171_vm0, %v6793_v0  ;;  %210 = vst.msk [vmem:[#allocation2 + $0x128] sm:$0xff] %vm171_vm0, %v6793_v0  ;;  %v242_v18 = vld [vmem:[%s4718_s18 + $0x78] sm:$0xff]  ;;  %v243_v19 = vld [vmem:[%s4718_s18 + $0x80] sm:$0xff] }
  0x1b   : > { %212 = vst.msk [vmem:[#allocation2 + $0x138] sm:$0xff] %vm171_vm0, %v6793_v0  ;;  %213 = vst.msk [vmem:[#allocation2 + $0x140] sm:$0xff] %vm171_vm0, %v6793_v0  ;;  %v244_v20 = vld [vmem:[%s4718_s18 + $0x88] sm:$0xff]  ;;  %v245_v21 = vld [vmem:[%s4718_s18 + $0x90] sm:$0xff] }
  0x1c   : > { %215 = vst.msk [vmem:[#allocation2 + $0x150] sm:$0xff] %vm171_vm0, %v6793_v0  ;;  %216 = vst.msk [vmem:[#allocation2 + $0x158] sm:$0xff] %vm171_vm0, %v6793_v0  ;;  %v246_v22 = vld [vmem:[%s4718_s18 + $0x98] sm:$0xff]  ;;  %v247_v23 = vld [vmem:[%s4718_s18 + $0xa0] sm:$0xff] }
  0x1d   : > { %218 = vst.msk [vmem:[#allocation2 + $0x168] sm:$0xff] %vm171_vm0, %v6793_v0  ;;  %219 = vst.msk [vmem:[#allocation2 + $0x170] sm:$0xff] %vm171_vm0, %v6793_v0  ;;  %v248_v24 = vld [vmem:[%s4718_s18 + $0xa8] sm:$0xff]  ;;  %v249_v28 = vld [vmem:[%s4718_s18 + $0xb0] sm:$0xff] }
  0x1e   : > { %221 = vst.msk [vmem:[#allocation2 + $0x180] sm:$0xff] %vm171_vm0, %v6793_v0  ;;  %222 = vst.msk [vmem:[#allocation2 + $0x188] sm:$0xff] %vm171_vm0, %v6793_v0  ;;  %v250_v29 = vld [vmem:[%s4718_s18 + $0xb8] sm:$0xff]  ;;  %v251_v33 = vld [vmem:[%s4718_s18 + $0xc0] sm:$0xff] }
  0x1f   : > { %224 = vst.msk [vmem:[#allocation2 + $0x198] sm:$0xff] %vm171_vm0, %v6793_v0  ;;  %225 = vst.msk [vmem:[#allocation2 + $0x1a0] sm:$0xff] %vm171_vm0, %v6793_v0  ;;  %v252_v34 = vld [vmem:[%s4718_s18 + $0xc8] sm:$0xff]  ;;  %v253_v35 = vld [vmem:[%s4718_s18 + $0xd0] sm:$0xff] }
  0x20   : > { %175 = vst.msk [vmem:[#allocation2 + $0x10] sm:$0x3] %vm174_vm1, %v6793_v0  ;;  %178 = vst.msk [vmem:[#allocation2 + $0x28] sm:$0x3] %vm174_vm1, %v6793_v0  ;;  %v254_v36 = vld [vmem:[%s4718_s18 + $0xd8] sm:$0xff]  ;;  %v255_v37 = vld [vmem:[%s4718_s18 + $0xe0] sm:$0xff] }
  0x21   : > { %181 = vst.msk [vmem:[#allocation2 + $0x40] sm:$0x3] %vm174_vm1, %v6793_v0  ;;  %184 = vst.msk [vmem:[#allocation2 + $0x58] sm:$0x3] %vm174_vm1, %v6793_v0  ;;  %v256_v38 = vld [vmem:[%s4718_s18 + $0xe8] sm:$0xff]  ;;  %v292_v45 = vld [vmem:[#allocation2] sm:$0xff] }
  0x22   : > { %187 = vst.msk [vmem:[#allocation2 + $0x70] sm:$0x3] %vm174_vm1, %v6793_v0  ;;  %190 = vst.msk [vmem:[#allocation2 + $0x88] sm:$0x3] %vm174_vm1, %v6793_v0  ;;  %v293_v48 = vld [vmem:[#allocation2 + $0x8] sm:$0xff] }
  0x23   : > { %193 = vst.msk [vmem:[#allocation2 + $0xa0] sm:$0x3] %vm174_vm1, %v6793_v0  ;;  %196 = vst.msk [vmem:[#allocation2 + $0xb8] sm:$0x3] %vm174_vm1, %v6793_v0 }
  0x24   : > { %199 = vst.msk [vmem:[#allocation2 + $0xd0] sm:$0x3] %vm174_vm1, %v6793_v0  ;;  %202 = vst.msk [vmem:[#allocation2 + $0xe8] sm:$0x3] %vm174_vm1, %v6793_v0 }
  0x25   : > { %205 = vst.msk [vmem:[#allocation2 + $0x100] sm:$0x3] %vm174_vm1, %v6793_v0  ;;  %208 = vst.msk [vmem:[#allocation2 + $0x118] sm:$0x3] %vm174_vm1, %v6793_v0 }
  0x26   : > { %211 = vst.msk [vmem:[#allocation2 + $0x130] sm:$0x3] %vm174_vm1, %v6793_v0  ;;  %214 = vst.msk [vmem:[#allocation2 + $0x148] sm:$0x3] %vm174_vm1, %v6793_v0 }
  0x27   : > { %217 = vst.msk [vmem:[#allocation2 + $0x160] sm:$0x3] %vm174_vm1, %v6793_v0  ;;  %220 = vst.msk [vmem:[#allocation2 + $0x178] sm:$0x3] %vm174_vm1, %v6793_v0  ;;  %v357_v8 = vld [vmem:[#allocation2 + $0x9] sm:$0xff] }
  0x28   : > { %223 = vst.msk [vmem:[#allocation2 + $0x190] sm:$0x3] %vm174_vm1, %v6793_v0  ;;  %226 = vst.msk [vmem:[#allocation2 + $0x1a8] sm:$0x3] %vm174_vm1, %v6793_v0  ;;  %422 = vrot.lane.b32.xlu0 %v357_v8, %s4554_s19  ;;  %vm3188_vm1 = vcmask 326912  }
  0x29   : > { %260 = vst.msk [vmem:[#allocation2 + $0x19] sm:$0xff] %vm171_vm0, %v227_v1  ;;  %261 = vst.msk [vmem:[#allocation2 + $0x21] sm:$0xff] %vm171_vm0, %v228_v2 }
  0x2a   : > { %262 = vst.msk [vmem:[#allocation2 + $0x31] sm:$0xff] %vm171_vm0, %v229_v3  ;;  %263 = vst.msk [vmem:[#allocation2 + $0x39] sm:$0xff] %vm171_vm0, %v230_v4 }
  0x2b   : > { %264 = vst.msk [vmem:[#allocation2 + $0x49] sm:$0xff] %vm171_vm0, %v231_v5  ;;  %265 = vst.msk [vmem:[#allocation2 + $0x51] sm:$0xff] %vm171_vm0, %v232_v6 }
  0x2c   : > { %266 = vst.msk [vmem:[#allocation2 + $0x61] sm:$0xff] %vm171_vm0, %v233_v9  ;;  %267 = vst.msk [vmem:[#allocation2 + $0x69] sm:$0xff] %vm171_vm0, %v234_v10 }
  0x2d   : > { %268 = vst.msk [vmem:[#allocation2 + $0x79] sm:$0xff] %vm171_vm0, %v235_v11  ;;  %269 = vst.msk [vmem:[#allocation2 + $0x81] sm:$0xff] %vm171_vm0, %v236_v12 }
  0x2e   : > { %270 = vst.msk [vmem:[#allocation2 + $0x91] sm:$0xff] %vm171_vm0, %v237_v13  ;;  %271 = vst.msk [vmem:[#allocation2 + $0x99] sm:$0xff] %vm171_vm0, %v238_v14 }
  0x2f   : > { %272 = vst.msk [vmem:[#allocation2 + $0xa9] sm:$0xff] %vm171_vm0, %v239_v15  ;;  %273 = vst.msk [vmem:[#allocation2 + $0xb1] sm:$0xff] %vm171_vm0, %v240_v16 }
  0x30   : > { %274 = vst.msk [vmem:[#allocation2 + $0xc1] sm:$0xff] %vm171_vm0, %v241_v17  ;;  %275 = vst.msk [vmem:[#allocation2 + $0xc9] sm:$0xff] %vm171_vm0, %v242_v18  ;;  %v4763_v25 = vld [vmem:[#allocation2 + $0x19] sm:$0xff]  ;;  %v4772_v27 = vld [vmem:[#allocation2 + $0x21] sm:$0xff] }
  0x31   : > { %276 = vst.msk [vmem:[#allocation2 + $0xd9] sm:$0xff] %vm171_vm0, %v243_v19  ;;  %277 = vst.msk [vmem:[#allocation2 + $0xe1] sm:$0xff] %vm171_vm0, %v244_v20  ;;  %v4765_v26 = vld [vmem:[#allocation2 + $0x31] sm:$0xff]  ;;  %424 = vrot.lane.b32.xlu1 %v4763_v25, %s4554_s19  ;;  %v4784_v31 = vld [vmem:[#allocation2 + $0x39] sm:$0xff] }
  0x32   : > { %278 = vst.msk [vmem:[#allocation2 + $0xf1] sm:$0xff] %vm171_vm0, %v245_v21  ;;  %279 = vst.msk [vmem:[#allocation2 + $0xf9] sm:$0xff] %vm171_vm0, %v246_v22  ;;  %428 = vrot.lane.b32.xlu0 %v4765_v26, %s4554_s19  ;;  %v4780_v30 = vld [vmem:[#allocation2 + $0x49] sm:$0xff]  ;;  %v4801_v39 = vld [vmem:[#allocation2 + $0x51] sm:$0xff] }
  0x33   : > { %280 = vst.msk [vmem:[#allocation2 + $0x109] sm:$0xff] %vm171_vm0, %v247_v23  ;;  %281 = vst.msk [vmem:[#allocation2 + $0x111] sm:$0xff] %vm171_vm0, %v248_v24  ;;  %v4788_v32 = vld [vmem:[#allocation2 + $0x61] sm:$0xff]  ;;  %v4812_v41 = vld [vmem:[#allocation2 + $0x69] sm:$0xff] }
  0x34   : > { %282 = vst.msk [vmem:[#allocation2 + $0x121] sm:$0xff] %vm171_vm0, %v249_v28  ;;  %283 = vst.msk [vmem:[#allocation2 + $0x129] sm:$0xff] %vm171_vm0, %v250_v29  ;;  %v4808_v40 = vld [vmem:[#allocation2 + $0x79] sm:$0xff]  ;;  %v4820_v43 = vld [vmem:[#allocation2 + $0x81] sm:$0xff] }
  0x35   : > { %426 = vrot.lane.b32.xlu1 %v4772_v27, %s4554_s19  ;;  %284 = vst.msk [vmem:[#allocation2 + $0x139] sm:$0xff] %vm171_vm0, %v251_v33  ;;  %285 = vst.msk [vmem:[#allocation2 + $0x141] sm:$0xff] %vm171_vm0, %v252_v34  ;;  %v4816_v42 = vld [vmem:[#allocation2 + $0x91] sm:$0xff]  ;;  %v4828_v46 = vld [vmem:[#allocation2 + $0x99] sm:$0xff] }
  0x36   : > { %432 = vrot.lane.b32.xlu0 %v4780_v30, %s4554_s19  ;;  %286 = vst.msk [vmem:[#allocation2 + $0x151] sm:$0xff] %vm171_vm0, %v253_v35  ;;  %287 = vst.msk [vmem:[#allocation2 + $0x159] sm:$0xff] %vm171_vm0, %v254_v36  ;;  %v4824_v44 = vld [vmem:[#allocation2 + $0xa9] sm:$0xff]  ;;  %v4831_v47 = vld [vmem:[#allocation2 + $0x18] sm:$0xff] }
  0x37   : > { %288 = vst.msk [vmem:[#allocation2 + $0x169] sm:$0xff] %vm171_vm0, %v255_v37  ;;  %289 = vst.msk [vmem:[#allocation2 + $0x171] sm:$0xff] %vm171_vm0, %v256_v38  ;;  %v4838_v49 = vld [vmem:[#allocation2 + $0x20] sm:$0xff]  ;;  %v4840_v50 = vld [vmem:[#allocation2 + $0x30] sm:$0xff] }
  0x38   : > { %324 = vst.msk [vmem:[#allocation3] sm:$0xff] %vm171_vm0, %v292_v45  ;;  %326 = vst.msk [vmem:[#allocation3 + $0x10] sm:$0xff] %vm171_vm0, %v4831_v47  ;;  %v4842_v51 = vld [vmem:[#allocation2 + $0xc1] sm:$0xff]  ;;  %v4848_v52 = vld [vmem:[#allocation2 + $0x38] sm:$0xff] }
  0x39   : > { %430 = vrot.lane.b32.xlu1 %v4784_v31, %s4554_s19  ;;  %325 = vst.msk [vmem:[#allocation3 + $0x8] sm:$0xff] %vm171_vm0, %v293_v48  ;;  %327 = vst.msk [vmem:[#allocation3 + $0x18] sm:$0xff] %vm171_vm0, %v4838_v49  ;;  %v4852_v53 = vld [vmem:[#allocation2 + $0xb1] sm:$0xff]  ;;  %v4856_v54 = vld [vmem:[#allocation2 + $0x48] sm:$0xff] }
  0x3a   : > { %436 = vrot.lane.b32.xlu0 %v4788_v32, %s4554_s19  ;;  %328 = vst.msk [vmem:[#allocation3 + $0x20] sm:$0xff] %vm171_vm0, %v4840_v50  ;;  %329 = vst.msk [vmem:[#allocation3 + $0x28] sm:$0xff] %vm171_vm0, %v4848_v52  ;;  %v4858_v55 = vld [vmem:[#allocation2 + $0x50] sm:$0xff]  ;;  %v4860_v56 = vld [vmem:[#allocation2 + $0xd9] sm:$0xff] }
  0x3b   : > { %330 = vst.msk [vmem:[#allocation3 + $0x30] sm:$0xff] %vm171_vm0, %v4856_v54  ;;  %331 = vst.msk [vmem:[#allocation3 + $0x38] sm:$0xff] %vm171_vm0, %v4858_v55  ;;  %v4866_v57 = vld [vmem:[#allocation2 + $0x60] sm:$0xff]  ;;  %v4868_v58 = vld [vmem:[#allocation2 + $0x68] sm:$0xff] }
  0x3c   : > { %v4870_v59 = vld [vmem:[#allocation2 + $0x78] sm:$0xff]  ;;  %332 = vst.msk [vmem:[#allocation3 + $0x40] sm:$0xff] %vm171_vm0, %v4866_v57  ;;  %333 = vst.msk [vmem:[#allocation3 + $0x48] sm:$0xff] %vm171_vm0, %v4868_v58  ;;  %v4880_v60 = vld [vmem:[#allocation2 + $0x80] sm:$0xff] }
  0x3d   : > { %434 = vrot.lane.b32.xlu1 %v4801_v39, %s4554_s19  ;;  %334 = vst.msk [vmem:[#allocation3 + $0x50] sm:$0xff] %vm171_vm0, %v4870_v59  ;;  %v4882_v61 = vld [vmem:[#allocation2 + $0x90] sm:$0xff]  ;;  %v4884_v62 = vld [vmem:[#allocation2 + $0x98] sm:$0xff]  ;;  %335 = vst.msk [vmem:[#allocation3 + $0x58] sm:$0xff] %vm171_vm0, %v4880_v60 }
  0x3e   : > { %440 = vrot.lane.b32.xlu0 %v4808_v40, %s4554_s19  ;;  %v4886_v63 = vld [vmem:[#allocation2 + $0xc9] sm:$0xff]  ;;  %336 = vst.msk [vmem:[#allocation3 + $0x60] sm:$0xff] %vm171_vm0, %v4882_v61  ;;  %337 = vst.msk [vmem:[#allocation3 + $0x68] sm:$0xff] %vm171_vm0, %v4884_v62  ;;  %v4898_v3 = vld [vmem:[#allocation2 + $0xc0] sm:$0xff] }
  0x3f   : > { %v4894_v1 = vld [vmem:[#allocation2 + $0xa8] sm:$0xff]  ;;  %v4896_v2 = vld [vmem:[#allocation2 + $0xb0] sm:$0xff]  ;;  %340 = vst.msk [vmem:[#allocation3 + $0x80] sm:$0xff] %vm171_vm0, %v4898_v3  ;;  %v4910_v5 = vld [vmem:[#allocation2 + $0xd8] sm:$0xff] }
  0x40   : > { %338 = vst.msk [vmem:[#allocation3 + $0x70] sm:$0xff] %vm171_vm0, %v4894_v1  ;;  %339 = vst.msk [vmem:[#allocation3 + $0x78] sm:$0xff] %vm171_vm0, %v4896_v2  ;;  %v4908_v4 = vld [vmem:[#allocation2 + $0xc8] sm:$0xff]  ;;  %v4912_v6 = vld [vmem:[#allocation2 + $0xe0] sm:$0xff] }
  0x41   : > { %438 = vrot.lane.b32.xlu1 %v4812_v41, %s4554_s19  ;;  %341 = vst.msk [vmem:[#allocation3 + $0x88] sm:$0xff] %vm171_vm0, %v4908_v4  ;;  %342 = vst.msk [vmem:[#allocation3 + $0x90] sm:$0xff] %vm171_vm0, %v4910_v5  ;;  %v4920_v7 = vld [vmem:[#allocation2 + $0xf0] sm:$0xff]  ;;  %v4922_v8 = vld [vmem:[#allocation2 + $0xf8] sm:$0xff] }
  0x42   : > { %444 = vrot.lane.b32.xlu0 %v4816_v42, %s4554_s19  ;;  %343 = vst.msk [vmem:[#allocation3 + $0x98] sm:$0xff] %vm171_vm0, %v4912_v6  ;;  %v4924_v9 = vld [vmem:[#allocation2 + $0x108] sm:$0xff]  ;;  %344 = vst.msk [vmem:[#allocation3 + $0xa0] sm:$0xff] %vm171_vm0, %v4920_v7  ;;  %v4934_v10 = vld [vmem:[#allocation2 + $0x110] sm:$0xff] }
  0x43   : > { %345 = vst.msk [vmem:[#allocation3 + $0xa8] sm:$0xff] %vm171_vm0, %v4922_v8  ;;  %346 = vst.msk [vmem:[#allocation3 + $0xb0] sm:$0xff] %vm171_vm0, %v4924_v9  ;;  %v4936_v11 = vld [vmem:[#allocation2 + $0xf1] sm:$0xff]  ;;  %v4940_v12 = vld [vmem:[#allocation2 + $0x120] sm:$0xff] }
  0x44   : > { %347 = vst.msk [vmem:[#allocation3 + $0xb8] sm:$0xff] %vm171_vm0, %v4934_v10  ;;  %348 = vst.msk [vmem:[#allocation3 + $0xc0] sm:$0xff] %vm171_vm0, %v4940_v12  ;;  %v4946_v13 = vld [vmem:[#allocation2 + $0x128] sm:$0xff]  ;;  %v4956_v16 = vld [vmem:[#allocation2 + $0x138] sm:$0xff] }
  0x45   : > { %442 = vrot.lane.b32.xlu1 %v4820_v43, %s4554_s19  ;;  %v4948_v14 = vld [vmem:[#allocation2 + $0xe1] sm:$0xff]  ;;  %349 = vst.msk [vmem:[#allocation3 + $0xc8] sm:$0xff] %vm171_vm0, %v4946_v13  ;;  %v4954_v15 = vld [vmem:[#allocation2 + $0x109] sm:$0xff]  ;;  %350 = vst.msk [vmem:[#allocation3 + $0xd0] sm:$0xff] %vm171_vm0, %v4956_v16 }
  0x46   : > { %448 = vrot.lane.b32.xlu0 %v4824_v44, %s4554_s19  ;;  %v4962_v17 = vld [vmem:[#allocation2 + $0x140] sm:$0xff]  ;;  %v4972_v20 = vld [vmem:[#allocation2 + $0x150] sm:$0xff]  ;;  %v4978_v21 = vld [vmem:[#allocation2 + $0x158] sm:$0xff] }
  0x47   : > { %v4964_v18 = vld [vmem:[#allocation2 + $0xf9] sm:$0xff]  ;;  %351 = vst.msk [vmem:[#allocation3 + $0xd8] sm:$0xff] %vm171_vm0, %v4962_v17  ;;  %v4970_v19 = vld [vmem:[#allocation2 + $0x121] sm:$0xff]  ;;  %352 = vst.msk [vmem:[#allocation3 + $0xe0] sm:$0xff] %vm171_vm0, %v4972_v20 }
  0x48   : > { %v4980_v22 = vld [vmem:[#allocation2 + $0x111] sm:$0xff]  ;;  %353 = vst.msk [vmem:[#allocation3 + $0xe8] sm:$0xff] %vm171_vm0, %v4978_v21  ;;  %v4986_v23 = vld [vmem:[#allocation2 + $0x139] sm:$0xff]  ;;  %v4988_v24 = vld [vmem:[#allocation2 + $0x168] sm:$0xff] }
  0x49   : > { %446 = vrot.lane.b32.xlu1 %v4828_v46, %s4554_s19  ;;  %354 = vst.msk [vmem:[#allocation3 + $0xf0] sm:$0xff] %vm171_vm0, %v4988_v24  ;;  %v4994_v28 = vld [vmem:[#allocation2 + $0x170] sm:$0xff]  ;;  %v5006_v34 = vld [vmem:[#allocation2 + $0x141] sm:$0xff]  ;;  %v258_v37 = vld [vmem:[%s4718_s18 + $0xf8] sm:$0xff] }
  0x4a   : > { %452 = vrot.lane.b32.xlu0 %v4842_v51, %s4554_s19  ;;  %v4996_v29 = vld [vmem:[#allocation2 + $0x129] sm:$0xff]  ;;  %355 = vst.msk [vmem:[#allocation3 + $0xf8] sm:$0xff] %vm171_vm0, %v4994_v28  ;;  %v5002_v33 = vld [vmem:[#allocation2 + $0x151] sm:$0xff]  ;;  %6833 = vst [vmem:[#allocation6_spill] sm:$0xff] %v5006_v34 }
  0x4b   : > { %v257_v35 = vld [vmem:[%s4718_s18 + $0xf0] sm:$0xff]  ;;  %291 = vst.msk [vmem:[#allocation2 + $0x189] sm:$0xff] %vm171_vm0, %v258_v37  ;;  %v5018_v38 = vld [vmem:[#allocation2 + $0x159] sm:$0xff]  ;;  %v549_v45 = vld [vmem:[#allocation2 + $0x2] sm:$0xff]  ;;  %s4338_s18 = sshll.u32 %s6907_s13, 3 }
  0x4c   : > { %290 = vst.msk [vmem:[#allocation2 + $0x181] sm:$0xff] %vm171_vm0, %v257_v35  ;;  %v5012_v36 = vld [vmem:[#allocation2 + $0x169] sm:$0xff]  ;;  %6835 = vst [vmem:[#allocation8_spill] sm:$0xff] %v5018_v38  ;;  %v5024_v48 = vld [vmem:[#allocation2 + $0x171] sm:$0xff]  ;;  %vm2995_vm0 = vcmask 261312  }
  0x4d   : > { %450 = vrot.lane.b32.xlu1 %v4852_v53, %s4554_s19  ;;  %6834 = vst [vmem:[#allocation7_spill] sm:$0xff] %v5012_v36  ;;  %6836 = vst [vmem:[#allocation9_spill] sm:$0xff] %v5024_v48  ;;  %v5027_v35 = vld [vmem:[#allocation2 + $0x1a] sm:$0xff]  ;;  %v550_v37 = vld [vmem:[#allocation2 + $0xa] sm:$0xff] }
  0x4e   : > { %456 = vrot.lane.b32.xlu0 %v4860_v56, %s4554_s19  ;;  %6837 = vst [vmem:[#allocation10_spill] sm:$0xff] %v5027_v35  ;;  %v5033_v0 = vld [vmem:[#allocation2 + $0x32] sm:$0xff] }
  0x4f   : > { %6838 = vst [vmem:[#allocation11_spill] sm:$0xff] %v5033_v0 }
  0x51   : > { %454 = vrot.lane.b32.xlu1 %v4886_v63, %s4554_s19 }
  0x52   : > { %460 = vrot.lane.b32.xlu0 %v4936_v11, %s4554_s19 }
  0x55   : > { %458 = vrot.lane.b32.xlu1 %v4948_v14, %s4554_s19 }
  0x56   : > { %464 = vrot.lane.b32.xlu0 %v4954_v15, %s4554_s19 }
  0x59   : > { %462 = vrot.lane.b32.xlu1 %v4964_v18, %s4554_s19 }
  0x5a   : > { %468 = vrot.lane.b32.xlu0 %v4970_v19, %s4554_s19 }
  0x5d   : > { %466 = vrot.lane.b32.xlu1 %v4980_v22, %s4554_s19 }
  0x5e   : > { %472 = vrot.lane.b32.xlu0 %v4986_v23, %s4554_s19 }
  0x61   : > { %470 = vrot.lane.b32.xlu1 %v4996_v29, %s4554_s19 }
  0x62   : > { %476 = vrot.lane.b32.xlu0 %v5002_v33, %s4554_s19 }
  0x65   : > { %474 = vrot.lane.b32.xlu1 %v5006_v34, %s4554_s19 }
  0x66   : > { %480 = vrot.lane.b32.xlu0 %v5012_v36, %s4554_s19  ;;  %v5036_v36 = vld [vmem:[#allocation2 + $0x22] sm:$0xff] }
  0x67   : > { %6839 = vst [vmem:[#allocation12_spill] sm:$0xff] %v5036_v36 }
  0x69   : > { %478 = vrot.lane.b32.xlu1 %v5018_v38, %s4554_s19  ;;  %v5040_v38 = vld [vmem:[#allocation2 + $0x4a] sm:$0xff] }
  0x6a   : > { %613 = vrot.lane.b32.xlu0 %v549_v45, %s4555_s20  ;;  %6840 = vst [vmem:[#allocation13_spill] sm:$0xff] %v5040_v38  ;;  %v5044_v45 = vld [vmem:[#allocation2 + $0x3a] sm:$0xff] }
  0x6b   : > { %6841 = vst [vmem:[#allocation14_spill] sm:$0xff] %v5044_v45 }
  0x6d   : > { %482 = vrot.lane.b32.xlu1 %v5024_v48, %s4554_s19  ;;  %v5134_v48 = vld [vmem:[#allocation2 + $0x142] sm:$0xff] }
  0x6e   : > { %617 = vrot.lane.b32.xlu0 %v5027_v35, %s4555_s20  ;;  %v5048_v35 = vld [vmem:[#allocation2 + $0x62] sm:$0xff]  ;;  %6862 = vst [vmem:[#allocation35_spill] sm:$0xff] %v5134_v48 }
  0x6f   : > { %6842 = vst [vmem:[#allocation15_spill] sm:$0xff] %v5048_v35 }
  0x71   : > { %615 = vrot.lane.b32.xlu1 %v550_v37, %s4555_s20  ;;  %v5052_v37 = vld [vmem:[#allocation2 + $0x52] sm:$0xff] }
  0x72   : > { %621 = vrot.lane.b32.xlu0 %v5033_v0, %s4555_s20  ;;  %6843 = vst [vmem:[#allocation16_spill] sm:$0xff] %v5052_v37  ;;  %v5056_v0 = vld [vmem:[#allocation2 + $0x7a] sm:$0xff] }
  0x73   : > { %6844 = vst [vmem:[#allocation17_spill] sm:$0xff] %v5056_v0 }
  0x75   : > { %619 = vrot.lane.b32.xlu1 %v5036_v36, %s4555_s20  ;;  %v5060_v36 = vld [vmem:[#allocation2 + $0x6a] sm:$0xff] }
  0x76   : > { %625 = vrot.lane.b32.xlu0 %v5040_v38, %s4555_s20  ;;  %6845 = vst [vmem:[#allocation18_spill] sm:$0xff] %v5060_v36  ;;  %v5064_v38 = vld [vmem:[#allocation2 + $0x92] sm:$0xff] }
  0x77   : > { %6846 = vst [vmem:[#allocation19_spill] sm:$0xff] %v5064_v38 }
  0x79   : > { %623 = vrot.lane.b32.xlu1 %v5044_v45, %s4555_s20  ;;  %v5068_v45 = vld [vmem:[#allocation2 + $0x82] sm:$0xff] }
  0x7a   : > { %629 = vrot.lane.b32.xlu0 %v5048_v35, %s4555_s20  ;;  %6847 = vst [vmem:[#allocation20_spill] sm:$0xff] %v5068_v45  ;;  %v5072_v35 = vld [vmem:[#allocation2 + $0xaa] sm:$0xff] }
  0x7b   : > { %6848 = vst [vmem:[#allocation21_spill] sm:$0xff] %v5072_v35 }
  0x7d   : > { %627 = vrot.lane.b32.xlu1 %v5052_v37, %s4555_s20  ;;  %v5076_v37 = vld [vmem:[#allocation2 + $0x9a] sm:$0xff] }
  0x7e   : > { %633 = vrot.lane.b32.xlu0 %v5056_v0, %s4555_s20  ;;  %6849 = vst [vmem:[#allocation22_spill] sm:$0xff] %v5076_v37  ;;  %v5080_v0 = vld [vmem:[#allocation2 + $0xc2] sm:$0xff] }
  0x7f   : > { %6850 = vst [vmem:[#allocation23_spill] sm:$0xff] %v5080_v0 }
  0x81   : > { %631 = vrot.lane.b32.xlu1 %v5060_v36, %s4555_s20  ;;  %v5084_v36 = vld [vmem:[#allocation2 + $0xb2] sm:$0xff] }
  0x82   : > { %637 = vrot.lane.b32.xlu0 %v5064_v38, %s4555_s20  ;;  %6851 = vst [vmem:[#allocation24_spill] sm:$0xff] %v5084_v36  ;;  %v5088_v38 = vld [vmem:[#allocation2 + $0xda] sm:$0xff] }
  0x83   : > { %6852 = vst [vmem:[#allocation25_spill] sm:$0xff] %v5088_v38 }
  0x85   : > { %635 = vrot.lane.b32.xlu1 %v5068_v45, %s4555_s20  ;;  %v5092_v45 = vld [vmem:[#allocation2 + $0xca] sm:$0xff] }
  0x86   : > { %641 = vrot.lane.b32.xlu0 %v5072_v35, %s4555_s20  ;;  %6853 = vst [vmem:[#allocation26_spill] sm:$0xff] %v5092_v45  ;;  %v5096_v35 = vld [vmem:[#allocation2 + $0xf2] sm:$0xff] }
  0x87   : > { %6854 = vst [vmem:[#allocation27_spill] sm:$0xff] %v5096_v35 }
  0x89   : > { %639 = vrot.lane.b32.xlu1 %v5076_v37, %s4555_s20  ;;  %v5100_v37 = vld [vmem:[#allocation2 + $0xe2] sm:$0xff] }
  0x8a   : > { %645 = vrot.lane.b32.xlu0 %v5080_v0, %s4555_s20  ;;  %6855 = vst [vmem:[#allocation28_spill] sm:$0xff] %v5100_v37  ;;  %v5104_v0 = vld [vmem:[#allocation2 + $0x10a] sm:$0xff] }
  0x8b   : > { %6856 = vst [vmem:[#allocation29_spill] sm:$0xff] %v5104_v0 }
  0x8d   : > { %643 = vrot.lane.b32.xlu1 %v5084_v36, %s4555_s20  ;;  %v5108_v36 = vld [vmem:[#allocation2 + $0xfa] sm:$0xff] }
  0x8e   : > { %649 = vrot.lane.b32.xlu0 %v5088_v38, %s4555_s20  ;;  %6857 = vst [vmem:[#allocation30_spill] sm:$0xff] %v5108_v36  ;;  %v5112_v38 = vld [vmem:[#allocation2 + $0x122] sm:$0xff] }
  0x8f   : > { %6858 = vst [vmem:[#allocation31_spill] sm:$0xff] %v5112_v38 }
  0x91   : > { %647 = vrot.lane.b32.xlu1 %v5092_v45, %s4555_s20  ;;  %v5116_v45 = vld [vmem:[#allocation2 + $0x112] sm:$0xff] }
  0x92   : > { %653 = vrot.lane.b32.xlu0 %v5096_v35, %s4555_s20  ;;  %6859 = vst [vmem:[#allocation32_spill] sm:$0xff] %v5116_v45  ;;  %v5120_v35 = vld [vmem:[#allocation2 + $0x13a] sm:$0xff] }
  0x93   : > { %6860 = vst [vmem:[#allocation33_spill] sm:$0xff] %v5120_v35 }
  0x95   : > { %651 = vrot.lane.b32.xlu1 %v5100_v37, %s4555_s20  ;;  %v421_v37 = vpop.permute.xlu0 %420 }
  0x96   : > { %657 = vrot.lane.b32.xlu0 %v5104_v0, %s4555_s20  ;;  %517 = vst.msk [vmem:[#allocation3] sm:$0xff] %vm516_vm2, %v421_v37  ;;  %v5125_v0 = vld [vmem:[#allocation2 + $0x12a] sm:$0xff] }
  0x97   : > { %6861 = vst [vmem:[#allocation34_spill] sm:$0xff] %v5125_v0  ;;  %v5139_v37 = vld [vmem:[#allocation2 + $0x16a] sm:$0xff] }
  0x99   : > { %655 = vrot.lane.b32.xlu1 %v5108_v36, %s4555_s20  ;;  %v5129_v36 = vld [vmem:[#allocation2 + $0x152] sm:$0xff] }
  0x9a   : > { %661 = vrot.lane.b32.xlu0 %v5112_v38, %s4555_s20  ;;  %v423_v38 = vpop.permute.xlu0 %422 }
  0x9b   : > { %518 = vst.msk [vmem:[#allocation3 + $0x8] sm:$0xff] %vm516_vm2, %v423_v38  ;;  %v5152_v38 = vld [vmem:[#allocation2 + $0x172] sm:$0xff] }
  0x9d   : > { %659 = vrot.lane.b32.xlu1 %v5116_v45, %s4555_s20 }
  0x9e   : > { %665 = vrot.lane.b32.xlu0 %v5120_v35, %s4555_s20 }
  0xa1   : > { %663 = vrot.lane.b32.xlu1 %v5125_v0, %s4555_s20  ;;  %v5144_v0 = vld [vmem:[#allocation2 + $0x15a] sm:$0xff] }
  0xa2   : > { %669 = vrot.lane.b32.xlu0 %v5129_v36, %s4555_s20 }
  0xa3   : > { %v425_v34 = vpop.permute.xlu1 %424 }
  0xa4   : > { %519 = vst.msk [vmem:[#allocation3 + $0x10] sm:$0xff] %vm516_vm2, %v425_v34  ;;  %v429_v35 = vpop.permute.xlu0 %428 }
  0xa5   : > { %667 = vrot.lane.b32.xlu1 %v5134_v48, %s4555_s20  ;;  %521 = vst.msk [vmem:[#allocation3 + $0x20] sm:$0xff] %vm516_vm2, %v429_v35 }
  0xa6   : > { %673 = vrot.lane.b32.xlu0 %v5139_v37, %s4555_s20 }
  0xa7   : > { %v427_v45 = vpop.permute.xlu1 %426 }
  0xa8   : > { %520 = vst.msk [vmem:[#allocation3 + $0x18] sm:$0xff] %vm516_vm2, %v427_v45  ;;  %v433_v34 = vpop.permute.xlu0 %432 }
  0xa9   : > { %671 = vrot.lane.b32.xlu1 %v5144_v0, %s4555_s20  ;;  %523 = vst.msk [vmem:[#allocation3 + $0x30] sm:$0xff] %vm516_vm2, %v433_v34 }
  0xaa   : > { %806 = vrot.lane.b32.xlu0 %v4831_v47, %s4556_s21 }
  0xab   : > { %v431_v48 = vpop.permute.xlu1 %430 }
  0xac   : > { %522 = vst.msk [vmem:[#allocation3 + $0x28] sm:$0xff] %vm516_vm2, %v431_v48  ;;  %v437_v35 = vpop.permute.xlu0 %436 }
  0xad   : > { %675 = vrot.lane.b32.xlu1 %v5152_v38, %s4555_s20  ;;  %525 = vst.msk [vmem:[#allocation3 + $0x40] sm:$0xff] %vm516_vm2, %v437_v35 }
  0xae   : > { %810 = vrot.lane.b32.xlu0 %v4840_v50, %s4556_s21 }
  0xaf   : > { %v435_v45 = vpop.permute.xlu1 %434 }
  0xb0   : > { %524 = vst.msk [vmem:[#allocation3 + $0x38] sm:$0xff] %vm516_vm2, %v435_v45  ;;  %v441_v34 = vpop.permute.xlu0 %440 }
  0xb1   : > { %808 = vrot.lane.b32.xlu1 %v4838_v49, %s4556_s21  ;;  %527 = vst.msk [vmem:[#allocation3 + $0x50] sm:$0xff] %vm516_vm2, %v441_v34 }
  0xb2   : > { %814 = vrot.lane.b32.xlu0 %v4856_v54, %s4556_s21 }
  0xb3   : > { %v439_v47 = vpop.permute.xlu1 %438 }
  0xb4   : > { %526 = vst.msk [vmem:[#allocation3 + $0x48] sm:$0xff] %vm516_vm2, %v439_v47  ;;  %v445_v48 = vpop.permute.xlu0 %444 }
  0xb5   : > { %812 = vrot.lane.b32.xlu1 %v4848_v52, %s4556_s21  ;;  %529 = vst.msk [vmem:[#allocation3 + $0x60] sm:$0xff] %vm516_vm2, %v445_v48 }
  0xb6   : > { %818 = vrot.lane.b32.xlu0 %v4866_v57, %s4556_s21 }
  0xb7   : > { %v443_v35 = vpop.permute.xlu1 %442 }
  0xb8   : > { %528 = vst.msk [vmem:[#allocation3 + $0x58] sm:$0xff] %vm516_vm2, %v443_v35  ;;  %v449_v49 = vpop.permute.xlu0 %448 }
  0xb9   : > { %816 = vrot.lane.b32.xlu1 %v4858_v55, %s4556_s21  ;;  %531 = vst.msk [vmem:[#allocation3 + $0x70] sm:$0xff] %vm516_vm2, %v449_v49 }
  0xba   : > { %822 = vrot.lane.b32.xlu0 %v4870_v59, %s4556_s21 }
  0xbb   : > { %v447_v45 = vpop.permute.xlu1 %446 }
  0xbc   : > { %530 = vst.msk [vmem:[#allocation3 + $0x68] sm:$0xff] %vm516_vm2, %v447_v45  ;;  %v453_v34 = vpop.permute.xlu0 %452 }
  0xbd   : > { %820 = vrot.lane.b32.xlu1 %v4868_v58, %s4556_s21  ;;  %533 = vst.msk [vmem:[#allocation3 + $0x80] sm:$0xff] %vm516_vm2, %v453_v34 }
  0xbe   : > { %826 = vrot.lane.b32.xlu0 %v4882_v61, %s4556_s21 }
  0xbf   : > { %v451_v47 = vpop.permute.xlu1 %450 }
  0xc0   : > { %532 = vst.msk [vmem:[#allocation3 + $0x78] sm:$0xff] %vm516_vm2, %v451_v47  ;;  %v457_v48 = vpop.permute.xlu0 %456 }
  0xc1   : > { %824 = vrot.lane.b32.xlu1 %v4880_v60, %s4556_s21  ;;  %535 = vst.msk [vmem:[#allocation3 + $0x90] sm:$0xff] %vm516_vm2, %v457_v48 }
  0xc2   : > { %830 = vrot.lane.b32.xlu0 %v4894_v1, %s4556_s21 }
  0xc3   : > { %v455_v35 = vpop.permute.xlu1 %454 }
  0xc4   : > { %534 = vst.msk [vmem:[#allocation3 + $0x88] sm:$0xff] %vm516_vm2, %v455_v35  ;;  %v461_v49 = vpop.permute.xlu0 %460 }
  0xc5   : > { %828 = vrot.lane.b32.xlu1 %v4884_v62, %s4556_s21  ;;  %537 = vst.msk [vmem:[#allocation3 + $0xa0] sm:$0xff] %vm516_vm2, %v461_v49 }
  0xc6   : > { %834 = vrot.lane.b32.xlu0 %v4898_v3, %s4556_s21 }
  0xc7   : > { %v459_v45 = vpop.permute.xlu1 %458 }
  0xc8   : > { %536 = vst.msk [vmem:[#allocation3 + $0x98] sm:$0xff] %vm516_vm2, %v459_v45  ;;  %v465_v34 = vpop.permute.xlu0 %464 }
  0xc9   : > { %832 = vrot.lane.b32.xlu1 %v4896_v2, %s4556_s21  ;;  %539 = vst.msk [vmem:[#allocation3 + $0xb0] sm:$0xff] %vm516_vm2, %v465_v34 }
  0xca   : > { %838 = vrot.lane.b32.xlu0 %v4910_v5, %s4556_s21 }
  0xcb   : > { %v463_v47 = vpop.permute.xlu1 %462 }
  0xcc   : > { %538 = vst.msk [vmem:[#allocation3 + $0xa8] sm:$0xff] %vm516_vm2, %v463_v47  ;;  %v469_v48 = vpop.permute.xlu0 %468 }
  0xcd   : > { %836 = vrot.lane.b32.xlu1 %v4908_v4, %s4556_s21  ;;  %541 = vst.msk [vmem:[#allocation3 + $0xc0] sm:$0xff] %vm516_vm2, %v469_v48 }
  0xce   : > { %842 = vrot.lane.b32.xlu0 %v4920_v7, %s4556_s21 }
  0xcf   : > { %v467_v35 = vpop.permute.xlu1 %466 }
  0xd0   : > { %540 = vst.msk [vmem:[#allocation3 + $0xb8] sm:$0xff] %vm516_vm2, %v467_v35  ;;  %v473_v49 = vpop.permute.xlu0 %472 }
  0xd1   : > { %840 = vrot.lane.b32.xlu1 %v4912_v6, %s4556_s21  ;;  %543 = vst.msk [vmem:[#allocation3 + $0xd0] sm:$0xff] %vm516_vm2, %v473_v49  ;;  %v6864_v49 = vld [vmem:[#allocation7_spill] sm:$0xff] }
  0xd2   : > { %846 = vrot.lane.b32.xlu0 %v4924_v9, %s4556_s21 }
  0xd3   : > { %v471_v5 = vpop.permute.xlu1 %470 }
  0xd4   : > { %542 = vst.msk [vmem:[#allocation3 + $0xc8] sm:$0xff] %vm516_vm2, %v471_v5  ;;  %v477_v4 = vpop.permute.xlu0 %476  ;;  %v6865_v5 = vld [vmem:[#allocation8_spill] sm:$0xff] }
  0xd5   : > { %844 = vrot.lane.b32.xlu1 %v4922_v8, %s4556_s21  ;;  %545 = vst.msk [vmem:[#allocation3 + $0xe0] sm:$0xff] %vm516_vm2, %v477_v4 }
  0xd6   : > { %850 = vrot.lane.b32.xlu0 %v4940_v12, %s4556_s21 }
  0xd7   : > { %v475_v7 = vpop.permute.xlu1 %474 }
  0xd8   : > { %544 = vst.msk [vmem:[#allocation3 + $0xd8] sm:$0xff] %vm516_vm2, %v475_v7  ;;  %v481_v6 = vpop.permute.xlu0 %480  ;;  %v6866_v7 = vld [vmem:[#allocation9_spill] sm:$0xff] }
  0xd9   : > { %848 = vrot.lane.b32.xlu1 %v4934_v10, %s4556_s21  ;;  %547 = vst.msk [vmem:[#allocation3 + $0xf0] sm:$0xff] %vm516_vm2, %v481_v6 }
  0xda   : > { %854 = vrot.lane.b32.xlu0 %v4956_v16, %s4556_s21 }
  0xdb   : > { %v479_v9 = vpop.permute.xlu1 %478 }
  0xdc   : > { %546 = vst.msk [vmem:[#allocation3 + $0xe8] sm:$0xff] %vm516_vm2, %v479_v9  ;;  %v614_v8 = vpop.permute.xlu0 %613  ;;  %v966_v9 = vld [vmem:[#allocation2 + $0x189] sm:$0xff] }
  0xdd   : > { %852 = vrot.lane.b32.xlu1 %v4946_v13, %s4556_s21  ;;  %710 = vst.msk [vmem:[#allocation3] sm:$0xff] %vm709_vm3, %v614_v8  ;;  %v772_v13 = vld [vmem:[#allocation2 + $0x180] sm:$0xff] }
  0xde   : > { %858 = vrot.lane.b32.xlu0 %v4972_v20, %s4556_s21 }
  0xdf   : > { %v483_v12 = vpop.permute.xlu1 %482 }
  0xe0   : > { %548 = vst.msk [vmem:[#allocation3 + $0xf8] sm:$0xff] %vm516_vm2, %v483_v12  ;;  %v618_v10 = vpop.permute.xlu0 %617  ;;  %v6867_v12 = vld [vmem:[#allocation10_spill] sm:$0xff]  ;;  %vm3381_vm2 = vcmask 392512  }
  0xe1   : > { %856 = vrot.lane.b32.xlu1 %v4962_v17, %s4556_s21  ;;  %712 = vst.msk [vmem:[#allocation3 + $0x10] sm:$0xff] %vm709_vm3, %v618_v10 }
  0xe2   : > { %862 = vrot.lane.b32.xlu0 %v4988_v24, %s4556_s21  ;;  %v773_v24 = vld [vmem:[#allocation2 + $0x188] sm:$0xff] }
  0xe3   : > { %v616_v16 = vpop.permute.xlu1 %615 }
  0xe4   : > { %711 = vst.msk [vmem:[#allocation3 + $0x8] sm:$0xff] %vm709_vm3, %v616_v16  ;;  %v622_v45 = vpop.permute.xlu0 %621 }
  0xe5   : > { %860 = vrot.lane.b32.xlu1 %v4978_v21, %s4556_s21  ;;  %714 = vst.msk [vmem:[#allocation3 + $0x20] sm:$0xff] %vm709_vm3, %v622_v45  ;;  %v6869_v45 = vld [vmem:[#allocation12_spill] sm:$0xff] }
  0xe6   : > { %866 = vrot.lane.b32.xlu0 %v772_v13, %s4556_s21  ;;  %v6868_v13 = vld [vmem:[#allocation11_spill] sm:$0xff] }
  0xe7   : > { %v620_v20 = vpop.permute.xlu1 %619 }
  0xe8   : > { %713 = vst.msk [vmem:[#allocation3 + $0x18] sm:$0xff] %vm709_vm3, %v620_v20  ;;  %v626_v17 = vpop.permute.xlu0 %625 }
  0xe9   : > { %864 = vrot.lane.b32.xlu1 %v4994_v28, %s4556_s21  ;;  %716 = vst.msk [vmem:[#allocation3 + $0x30] sm:$0xff] %vm709_vm3, %v626_v17 }
  0xea   : > { %999 = vrot.lane.b32.xlu0 %v4763_v25, %s4557_s22 }
  0xeb   : > { %v624_v34 = vpop.permute.xlu1 %623 }
  0xec   : > { %715 = vst.msk [vmem:[#allocation3 + $0x28] sm:$0xff] %vm709_vm3, %v624_v34  ;;  %v630_v21 = vpop.permute.xlu0 %629  ;;  %v6871_v34 = vld [vmem:[#allocation14_spill] sm:$0xff] }
  0xed   : > { %868 = vrot.lane.b32.xlu1 %v773_v24, %s4556_s21  ;;  %718 = vst.msk [vmem:[#allocation3 + $0x40] sm:$0xff] %vm709_vm3, %v630_v21  ;;  %v6870_v24 = vld [vmem:[#allocation13_spill] sm:$0xff]  ;;  %s170_s21 = scalar_lea.vmem %s6792_s3, %s4338_s18 }
  0xee   : > { %1003 = vrot.lane.b32.xlu0 %v4765_v26, %s4557_s22 }
  0xef   : > { %v628_v47 = vpop.permute.xlu1 %627 }
  0xf0   : > { %717 = vst.msk [vmem:[#allocation3 + $0x38] sm:$0xff] %vm709_vm3, %v628_v47  ;;  %v634_v28 = vpop.permute.xlu0 %633 }
  0xf1   : > { %1001 = vrot.lane.b32.xlu1 %v4772_v27, %s4557_s22  ;;  %720 = vst.msk [vmem:[#allocation3 + $0x50] sm:$0xff] %vm709_vm3, %v634_v28  ;;  %v6872_v28 = vld [vmem:[#allocation15_spill] sm:$0xff] }
  0xf2   : > { %1007 = vrot.lane.b32.xlu0 %v4780_v30, %s4557_s22 }
  0xf3   : > { %v632_v25 = vpop.permute.xlu1 %631 }
  0xf4   : > { %719 = vst.msk [vmem:[#allocation3 + $0x48] sm:$0xff] %vm709_vm3, %v632_v25  ;;  %v638_v48 = vpop.permute.xlu0 %637  ;;  %v6873_v25 = vld [vmem:[#allocation16_spill] sm:$0xff] }
  0xf5   : > { %1005 = vrot.lane.b32.xlu1 %v4784_v31, %s4557_s22  ;;  %722 = vst.msk [vmem:[#allocation3 + $0x60] sm:$0xff] %vm709_vm3, %v638_v48 }
  0xf6   : > { %1011 = vrot.lane.b32.xlu0 %v4788_v32, %s4557_s22 }
  0xf7   : > { %v636_v26 = vpop.permute.xlu1 %635 }
  0xf8   : > { %721 = vst.msk [vmem:[#allocation3 + $0x58] sm:$0xff] %vm709_vm3, %v636_v26  ;;  %v642_v27 = vpop.permute.xlu0 %641 }
  0xf9   : > { %1009 = vrot.lane.b32.xlu1 %v4801_v39, %s4557_s22  ;;  %724 = vst.msk [vmem:[#allocation3 + $0x70] sm:$0xff] %vm709_vm3, %v642_v27  ;;  %v6874_v27 = vld [vmem:[#allocation17_spill] sm:$0xff] }
  0xfa   : > { %1015 = vrot.lane.b32.xlu0 %v4808_v40, %s4557_s22 }
  0xfb   : > { %v640_v30 = vpop.permute.xlu1 %639 }
  0xfc   : > { %723 = vst.msk [vmem:[#allocation3 + $0x68] sm:$0xff] %vm709_vm3, %v640_v30  ;;  %v646_v31 = vpop.permute.xlu0 %645  ;;  %v6875_v30 = vld [vmem:[#allocation18_spill] sm:$0xff] }
  0xfd   : > { %1013 = vrot.lane.b32.xlu1 %v4812_v41, %s4557_s22  ;;  %726 = vst.msk [vmem:[#allocation3 + $0x80] sm:$0xff] %vm709_vm3, %v646_v31 }
  0xfe   : > { %1019 = vrot.lane.b32.xlu0 %v4816_v42, %s4557_s22 }
  0xff   : > { %v644_v32 = vpop.permute.xlu1 %643 }
 0x100   : > { %725 = vst.msk [vmem:[#allocation3 + $0x78] sm:$0xff] %vm709_vm3, %v644_v32  ;;  %v650_v39 = vpop.permute.xlu0 %649 }
 0x101   : > { %1017 = vrot.lane.b32.xlu1 %v4820_v43, %s4557_s22  ;;  %728 = vst.msk [vmem:[#allocation3 + $0x90] sm:$0xff] %vm709_vm3, %v650_v39  ;;  %v6876_v39 = vld [vmem:[#allocation19_spill] sm:$0xff] }
 0x102   : > { %1023 = vrot.lane.b32.xlu0 %v4824_v44, %s4557_s22 }
 0x103   : > { %v648_v40 = vpop.permute.xlu1 %647 }
 0x104   : > { %727 = vst.msk [vmem:[#allocation3 + $0x88] sm:$0xff] %vm709_vm3, %v648_v40  ;;  %v654_v41 = vpop.permute.xlu0 %653  ;;  %v6877_v40 = vld [vmem:[#allocation20_spill] sm:$0xff] }
 0x105   : > { %1021 = vrot.lane.b32.xlu1 %v4828_v46, %s4557_s22  ;;  %730 = vst.msk [vmem:[#allocation3 + $0xa0] sm:$0xff] %vm709_vm3, %v654_v41 }
 0x106   : > { %1027 = vrot.lane.b32.xlu0 %v4842_v51, %s4557_s22 }
 0x107   : > { %v652_v42 = vpop.permute.xlu1 %651 }
 0x108   : > { %729 = vst.msk [vmem:[#allocation3 + $0x98] sm:$0xff] %vm709_vm3, %v652_v42  ;;  %v658_v43 = vpop.permute.xlu0 %657 }
 0x109   : > { %1025 = vrot.lane.b32.xlu1 %v4852_v53, %s4557_s22  ;;  %732 = vst.msk [vmem:[#allocation3 + $0xb0] sm:$0xff] %vm709_vm3, %v658_v43  ;;  %v6878_v43 = vld [vmem:[#allocation21_spill] sm:$0xff] }
 0x10a   : > { %1031 = vrot.lane.b32.xlu0 %v4860_v56, %s4557_s22 }
 0x10b   : > { %v656_v44 = vpop.permute.xlu1 %655 }
 0x10c   : > { %731 = vst.msk [vmem:[#allocation3 + $0xa8] sm:$0xff] %vm709_vm3, %v656_v44  ;;  %v662_v46 = vpop.permute.xlu0 %661  ;;  %v6879_v44 = vld [vmem:[#allocation22_spill] sm:$0xff] }
 0x10d   : > { %1029 = vrot.lane.b32.xlu1 %v4886_v63, %s4557_s22  ;;  %734 = vst.msk [vmem:[#allocation3 + $0xc0] sm:$0xff] %vm709_vm3, %v662_v46 }
 0x10e   : > { %1035 = vrot.lane.b32.xlu0 %v4936_v11, %s4557_s22 }
 0x10f   : > { %v660_v51 = vpop.permute.xlu1 %659 }
 0x110   : > { %733 = vst.msk [vmem:[#allocation3 + $0xb8] sm:$0xff] %vm709_vm3, %v660_v51  ;;  %v666_v53 = vpop.permute.xlu0 %665 }
 0x111   : > { %1033 = vrot.lane.b32.xlu1 %v4948_v14, %s4557_s22  ;;  %736 = vst.msk [vmem:[#allocation3 + $0xd0] sm:$0xff] %vm709_vm3, %v666_v53  ;;  %v6880_v53 = vld [vmem:[#allocation23_spill] sm:$0xff] }
 0x112   : > { %1039 = vrot.lane.b32.xlu0 %v4954_v15, %s4557_s22 }
 0x113   : > { %v664_v56 = vpop.permute.xlu1 %663 }
 0x114   : > { %735 = vst.msk [vmem:[#allocation3 + $0xc8] sm:$0xff] %vm709_vm3, %v664_v56  ;;  %v670_v63 = vpop.permute.xlu0 %669  ;;  %v6881_v56 = vld [vmem:[#allocation24_spill] sm:$0xff] }
 0x115   : > { %1037 = vrot.lane.b32.xlu1 %v4964_v18, %s4557_s22  ;;  %738 = vst.msk [vmem:[#allocation3 + $0xe0] sm:$0xff] %vm709_vm3, %v670_v63 }
 0x116   : > { %1043 = vrot.lane.b32.xlu0 %v4970_v19, %s4557_s22 }
 0x117   : > { %v668_v11 = vpop.permute.xlu1 %667 }
 0x118   : > { %737 = vst.msk [vmem:[#allocation3 + $0xd8] sm:$0xff] %vm709_vm3, %v668_v11  ;;  %v674_v14 = vpop.permute.xlu0 %673 }
 0x119   : > { %1041 = vrot.lane.b32.xlu1 %v4980_v22, %s4557_s22  ;;  %740 = vst.msk [vmem:[#allocation3 + $0xf0] sm:$0xff] %vm709_vm3, %v674_v14  ;;  %v6863_v22 = vld [vmem:[#allocation6_spill] sm:$0xff]  ;;  %v6882_v14 = vld [vmem:[#allocation25_spill] sm:$0xff] }
 0x11a   : > { %1047 = vrot.lane.b32.xlu0 %v4986_v23, %s4557_s22 }
 0x11b   : > { %v672_v15 = vpop.permute.xlu1 %671 }
 0x11c   : > { %739 = vst.msk [vmem:[#allocation3 + $0xe8] sm:$0xff] %vm709_vm3, %v672_v15  ;;  %v807_v18 = vpop.permute.xlu0 %806  ;;  %v6883_v15 = vld [vmem:[#allocation26_spill] sm:$0xff] }
 0x11d   : > { %1045 = vrot.lane.b32.xlu1 %v4996_v29, %s4557_s22  ;;  %903 = vst.msk [vmem:[#allocation3] sm:$0xff] %vm902_vm4, %v807_v18  ;;  %v965_v29 = vld [vmem:[#allocation2 + $0x181] sm:$0xff] }
 0x11e   : > { %1051 = vrot.lane.b32.xlu0 %v5002_v33, %s4557_s22 }
 0x11f   : > { %v676_v19 = vpop.permute.xlu1 %675 }
 0x120   : > { %741 = vst.msk [vmem:[#allocation3 + $0xf8] sm:$0xff] %vm709_vm3, %v676_v19  ;;  %v811_v35 = vpop.permute.xlu0 %810  ;;  %vm3575_vm3 = vcmask 458112  }
 0x121   : > { %1049 = vrot.lane.b32.xlu1 %v6863_v22, %s4557_s22  ;;  %905 = vst.msk [vmem:[#allocation3 + $0x10] sm:$0xff] %vm902_vm4, %v811_v35  ;;  %v6884_v22 = vld [vmem:[#allocation27_spill] sm:$0xff]  ;;  %v6885_v35 = vld [vmem:[#allocation28_spill] sm:$0xff] }
 0x122   : > { %1055 = vrot.lane.b32.xlu0 %v6864_v49, %s4557_s22 }
 0x123   : > { %v809_v23 = vpop.permute.xlu1 %808 }
 0x124   : > { %904 = vst.msk [vmem:[#allocation3 + $0x8] sm:$0xff] %vm902_vm4, %v809_v23  ;;  %v815_v4 = vpop.permute.xlu0 %814 }
 0x125   : > { %1053 = vrot.lane.b32.xlu1 %v6865_v5, %s4557_s22  ;;  %907 = vst.msk [vmem:[#allocation3 + $0x20] sm:$0xff] %vm902_vm4, %v815_v4  ;;  %v6887_v5 = vld [vmem:[#allocation30_spill] sm:$0xff] }
 0x126   : > { %1059 = vrot.lane.b32.xlu0 %v965_v29, %s4557_s22  ;;  %v6886_v29 = vld [vmem:[#allocation29_spill] sm:$0xff] }
 0x127   : > { %v813_v33 = vpop.permute.xlu1 %812 }
 0x128   : > { %906 = vst.msk [vmem:[#allocation3 + $0x18] sm:$0xff] %vm902_vm4, %v813_v33  ;;  %v819_v6 = vpop.permute.xlu0 %818 }
 0x129   : > { %1057 = vrot.lane.b32.xlu1 %v6866_v7, %s4557_s22  ;;  %909 = vst.msk [vmem:[#allocation3 + $0x30] sm:$0xff] %vm902_vm4, %v819_v6  ;;  %v6888_v7 = vld [vmem:[#allocation31_spill] sm:$0xff]  ;;  %v6889_v6 = vld [vmem:[#allocation32_spill] sm:$0xff] }
 0x12a   : > { %1192 = vrot.lane.b32.xlu0 %v6867_v12, %s4558_s23  ;;  %v6890_v12 = vld [vmem:[#allocation33_spill] sm:$0xff] }
 0x12b   : > { %v817_v8 = vpop.permute.xlu1 %816 }
 0x12c   : > { %908 = vst.msk [vmem:[#allocation3 + $0x28] sm:$0xff] %vm902_vm4, %v817_v8  ;;  %v823_v10 = vpop.permute.xlu0 %822 }
 0x12d   : > { %1061 = vrot.lane.b32.xlu1 %v966_v9, %s4557_s22  ;;  %911 = vst.msk [vmem:[#allocation3 + $0x40] sm:$0xff] %vm902_vm4, %v823_v10  ;;  %v6891_v10 = vld [vmem:[#allocation34_spill] sm:$0xff] }
 0x12e   : > { %1196 = vrot.lane.b32.xlu0 %v6868_v13, %s4558_s23 }
 0x12f   : > { %v821_v16 = vpop.permute.xlu1 %820 }
 0x130   : > { %910 = vst.msk [vmem:[#allocation3 + $0x38] sm:$0xff] %vm902_vm4, %v821_v16  ;;  %v827_v20 = vpop.permute.xlu0 %826 }
 0x131   : > { %1194 = vrot.lane.b32.xlu1 %v6869_v45, %s4558_s23  ;;  %913 = vst.msk [vmem:[#allocation3 + $0x50] sm:$0xff] %vm902_vm4, %v827_v20  ;;  %v6892_v45 = vld [vmem:[#allocation35_spill] sm:$0xff] }
 0x132   : > { %1200 = vrot.lane.b32.xlu0 %v6870_v24, %s4558_s23  ;;  %v5429_v24 = vld [vmem:[#allocation2 + $0x182] sm:$0xff] }
 0x133   : > { %v825_v17 = vpop.permute.xlu1 %824 }
 0x134   : > { %912 = vst.msk [vmem:[#allocation3 + $0x48] sm:$0xff] %vm902_vm4, %v825_v17  ;;  %v831_v21 = vpop.permute.xlu0 %830 }
 0x135   : > { %1198 = vrot.lane.b32.xlu1 %v6871_v34, %s4558_s23  ;;  %915 = vst.msk [vmem:[#allocation3 + $0x60] sm:$0xff] %vm902_vm4, %v831_v21  ;;  %v5440_v21 = vld [vmem:[#allocation2 + $0x18a] sm:$0xff] }
 0x136   : > { %1204 = vrot.lane.b32.xlu0 %v6872_v28, %s4558_s23 }
 0x137   : > { %v829_v47 = vpop.permute.xlu1 %828 }
 0x138   : > { %914 = vst.msk [vmem:[#allocation3 + $0x58] sm:$0xff] %vm902_vm4, %v829_v47  ;;  %v835_v48 = vpop.permute.xlu0 %834 }
 0x139   : > { %1202 = vrot.lane.b32.xlu1 %v6873_v25, %s4558_s23  ;;  %917 = vst.msk [vmem:[#allocation3 + $0x70] sm:$0xff] %vm902_vm4, %v835_v48 }
 0x13a   : > { %1208 = vrot.lane.b32.xlu0 %v6874_v27, %s4558_s23  ;;  %v1936_v27 = vld [vmem:[%s6790_s1 + $0x18] sm:$0xff] }
 0x13b   : > { %v833_v26 = vpop.permute.xlu1 %832 }
 0x13c   : > { %916 = vst.msk [vmem:[#allocation3 + $0x68] sm:$0xff] %vm902_vm4, %v833_v26  ;;  %v839_v31 = vpop.permute.xlu0 %838 }
 0x13d   : > { %1206 = vrot.lane.b32.xlu1 %v6875_v30, %s4558_s23  ;;  %919 = vst.msk [vmem:[#allocation3 + $0x80] sm:$0xff] %vm902_vm4, %v839_v31 }
 0x13e   : > { %1212 = vrot.lane.b32.xlu0 %v6876_v39, %s4558_s23 }
 0x13f   : > { %v837_v32 = vpop.permute.xlu1 %836 }
 0x140   : > { %918 = vst.msk [vmem:[#allocation3 + $0x78] sm:$0xff] %vm902_vm4, %v837_v32  ;;  %v843_v41 = vpop.permute.xlu0 %842  ;;  %v1515_v32 = vld [vmem:[#allocation2 + $0x31] sm:$0xff] }
 0x141   : > { %1210 = vrot.lane.b32.xlu1 %v6877_v40, %s4558_s23  ;;  %921 = vst.msk [vmem:[#allocation3 + $0x90] sm:$0xff] %vm902_vm4, %v843_v41  ;;  %v1709_v40 = vld [vmem:[#allocation2 + $0x3a] sm:$0xff]  ;;  %v1708_v41 = vld [vmem:[#allocation2 + $0x32] sm:$0xff] }
 0x142   : > { %1216 = vrot.lane.b32.xlu0 %v6878_v43, %s4558_s23  ;;  %v1518_v43 = vld [vmem:[#allocation2 + $0x51] sm:$0xff] }
 0x143   : > { %v841_v42 = vpop.permute.xlu1 %840 }
 0x144   : > { %920 = vst.msk [vmem:[#allocation3 + $0x88] sm:$0xff] %vm902_vm4, %v841_v42  ;;  %v847_v46 = vpop.permute.xlu0 %846 }
 0x145   : > { %1214 = vrot.lane.b32.xlu1 %v6879_v44, %s4558_s23  ;;  %923 = vst.msk [vmem:[#allocation3 + $0xa0] sm:$0xff] %vm902_vm4, %v847_v46  ;;  %v1517_v46 = vld [vmem:[#allocation2 + $0x49] sm:$0xff] }
 0x146   : > { %1220 = vrot.lane.b32.xlu0 %v6880_v53, %s4558_s23  ;;  %v1711_v53 = vld [vmem:[#allocation2 + $0x52] sm:$0xff] }
 0x147   : > { %v845_v51 = vpop.permute.xlu1 %844 }
 0x148   : > { %922 = vst.msk [vmem:[#allocation3 + $0x98] sm:$0xff] %vm902_vm4, %v845_v51  ;;  %v851_v63 = vpop.permute.xlu0 %850 }
 0x149   : > { %1218 = vrot.lane.b32.xlu1 %v6881_v56, %s4558_s23  ;;  %925 = vst.msk [vmem:[#allocation3 + $0xb0] sm:$0xff] %vm902_vm4, %v851_v63  ;;  %v1710_v63 = vld [vmem:[#allocation2 + $0x4a] sm:$0xff] }
 0x14a   : > { %1224 = vrot.lane.b32.xlu0 %v6882_v14, %s4558_s23  ;;  %v1520_v14 = vld [vmem:[#allocation2 + $0x69] sm:$0xff] }
 0x14b   : > { %v849_v11 = vpop.permute.xlu1 %848 }
 0x14c   : > { %924 = vst.msk [vmem:[#allocation3 + $0xa8] sm:$0xff] %vm902_vm4, %v849_v11  ;;  %v855_v18 = vpop.permute.xlu0 %854 }
 0x14d   : > { %1222 = vrot.lane.b32.xlu1 %v6883_v15, %s4558_s23  ;;  %927 = vst.msk [vmem:[#allocation3 + $0xc0] sm:$0xff] %vm902_vm4, %v855_v18  ;;  %v1519_v18 = vld [vmem:[#allocation2 + $0x61] sm:$0xff] }
 0x14e   : > { %1228 = vrot.lane.b32.xlu0 %v6884_v22, %s4558_s23  ;;  %v1713_v22 = vld [vmem:[#allocation2 + $0x6a] sm:$0xff] }
 0x14f   : > { %v853_v19 = vpop.permute.xlu1 %852 }
 0x150   : > { %926 = vst.msk [vmem:[#allocation3 + $0xb8] sm:$0xff] %vm902_vm4, %v853_v19  ;;  %v859_v23 = vpop.permute.xlu0 %858 }
 0x151   : > { %1226 = vrot.lane.b32.xlu1 %v6885_v35, %s4558_s23  ;;  %929 = vst.msk [vmem:[#allocation3 + $0xd0] sm:$0xff] %vm902_vm4, %v859_v23  ;;  %v1712_v23 = vld [vmem:[#allocation2 + $0x62] sm:$0xff] }
 0x152   : > { %1232 = vrot.lane.b32.xlu0 %v6886_v29, %s4558_s23  ;;  %v1522_v29 = vld [vmem:[#allocation2 + $0x81] sm:$0xff] }
 0x153   : > { %v857_v49 = vpop.permute.xlu1 %856 }
 0x154   : > { %928 = vst.msk [vmem:[#allocation3 + $0xc8] sm:$0xff] %vm902_vm4, %v857_v49  ;;  %v863_v4 = vpop.permute.xlu0 %862 }
 0x155   : > { %1230 = vrot.lane.b32.xlu1 %v6887_v5, %s4558_s23  ;;  %931 = vst.msk [vmem:[#allocation3 + $0xe0] sm:$0xff] %vm902_vm4, %v863_v4  ;;  %v1521_v4 = vld [vmem:[#allocation2 + $0x79] sm:$0xff] }
 0x156   : > { %1236 = vrot.lane.b32.xlu0 %v6888_v7, %s4558_s23  ;;  %v1715_v7 = vld [vmem:[#allocation2 + $0x82] sm:$0xff] }
 0x157   : > { %v861_v33 = vpop.permute.xlu1 %860 }
 0x158   : > { %930 = vst.msk [vmem:[#allocation3 + $0xd8] sm:$0xff] %vm902_vm4, %v861_v33  ;;  %v867_v9 = vpop.permute.xlu0 %866 }
 0x159   : > { %1234 = vrot.lane.b32.xlu1 %v6889_v6, %s4558_s23  ;;  %933 = vst.msk [vmem:[#allocation3 + $0xf0] sm:$0xff] %vm902_vm4, %v867_v9  ;;  %v1714_v9 = vld [vmem:[#allocation2 + $0x7a] sm:$0xff] }
 0x15a   : > { %1240 = vrot.lane.b32.xlu0 %v6890_v12, %s4558_s23  ;;  %v1524_v12 = vld [vmem:[#allocation2 + $0x99] sm:$0xff] }
 0x15b   : > { %v865_v8 = vpop.permute.xlu1 %864 }
 0x15c   : > { %932 = vst.msk [vmem:[#allocation3 + $0xe8] sm:$0xff] %vm902_vm4, %v865_v8  ;;  %v1000_v16 = vpop.permute.xlu0 %999 }
 0x15d   : > { %1238 = vrot.lane.b32.xlu1 %v6891_v10, %s4558_s23  ;;  %1096 = vst.msk [vmem:[#allocation3] sm:$0xff] %vm1095_vm5, %v1000_v16  ;;  %v1523_v16 = vld [vmem:[#allocation2 + $0x91] sm:$0xff] }
 0x15e   : > { %1244 = vrot.lane.b32.xlu0 %v5129_v36, %s4558_s23 }
 0x15f   : > { %v869_v13 = vpop.permute.xlu1 %868 }
 0x160   : > { %934 = vst.msk [vmem:[#allocation3 + $0xf8] sm:$0xff] %vm902_vm4, %v869_v13  ;;  %v1004_v20 = vpop.permute.xlu0 %1003  ;;  %vm3768_vm4 = vcmask 523712  }
 0x161   : > { %1242 = vrot.lane.b32.xlu1 %v6892_v45, %s4558_s23  ;;  %1098 = vst.msk [vmem:[#allocation3 + $0x10] sm:$0xff] %vm1095_vm5, %v1004_v20  ;;  %v1717_v45 = vld [vmem:[#allocation2 + $0x9a] sm:$0xff] }
 0x162   : > { %1248 = vrot.lane.b32.xlu0 %v5139_v37, %s4558_s23 }
 0x163   : > { %v1002_v17 = vpop.permute.xlu1 %1001 }
 0x164   : > { %1097 = vst.msk [vmem:[#allocation3 + $0x8] sm:$0xff] %vm1095_vm5, %v1002_v17  ;;  %v1008_v36 = vpop.permute.xlu0 %1007  ;;  %v1716_v17 = vld [vmem:[#allocation2 + $0x92] sm:$0xff] }
 0x165   : > { %1246 = vrot.lane.b32.xlu1 %v5144_v0, %s4558_s23  ;;  %1100 = vst.msk [vmem:[#allocation3 + $0x20] sm:$0xff] %vm1095_vm5, %v1008_v36 }
 0x166   : > { %1252 = vrot.lane.b32.xlu0 %v5429_v24, %s4558_s23 }
 0x167   : > { %v1006_v34 = vpop.permute.xlu1 %1005 }
 0x168   : > { %1099 = vst.msk [vmem:[#allocation3 + $0x18] sm:$0xff] %vm1095_vm5, %v1006_v34  ;;  %v1012_v37 = vpop.permute.xlu0 %1011  ;;  %v1526_v34 = vld [vmem:[#allocation2 + $0xb1] sm:$0xff] }
 0x169   : > { %1250 = vrot.lane.b32.xlu1 %v5152_v38, %s4558_s23  ;;  %1102 = vst.msk [vmem:[#allocation3 + $0x30] sm:$0xff] %vm1095_vm5, %v1012_v37 }
 0x16a   : > { %1386 = vrot.lane.b32.xlu0 %v4840_v50, %s4559_s24 }
 0x16b   : > { %v1010_v47 = vpop.permute.xlu1 %1009 }
 0x16c   : > { %1101 = vst.msk [vmem:[#allocation3 + $0x28] sm:$0xff] %vm1095_vm5, %v1010_v47  ;;  %v1016_v0 = vpop.permute.xlu0 %1015  ;;  %v1525_v47 = vld [vmem:[#allocation2 + $0xa9] sm:$0xff] }
 0x16d   : > { %1254 = vrot.lane.b32.xlu1 %v5440_v21, %s4558_s23  ;;  %1104 = vst.msk [vmem:[#allocation3 + $0x40] sm:$0xff] %vm1095_vm5, %v1016_v0 }
 0x16e   : > { %1390 = vrot.lane.b32.xlu0 %v4856_v54, %s4559_s24 }
 0x16f   : > { %v1014_v28 = vpop.permute.xlu1 %1013 }
 0x170   : > { %1103 = vst.msk [vmem:[#allocation3 + $0x38] sm:$0xff] %vm1095_vm5, %v1014_v28  ;;  %v1020_v38 = vpop.permute.xlu0 %1019  ;;  %v1719_v28 = vld [vmem:[#allocation2 + $0xb2] sm:$0xff] }
 0x171   : > { %1388 = vrot.lane.b32.xlu1 %v4848_v52, %s4559_s24  ;;  %1106 = vst.msk [vmem:[#allocation3 + $0x50] sm:$0xff] %vm1095_vm5, %v1020_v38 }
 0x172   : > { %1394 = vrot.lane.b32.xlu0 %v4866_v57, %s4559_s24 }
 0x173   : > { %v1018_v50 = vpop.permute.xlu1 %1017 }
 0x174   : > { %1105 = vst.msk [vmem:[#allocation3 + $0x48] sm:$0xff] %vm1095_vm5, %v1018_v50  ;;  %v1024_v25 = vpop.permute.xlu0 %1023  ;;  %v1718_v50 = vld [vmem:[#allocation2 + $0xaa] sm:$0xff] }
 0x175   : > { %1392 = vrot.lane.b32.xlu1 %v4858_v55, %s4559_s24  ;;  %1108 = vst.msk [vmem:[#allocation3 + $0x60] sm:$0xff] %vm1095_vm5, %v1024_v25 }
 0x176   : > { %1398 = vrot.lane.b32.xlu0 %v4870_v59, %s4559_s24  ;;  %v1933_v59 = vld [vmem:[%s6790_s1] sm:$0xff] }
 0x177   : > { %v1022_v54 = vpop.permute.xlu1 %1021 }
 0x178   : > { %1107 = vst.msk [vmem:[#allocation3 + $0x58] sm:$0xff] %vm1095_vm5, %v1022_v54  ;;  %v1028_v52 = vpop.permute.xlu0 %1027  ;;  %v1527_v54 = vld [vmem:[#allocation2 + $0xc1] sm:$0xff] }
 0x179   : > { %1396 = vrot.lane.b32.xlu1 %v4868_v58, %s4559_s24  ;;  %1110 = vst.msk [vmem:[#allocation3 + $0x70] sm:$0xff] %vm1095_vm5, %v1028_v52  ;;  %v1934_v58 = vld [vmem:[%s6790_s1 + $0x8] sm:$0xff] }
 0x17a   : > { %1402 = vrot.lane.b32.xlu0 %v4882_v61, %s4559_s24  ;;  %v4468_v48 = vpack.c.bf16 %v1934_v58, %v1933_v59  ;;  %v1935_v61 = vld [vmem:[%s6790_s1 + $0x10] sm:$0xff]  ;;  %v1720_v59 = vld [vmem:[#allocation2 + $0xc2] sm:$0xff] }
 0x17b   : > { %v1026_v57 = vpop.permute.xlu1 %1025  ;;  %v4472_v30 = vpack.c.bf16 %v1936_v27, %v1935_v61  ;;  %v1721_v27 = vld [vmem:[#allocation2 + $0xca] sm:$0xff] }
 0x17c   : > { %1109 = vst.msk [vmem:[#allocation3 + $0x68] sm:$0xff] %vm1095_vm5, %v1026_v57  ;;  %v1032_v55 = vpop.permute.xlu0 %1031  ;;  %4469 = vmatprep.subr.bf16.mxu0 %v4468_v48  ;;  %v1335_v57 = vld [vmem:[#allocation2 + $0xc8] sm:$0xff] }
 0x17d   : > { %1400 = vrot.lane.b32.xlu1 %v4880_v60, %s4559_s24  ;;  %1112 = vst.msk [vmem:[#allocation3 + $0x80] sm:$0xff] %vm1095_vm5, %v1032_v55  ;;  %4471 = vmatpush3.bf16.msra.mxu0 %v4468_v48  ;;  %v1528_v48 = vld [vmem:[#allocation2 + $0xc9] sm:$0xff] }
 0x17e   : > { %1406 = vrot.lane.b32.xlu0 %v4894_v1, %s4559_s24  ;;  %4473 = vmatprep.subr.bf16.mxu0 %v4472_v30 }
 0x17f   : > { %v1030_v26 = vpop.permute.xlu1 %1029 }
 0x180   : > { %1111 = vst.msk [vmem:[#allocation3 + $0x78] sm:$0xff] %vm1095_vm5, %v1030_v26  ;;  %v1036_v60 = vpop.permute.xlu0 %1035 }
 0x181   : > { %1404 = vrot.lane.b32.xlu1 %v4884_v62, %s4559_s24  ;;  %1114 = vst.msk [vmem:[#allocation3 + $0x90] sm:$0xff] %vm1095_vm5, %v1036_v60  ;;  %v1516_v62 = vld [vmem:[#allocation2 + $0x39] sm:$0xff]  ;;  %4475 = vmatpush3.bf16.msra.mxu0 %v4472_v30 }
 0x182   : > { %1410 = vrot.lane.b32.xlu0 %v4898_v3, %s4559_s24  ;;  %v1937_v3 = vld [vmem:[%s6790_s1 + $0x20] sm:$0xf]  ;;  %v1336_v60 = vld [vmem:[#allocation2 + $0xd8] sm:$0xff] }
 0x183   : > { %v1034_v1 = vpop.permute.xlu1 %1033  ;;  %4418 = vmatprep.subr.msk.mxu0 %vm2035_vm6, %v1937_v3 }
 0x184   : > { %1113 = vst.msk [vmem:[#allocation3 + $0x88] sm:$0xff] %vm1095_vm5, %v1034_v1  ;;  %v1040_v31 = vpop.permute.xlu0 %1039  ;;  %v1529_v1 = vld [vmem:[#allocation2 + $0xd9] sm:$0xff] }
 0x185   : > { %1408 = vrot.lane.b32.xlu1 %v4896_v2, %s4559_s24  ;;  %1116 = vst.msk [vmem:[#allocation3 + $0xa0] sm:$0xff] %vm1095_vm5, %v1040_v31  ;;  %4419 = vmatpush3.msk.msra.mxu0 %vm2035_vm6, %v1937_v3  ;;  %v1337_v31 = vld [vmem:[#allocation2 + $0xe0] sm:$0xff]  ;;  %vm4027_vm6 = vcmask 588800  }
 0x186   : > { %1581 = vrot.lane.b32.xlu0 %v1516_v62, %s4560_s6 }
 0x187   : > { %v1038_v39 = vpop.permute.xlu1 %1037 }
 0x188   : > { %1115 = vst.msk [vmem:[#allocation3 + $0x98] sm:$0xff] %vm1095_vm5, %v1038_v39  ;;  %v1044_v2 = vpop.permute.xlu0 %1043  ;;  %v1722_v39 = vld [vmem:[#allocation2 + $0xda] sm:$0xff] }
 0x189   : > { %1579 = vrot.lane.b32.xlu1 %v1515_v32, %s4560_s6  ;;  %1118 = vst.msk [vmem:[#allocation3 + $0xb0] sm:$0xff] %vm1095_vm5, %v1044_v2 }
 0x18a   : > { %1774 = vrot.lane.b32.xlu0 %v1709_v40, %s4561_s9  ;;  %v1530_v40 = vld [vmem:[#allocation2 + $0xe1] sm:$0xff] }
 0x18b   : > { %v1042_v42 = vpop.permute.xlu1 %1041 }
 0x18c   : > { %1117 = vst.msk [vmem:[#allocation3 + $0xa8] sm:$0xff] %vm1095_vm5, %v1042_v42  ;;  %v1048_v44 = vpop.permute.xlu0 %1047 }
 0x18d   : > { %1772 = vrot.lane.b32.xlu1 %v1708_v41, %s4561_s9  ;;  %1120 = vst.msk [vmem:[#allocation3 + $0xc0] sm:$0xff] %vm1095_vm5, %v1048_v44  ;;  %v1338_v41 = vld [vmem:[#allocation2 + $0xf0] sm:$0xff] }
 0x18e   : > { %1585 = vrot.lane.b32.xlu0 %v1518_v43, %s4560_s6  ;;  %v1723_v43 = vld [vmem:[#allocation2 + $0xe2] sm:$0xff] }
 0x18f   : > { %v1046_v51 = vpop.permute.xlu1 %1045 }
 0x190   : > { %1119 = vst.msk [vmem:[#allocation3 + $0xb8] sm:$0xff] %vm1095_vm5, %v1046_v51  ;;  %v1052_v56 = vpop.permute.xlu0 %1051 }
 0x191   : > { %1583 = vrot.lane.b32.xlu1 %v1517_v46, %s4560_s6  ;;  %1122 = vst.msk [vmem:[#allocation3 + $0xd0] sm:$0xff] %vm1095_vm5, %v1052_v56  ;;  %v1531_v46 = vld [vmem:[#allocation2 + $0xf1] sm:$0xff] }
 0x192   : > { %1778 = vrot.lane.b32.xlu0 %v1711_v53, %s4561_s9  ;;  %v1339_v53 = vld [vmem:[#allocation2 + $0xf8] sm:$0xff] }
 0x193   : > { %v1050_v11 = vpop.permute.xlu1 %1049 }
 0x194   : > { %1121 = vst.msk [vmem:[#allocation3 + $0xc8] sm:$0xff] %vm1095_vm5, %v1050_v11  ;;  %v1056_v15 = vpop.permute.xlu0 %1055 }
 0x195   : > { %1776 = vrot.lane.b32.xlu1 %v1710_v63, %s4561_s9  ;;  %1124 = vst.msk [vmem:[#allocation3 + $0xe0] sm:$0xff] %vm1095_vm5, %v1056_v15  ;;  %v1724_v63 = vld [vmem:[#allocation2 + $0xf2] sm:$0xff] }
 0x196   : > { %1589 = vrot.lane.b32.xlu0 %v1520_v14, %s4560_s6  ;;  %v1532_v14 = vld [vmem:[#allocation2 + $0xf9] sm:$0xff] }
 0x197   : > { %v1054_v19 = vpop.permute.xlu1 %1053 }
 0x198   : > { %1123 = vst.msk [vmem:[#allocation3 + $0xd8] sm:$0xff] %vm1095_vm5, %v1054_v19  ;;  %v1060_v35 = vpop.permute.xlu0 %1059 }
 0x199   : > { %1587 = vrot.lane.b32.xlu1 %v1519_v18, %s4560_s6  ;;  %1126 = vst.msk [vmem:[#allocation3 + $0xf0] sm:$0xff] %vm1095_vm5, %v1060_v35  ;;  %v1340_v18 = vld [vmem:[#allocation2 + $0x108] sm:$0xff] }
 0x19a   : > { %1782 = vrot.lane.b32.xlu0 %v1713_v22, %s4561_s9  ;;  %v1725_v22 = vld [vmem:[#allocation2 + $0xfa] sm:$0xff] }
 0x19b   : > { %v1058_v49 = vpop.permute.xlu1 %1057 }
 0x19c   : > { %1125 = vst.msk [vmem:[#allocation3 + $0xe8] sm:$0xff] %vm1095_vm5, %v1058_v49  ;;  %v1193_v5 = vpop.permute.xlu0 %1192 }
 0x19d   : > { %1780 = vrot.lane.b32.xlu1 %v1712_v23, %s4561_s9  ;;  %1289 = vst.msk [vmem:[#allocation3] sm:$0xff] %vm1288_vm7, %v1193_v5  ;;  %v1533_v23 = vld [vmem:[#allocation2 + $0x109] sm:$0xff] }
 0x19e   : > { %1593 = vrot.lane.b32.xlu0 %v1522_v29, %s4560_s6  ;;  %v1341_v29 = vld [vmem:[#allocation2 + $0x110] sm:$0xff] }
 0x19f   : > { %v1062_v33 = vpop.permute.xlu1 %1061 }
 0x1a0   : > { %1127 = vst.msk [vmem:[#allocation3 + $0xf8] sm:$0xff] %vm1095_vm5, %v1062_v33  ;;  %v1197_v6 = vpop.permute.xlu0 %1196  ;;  %vm3961_vm5 = vcmask 589312  }
 0x1a1   : > { %1591 = vrot.lane.b32.xlu1 %v1521_v4, %s4560_s6  ;;  %1291 = vst.msk [vmem:[#allocation3 + $0x10] sm:$0xff] %vm1288_vm7, %v1197_v6  ;;  %v1726_v4 = vld [vmem:[#allocation2 + $0x10a] sm:$0xff] }
 0x1a2   : > { %1786 = vrot.lane.b32.xlu0 %v1715_v7, %s4561_s9  ;;  %v1534_v7 = vld [vmem:[#allocation2 + $0x111] sm:$0xff] }
 0x1a3   : > { %v1195_v8 = vpop.permute.xlu1 %1194 }
 0x1a4   : > { %1290 = vst.msk [vmem:[#allocation3 + $0x8] sm:$0xff] %vm1288_vm7, %v1195_v8  ;;  %v1201_v10 = vpop.permute.xlu0 %1200 }
 0x1a5   : > { %1784 = vrot.lane.b32.xlu1 %v1714_v9, %s4561_s9  ;;  %1293 = vst.msk [vmem:[#allocation3 + $0x20] sm:$0xff] %vm1288_vm7, %v1201_v10  ;;  %v1342_v9 = vld [vmem:[#allocation2 + $0x120] sm:$0xff] }
 0x1a6   : > { %1597 = vrot.lane.b32.xlu0 %v1524_v12, %s4560_s6  ;;  %v1727_v12 = vld [vmem:[#allocation2 + $0x112] sm:$0xff] }
 0x1a7   : > { %v1199_v13 = vpop.permute.xlu1 %1198 }
 0x1a8   : > { %1292 = vst.msk [vmem:[#allocation3 + $0x18] sm:$0xff] %vm1288_vm7, %v1199_v13  ;;  %v1205_v20 = vpop.permute.xlu0 %1204 }
 0x1a9   : > { %1595 = vrot.lane.b32.xlu1 %v1523_v16, %s4560_s6  ;;  %1295 = vst.msk [vmem:[#allocation3 + $0x30] sm:$0xff] %vm1288_vm7, %v1205_v20  ;;  %v1535_v16 = vld [vmem:[#allocation2 + $0x121] sm:$0xff] }
 0x1aa   : > { %1790 = vrot.lane.b32.xlu0 %v1717_v45, %s4561_s9  ;;  %v1343_v45 = vld [vmem:[#allocation2 + $0x128] sm:$0xff] }
 0x1ab   : > { %v1203_v36 = vpop.permute.xlu1 %1202 }
 0x1ac   : > { %1294 = vst.msk [vmem:[#allocation3 + $0x28] sm:$0xff] %vm1288_vm7, %v1203_v36  ;;  %v1209_v37 = vpop.permute.xlu0 %1208 }
 0x1ad   : > { %1788 = vrot.lane.b32.xlu1 %v1716_v17, %s4561_s9  ;;  %1297 = vst.msk [vmem:[#allocation3 + $0x40] sm:$0xff] %vm1288_vm7, %v1209_v37  ;;  %v1728_v17 = vld [vmem:[#allocation2 + $0x122] sm:$0xff] }
 0x1ae   : > { %1601 = vrot.lane.b32.xlu0 %v1526_v34, %s4560_s6  ;;  %v1536_v34 = vld [vmem:[#allocation2 + $0x129] sm:$0xff] }
 0x1af   : > { %v1207_v0 = vpop.permute.xlu1 %1206 }
 0x1b0   : > { %1296 = vst.msk [vmem:[#allocation3 + $0x38] sm:$0xff] %vm1288_vm7, %v1207_v0  ;;  %v1213_v38 = vpop.permute.xlu0 %1212 }
 0x1b1   : > { %1599 = vrot.lane.b32.xlu1 %v1525_v47, %s4560_s6  ;;  %1299 = vst.msk [vmem:[#allocation3 + $0x50] sm:$0xff] %vm1288_vm7, %v1213_v38  ;;  %v1344_v47 = vld [vmem:[#allocation2 + $0x138] sm:$0xff] }
 0x1b2   : > { %1794 = vrot.lane.b32.xlu0 %v1719_v28, %s4561_s9  ;;  %v1729_v28 = vld [vmem:[#allocation2 + $0x12a] sm:$0xff] }
 0x1b3   : > { %v1211_v25 = vpop.permute.xlu1 %1210 }
 0x1b4   : > { %1298 = vst.msk [vmem:[#allocation3 + $0x48] sm:$0xff] %vm1288_vm7, %v1211_v25  ;;  %v1217_v52 = vpop.permute.xlu0 %1216 }
 0x1b5   : > { %1792 = vrot.lane.b32.xlu1 %v1718_v50, %s4561_s9  ;;  %1301 = vst.msk [vmem:[#allocation3 + $0x60] sm:$0xff] %vm1288_vm7, %v1217_v52  ;;  %v1537_v50 = vld [vmem:[#allocation2 + $0x139] sm:$0xff] }
 0x1b6   : > { %1603 = vrot.lane.b32.xlu0 %v1527_v54, %s4560_s6  ;;  %v1345_v54 = vld [vmem:[#allocation2 + $0x140] sm:$0xff] }
 0x1b7   : > { %v1215_v55 = vpop.permute.xlu1 %1214 }
 0x1b8   : > { %1300 = vst.msk [vmem:[#allocation3 + $0x58] sm:$0xff] %vm1288_vm7, %v1215_v55  ;;  %v1221_v58 = vpop.permute.xlu0 %1220 }
 0x1b9   : > { %1412 = vrot.lane.b32.xlu1 %v1335_v57, %s4559_s24  ;;  %1303 = vst.msk [vmem:[#allocation3 + $0x70] sm:$0xff] %vm1288_vm7, %v1221_v58  ;;  %v1730_v57 = vld [vmem:[#allocation2 + $0x13a] sm:$0xff] }
 0x1ba   : > { %1796 = vrot.lane.b32.xlu0 %v1720_v59, %s4561_s9  ;;  %v1538_v59 = vld [vmem:[#allocation2 + $0x141] sm:$0xff] }
 0x1bb   : > { %v1219_v26 = vpop.permute.xlu1 %1218 }
 0x1bc   : > { %1302 = vst.msk [vmem:[#allocation3 + $0x68] sm:$0xff] %vm1288_vm7, %v1219_v26  ;;  %v1225_v61 = vpop.permute.xlu0 %1224 }
 0x1bd   : > { %1605 = vrot.lane.b32.xlu1 %v1528_v48, %s4560_s6  ;;  %1305 = vst.msk [vmem:[#allocation3 + $0x80] sm:$0xff] %vm1288_vm7, %v1225_v61  ;;  %v1346_v48 = vld [vmem:[#allocation2 + $0x150] sm:$0xff] }
 0x1be   : > { %1414 = vrot.lane.b32.xlu0 %v1336_v60, %s4559_s24  ;;  %v1731_v60 = vld [vmem:[#allocation2 + $0x142] sm:$0xff] }
 0x1bf   : > { %v1223_v30 = vpop.permute.xlu1 %1222 }
 0x1c0   : > { %1304 = vst.msk [vmem:[#allocation3 + $0x78] sm:$0xff] %vm1288_vm7, %v1223_v30  ;;  %v1229_v62 = vpop.permute.xlu0 %1228 }
 0x1c1   : > { %1798 = vrot.lane.b32.xlu1 %v1721_v27, %s4561_s9  ;;  %1307 = vst.msk [vmem:[#allocation3 + $0x90] sm:$0xff] %vm1288_vm7, %v1229_v62  ;;  %v1539_v27 = vld [vmem:[#allocation2 + $0x151] sm:$0xff] }
 0x1c2   : > { %1607 = vrot.lane.b32.xlu0 %v1529_v1, %s4560_s6  ;;  %v1347_v1 = vld [vmem:[#allocation2 + $0x158] sm:$0xff] }
 0x1c3   : > { %v1227_v32 = vpop.permute.xlu1 %1226 }
 0x1c4   : > { %1306 = vst.msk [vmem:[#allocation3 + $0x88] sm:$0xff] %vm1288_vm7, %v1227_v32  ;;  %v1233_v3 = vpop.permute.xlu0 %1232 }
 0x1c5   : > { %1416 = vrot.lane.b32.xlu1 %v1337_v31, %s4559_s24  ;;  %1309 = vst.msk [vmem:[#allocation3 + $0xa0] sm:$0xff] %vm1288_vm7, %v1233_v3  ;;  %v1732_v31 = vld [vmem:[#allocation2 + $0x152] sm:$0xff] }
 0x1c6   : > { %1800 = vrot.lane.b32.xlu0 %v1722_v39, %s4561_s9  ;;  %v1540_v39 = vld [vmem:[#allocation2 + $0x159] sm:$0xff] }
 0x1c7   : > { %v1231_v2 = vpop.permute.xlu1 %1230 }
 0x1c8   : > { %1308 = vst.msk [vmem:[#allocation3 + $0x98] sm:$0xff] %vm1288_vm7, %v1231_v2  ;;  %v1237_v42 = vpop.permute.xlu0 %1236 }
 0x1c9   : > { %1609 = vrot.lane.b32.xlu1 %v1530_v40, %s4560_s6  ;;  %1311 = vst.msk [vmem:[#allocation3 + $0xb0] sm:$0xff] %vm1288_vm7, %v1237_v42  ;;  %v1348_v40 = vld [vmem:[#allocation2 + $0x168] sm:$0xff] }
 0x1ca   : > { %1418 = vrot.lane.b32.xlu0 %v1338_v41, %s4559_s24  ;;  %v1733_v41 = vld [vmem:[#allocation2 + $0x15a] sm:$0xff] }
 0x1cb   : > { %v1235_v44 = vpop.permute.xlu1 %1234 }
 0x1cc   : > { %1310 = vst.msk [vmem:[#allocation3 + $0xa8] sm:$0xff] %vm1288_vm7, %v1235_v44  ;;  %v1241_v51 = vpop.permute.xlu0 %1240 }
 0x1cd   : > { %1802 = vrot.lane.b32.xlu1 %v1723_v43, %s4561_s9  ;;  %1313 = vst.msk [vmem:[#allocation3 + $0xc0] sm:$0xff] %vm1288_vm7, %v1241_v51 }
 0x1ce   : > { %1611 = vrot.lane.b32.xlu0 %v1531_v46, %s4560_s6  ;;  %v1541_v46 = vld [vmem:[#allocation2 + $0x169] sm:$0xff] }
 0x1cf   : > { %v1239_v56 = vpop.permute.xlu1 %1238 }
 0x1d0   : > { %1312 = vst.msk [vmem:[#allocation3 + $0xb8] sm:$0xff] %vm1288_vm7, %v1239_v56  ;;  %v1245_v11 = vpop.permute.xlu0 %1244 }
 0x1d1   : > { %1420 = vrot.lane.b32.xlu1 %v1339_v53, %s4559_s24  ;;  %1315 = vst.msk [vmem:[#allocation3 + $0xd0] sm:$0xff] %vm1288_vm7, %v1245_v11  ;;  %v1349_v53 = vld [vmem:[#allocation2 + $0x170] sm:$0xff] }
 0x1d2   : > { %1804 = vrot.lane.b32.xlu0 %v1724_v63, %s4561_s9  ;;  %v1734_v63 = vld [vmem:[#allocation2 + $0x16a] sm:$0xff] }
 0x1d3   : > { %v1243_v15 = vpop.permute.xlu1 %1242 }
 0x1d4   : > { %1314 = vst.msk [vmem:[#allocation3 + $0xc8] sm:$0xff] %vm1288_vm7, %v1243_v15  ;;  %v1249_v19 = vpop.permute.xlu0 %1248 }
 0x1d5   : > { %1613 = vrot.lane.b32.xlu1 %v1532_v14, %s4560_s6  ;;  %1317 = vst.msk [vmem:[#allocation3 + $0xe0] sm:$0xff] %vm1288_vm7, %v1249_v19  ;;  %v1542_v14 = vld [vmem:[#allocation2 + $0x171] sm:$0xff] }
 0x1d6   : > { %1422 = vrot.lane.b32.xlu0 %v1340_v18, %s4559_s24 }
 0x1d7   : > { %v1247_v35 = vpop.permute.xlu1 %1246 }
 0x1d8   : > { %1316 = vst.msk [vmem:[#allocation3 + $0xd8] sm:$0xff] %vm1288_vm7, %v1247_v35  ;;  %v1253_v49 = vpop.permute.xlu0 %1252 }
 0x1d9   : > { %1806 = vrot.lane.b32.xlu1 %v1725_v22, %s4561_s9  ;;  %1319 = vst.msk [vmem:[#allocation3 + $0xf0] sm:$0xff] %vm1288_vm7, %v1253_v49  ;;  %v1350_v22 = vld [vmem:[#allocation2 + $0x180] sm:$0xff] }
 0x1da   : > { %1615 = vrot.lane.b32.xlu0 %v1533_v23, %s4560_s6  ;;  %v1735_v23 = vld [vmem:[#allocation2 + $0x172] sm:$0xff] }
 0x1db   : > { %v1251_v5 = vpop.permute.xlu1 %1250 }
 0x1dc   : > { %1318 = vst.msk [vmem:[#allocation3 + $0xe8] sm:$0xff] %vm1288_vm7, %v1251_v5  ;;  %v1387_v33 = vpop.permute.xlu0 %1386 }
 0x1dd   : > { %1424 = vrot.lane.b32.xlu1 %v1341_v29, %s4559_s24  ;;  %1483 = vst.msk [vmem:[#allocation3] sm:$0xff] %vm1482_vm8, %v1387_v33  ;;  %v1543_v29 = vld [vmem:[#allocation2 + $0x181] sm:$0xff] }
 0x1de   : > { %1808 = vrot.lane.b32.xlu0 %v1726_v4, %s4561_s9  ;;  %v1351_v4 = vld [vmem:[#allocation2 + $0x188] sm:$0xff] }
 0x1df   : > { %v1255_v6 = vpop.permute.xlu1 %1254 }
 0x1e0   : > { %1320 = vst.msk [vmem:[#allocation3 + $0xf8] sm:$0xff] %vm1288_vm7, %v1255_v6  ;;  %v1391_v8 = vpop.permute.xlu0 %1390  ;;  %vm6473_vm7 = vmpackc.low %vm4027_vm6, %vm4027_vm6 }
 0x1e1   : > { %1617 = vrot.lane.b32.xlu1 %v1534_v7, %s4560_s6  ;;  %1485 = vst.msk [vmem:[#allocation3 + $0x10] sm:$0xff] %vm1482_vm8, %v1391_v8  ;;  %v1544_v8 = vld [vmem:[#allocation2 + $0x189] sm:$0xff] }
 0x1e2   : > { %1426 = vrot.lane.b32.xlu0 %v1342_v9, %s4559_s24 }
 0x1e3   : > { %v1389_v10 = vpop.permute.xlu1 %1388 }
 0x1e4   : > { %1484 = vst.msk [vmem:[#allocation3 + $0x8] sm:$0xff] %vm1482_vm8, %v1389_v10  ;;  %v1395_v13 = vpop.permute.xlu0 %1394  ;;  %v1352_v10 = vld [vmem:[#allocation2 + $0x198] sm:$0xff] }
 0x1e5   : > { %1810 = vrot.lane.b32.xlu1 %v1727_v12, %s4561_s9  ;;  %1487 = vst.msk [vmem:[#allocation3 + $0x20] sm:$0xff] %vm1482_vm8, %v1395_v13 }
 0x1e6   : > { %1619 = vrot.lane.b32.xlu0 %v1535_v16, %s4560_s6 }
 0x1e7   : > { %v1393_v20 = vpop.permute.xlu1 %1392 }
 0x1e8   : > { %1486 = vst.msk [vmem:[#allocation3 + $0x18] sm:$0xff] %vm1482_vm8, %v1393_v20  ;;  %v1399_v36 = vpop.permute.xlu0 %1398 }
 0x1e9   : > { %1428 = vrot.lane.b32.xlu1 %v1343_v45, %s4559_s24  ;;  %1489 = vst.msk [vmem:[#allocation3 + $0x30] sm:$0xff] %vm1482_vm8, %v1399_v36  ;;  %v1353_v36 = vld [vmem:[#allocation2 + $0x1a0] sm:$0xff] }
 0x1ea   : > { %1812 = vrot.lane.b32.xlu0 %v1728_v17, %s4561_s9  ;;  %v1545_v17 = vld [vmem:[#allocation2 + $0x199] sm:$0xff] }
 0x1eb   : > { %v1397_v37 = vpop.permute.xlu1 %1396 }
 0x1ec   : > { %1488 = vst.msk [vmem:[#allocation3 + $0x28] sm:$0xff] %vm1482_vm8, %v1397_v37  ;;  %v1403_v0 = vpop.permute.xlu0 %1402 }
 0x1ed   : > { %1621 = vrot.lane.b32.xlu1 %v1536_v34, %s4560_s6  ;;  %1491 = vst.msk [vmem:[#allocation3 + $0x40] sm:$0xff] %vm1482_vm8, %v1403_v0  ;;  %v1546_v0 = vld [vmem:[#allocation2 + $0x1a1] sm:$0xff] }
 0x1ee   : > { %1430 = vrot.lane.b32.xlu0 %v1344_v47, %s4559_s24 }
 0x1ef   : > { %v1401_v38 = vpop.permute.xlu1 %1400 }
 0x1f0   : > { %1490 = vst.msk [vmem:[#allocation3 + $0x38] sm:$0xff] %vm1482_vm8, %v1401_v38  ;;  %v1407_v25 = vpop.permute.xlu0 %1406 }
 0x1f1   : > { %1814 = vrot.lane.b32.xlu1 %v1729_v28, %s4561_s9  ;;  %1493 = vst.msk [vmem:[#allocation3 + $0x50] sm:$0xff] %vm1482_vm8, %v1407_v25 }
 0x1f2   : > { %1623 = vrot.lane.b32.xlu0 %v1537_v50, %s4560_s6 }
 0x1f3   : > { %v1405_v52 = vpop.permute.xlu1 %1404 }
 0x1f4   : > { %1492 = vst.msk [vmem:[#allocation3 + $0x48] sm:$0xff] %vm1482_vm8, %v1405_v52  ;;  %v1411_v55 = vpop.permute.xlu0 %1410 }
 0x1f5   : > { %1432 = vrot.lane.b32.xlu1 %v1345_v54, %s4559_s24  ;;  %1495 = vst.msk [vmem:[#allocation3 + $0x60] sm:$0xff] %vm1482_vm8, %v1411_v55 }
 0x1f6   : > { %1816 = vrot.lane.b32.xlu0 %v1730_v57, %s4561_s9 }
 0x1f7   : > { %v1409_v58 = vpop.permute.xlu1 %1408 }
 0x1f8   : > { %1494 = vst.msk [vmem:[#allocation3 + $0x58] sm:$0xff] %vm1482_vm8, %v1409_v58  ;;  %v1582_v26 = vpop.permute.xlu0 %1581 }
 0x1f9   : > { %1625 = vrot.lane.b32.xlu1 %v1538_v59, %s4560_s6  ;;  %1677 = vst.msk [vmem:[#allocation3 + $0x8] sm:$0xff] %vm1675_vm9, %v1582_v26 }
 0x1fa   : > { %1434 = vrot.lane.b32.xlu0 %v1346_v48, %s4559_s24 }
 0x1fb   : > { %v1580_v61 = vpop.permute.xlu1 %1579 }
 0x1fc   : > { %1676 = vst.msk [vmem:[#allocation3] sm:$0xff] %vm1675_vm9, %v1580_v61  ;;  %v1775_v30 = vpop.permute.xlu0 %1774 }
 0x1fd   : > { %1818 = vrot.lane.b32.xlu1 %v1731_v60, %s4561_s9  ;;  %1870 = vst.msk [vmem:[#allocation3 + $0x8] sm:$0xff] %vm1868_vm10, %v1775_v30 }
 0x1fe   : > { %1627 = vrot.lane.b32.xlu0 %v1539_v27, %s4560_s6 }
 0x1ff   : > { %v1773_v62 = vpop.permute.xlu1 %1772 }
 0x200   : > { %1869 = vst.msk [vmem:[#allocation3] sm:$0xff] %vm1868_vm10, %v1773_v62  ;;  %v1586_v32 = vpop.permute.xlu0 %1585 }
 0x201   : > { %1436 = vrot.lane.b32.xlu1 %v1347_v1, %s4559_s24  ;;  %1679 = vst.msk [vmem:[#allocation3 + $0x18] sm:$0xff] %vm1675_vm9, %v1586_v32 }
 0x202   : > { %1820 = vrot.lane.b32.xlu0 %v1732_v31, %s4561_s9 }
 0x203   : > { %v1584_v3 = vpop.permute.xlu1 %1583 }
 0x204   : > { %1678 = vst.msk [vmem:[#allocation3 + $0x10] sm:$0xff] %vm1675_vm9, %v1584_v3  ;;  %v1779_v2 = vpop.permute.xlu0 %1778  ;;  %v1902_v42 = vld [vmem:[#allocation3 + $0x8] sm:$0xff] }
 0x205   : > { %1629 = vrot.lane.b32.xlu1 %v1540_v39, %s4560_s6  ;;  %1872 = vst.msk [vmem:[#allocation3 + $0x18] sm:$0xff] %vm1868_vm10, %v1779_v2 }
 0x206   : > { %1438 = vrot.lane.b32.xlu0 %v1348_v40, %s4559_s24 }
 0x207   : > { %v1777_v43 = vpop.permute.xlu1 %1776  ;;  %v1901_v44 = vld [vmem:[#allocation3] sm:$0xff] }
 0x208   : > { %1871 = vst.msk [vmem:[#allocation3 + $0x10] sm:$0xff] %vm1868_vm10, %v1777_v43  ;;  %4420 = vmatprep.mubr.msk.f32.mxu0 %vm1938_vm11, %v1901_v44  ;;  %v1590_v51 = vpop.permute.xlu0 %1589 }
 0x209   : > { %1822 = vrot.lane.b32.xlu1 %v1733_v41, %s4561_s9  ;;  %4421 = vmatmul.mubr.msk.f32.vlgmr.msra.gmra.mrb[0].mxu0 %vm1938_vm11, %v1902_v42  ;;  %1681 = vst.msk [vmem:[#allocation3 + $0x28] sm:$0xff] %vm1675_vm9, %v1590_v51 }
 0x20a   : > { %1631 = vrot.lane.b32.xlu0 %v1541_v46, %s4560_s6 }
 0x20b   : > { %v1588_v56 = vpop.permute.xlu1 %1587 }
 0x20c   : > { %1680 = vst.msk [vmem:[#allocation3 + $0x20] sm:$0xff] %vm1675_vm9, %v1588_v56  ;;  %v1783_v11 = vpop.permute.xlu0 %1782  ;;  %v1904_v15 = vld [vmem:[#allocation3 + $0x18] sm:$0xff] }
 0x20d   : > { %1440 = vrot.lane.b32.xlu1 %v1349_v53, %s4559_s24  ;;  %1874 = vst.msk [vmem:[#allocation3 + $0x28] sm:$0xff] %vm1868_vm10, %v1783_v11 }
 0x20e   : > { %1824 = vrot.lane.b32.xlu0 %v1734_v63, %s4561_s9 }
 0x20f   : > { %v1781_v18 = vpop.permute.xlu1 %1780  ;;  %v1903_v19 = vld [vmem:[#allocation3 + $0x10] sm:$0xff] }
 0x210   : > { %1873 = vst.msk [vmem:[#allocation3 + $0x20] sm:$0xff] %vm1868_vm10, %v1781_v18  ;;  %4423 = vmatprep.mubr.msk.f32.mxu0 %vm1938_vm11, %v1903_v19  ;;  %v1594_v35 = vpop.permute.xlu0 %1593  ;;  %v6893_v19 = vmov 0.0  }
 0x211   : > { %1633 = vrot.lane.b32.xlu1 %v1542_v14, %s4560_s6  ;;  %4424 = vmatmul.mubr.msk.f32.gmra.mrb[2].mxu0 %vm1938_vm11, %v1904_v15  ;;  %1683 = vst.msk [vmem:[#allocation3 + $0x38] sm:$0xff] %vm1675_vm9, %v1594_v35 }
 0x212   : > { %1442 = vrot.lane.b32.xlu0 %v1350_v22, %s4559_s24  ;;  %2302 = vst.msk [vmem:[#allocation4 + $0x20] sm:$0xff] %vm2296_vm12, %v6893_v19  ;;  %2297 = vst.msk [vmem:[#allocation4] sm:$0xff] %vm2296_vm12, %v6893_v19 }
 0x213   : > { %v1592_v49 = vpop.permute.xlu1 %1591  ;;  %2303 = vst.msk [vmem:[#allocation4 + $0x28] sm:$0x3] %vm2299_vm13, %v6893_v19  ;;  %2300 = vst.msk [vmem:[#allocation4 + $0x10] sm:$0x3] %vm2299_vm13, %v6893_v19 }
 0x214   : > { %1682 = vst.msk [vmem:[#allocation3 + $0x30] sm:$0xff] %vm1675_vm9, %v1592_v49  ;;  %v1787_v5 = vpop.permute.xlu0 %1786  ;;  %v1906_v33 = vld [vmem:[#allocation3 + $0x28] sm:$0xff]  ;;  %v1739_v49 = vld [vmem:[#allocation2 + $0x1a2] sm:$0xff] }
 0x215   : > { %1826 = vrot.lane.b32.xlu1 %v1735_v23, %s4561_s9  ;;  %1876 = vst.msk [vmem:[#allocation3 + $0x38] sm:$0xff] %vm1868_vm10, %v1787_v5  ;;  %v1738_v23 = vld [vmem:[#allocation2 + $0x19a] sm:$0xff] }
 0x216   : > { %1635 = vrot.lane.b32.xlu0 %v1543_v29, %s4560_s6  ;;  %2298 = vst.msk [vmem:[#allocation4 + $0x8] sm:$0xff] %vm2296_vm12, %v6893_v19  ;;  %2301 = vst.msk [vmem:[#allocation4 + $0x18] sm:$0xff] %vm2296_vm12, %v6893_v19 }
 0x217   : > { %v1785_v7 = vpop.permute.xlu1 %1784  ;;  %v1905_v6 = vld [vmem:[#allocation3 + $0x20] sm:$0xff]  ;;  %2304 = vst.msk [vmem:[#allocation4 + $0x30] sm:$0xff] %vm2296_vm12, %v6893_v19  ;;  %2305 = vst.msk [vmem:[#allocation4 + $0x38] sm:$0xff] %vm2296_vm12, %v6893_v19 }
 0x218   : > { %1875 = vst.msk [vmem:[#allocation3 + $0x30] sm:$0xff] %vm1868_vm10, %v1785_v7  ;;  %4426 = vmatprep.mubr.msk.f32.mxu0 %vm1938_vm11, %v1905_v6  ;;  %v1598_v9 = vpop.permute.xlu0 %1597 }
 0x219   : > { %1444 = vrot.lane.b32.xlu1 %v1351_v4, %s4559_s24  ;;  %4427 = vmatmul.mubr.msk.f32.gmra.mrb[4].mxu0 %vm1938_vm11, %v1906_v33  ;;  %1685 = vst.msk [vmem:[#allocation3 + $0x48] sm:$0xff] %vm1675_vm9, %v1598_v9 }
 0x21a   : > { %1828 = vrot.lane.b32.xlu0 %v5429_v24, %s4561_s9  ;;  %2306 = vst.msk [vmem:[#allocation4 + $0x40] sm:$0x3] %vm2299_vm13, %v6893_v19  ;;  %2309 = vst.msk [vmem:[#allocation4 + $0x58] sm:$0x3] %vm2299_vm13, %v6893_v19 }
 0x21b   : > { %v1596_v12 = vpop.permute.xlu1 %1595  ;;  %2307 = vst.msk [vmem:[#allocation4 + $0x48] sm:$0xff] %vm2296_vm12, %v6893_v19  ;;  %2308 = vst.msk [vmem:[#allocation4 + $0x50] sm:$0xff] %vm2296_vm12, %v6893_v19 }
 0x21c   : > { %1684 = vst.msk [vmem:[#allocation3 + $0x40] sm:$0xff] %vm1675_vm9, %v1596_v12  ;;  %v1791_v16 = vpop.permute.xlu0 %1790  ;;  %v1908_v13 = vld [vmem:[#allocation3 + $0x38] sm:$0xff] }
 0x21d   : > { %1637 = vrot.lane.b32.xlu1 %v1544_v8, %s4560_s6  ;;  %1878 = vst.msk [vmem:[#allocation3 + $0x48] sm:$0xff] %vm1868_vm10, %v1791_v16  ;;  %v2449_v4 = vld [vmem:[#allocation4 + $0x1] sm:$0xff]  ;;  %v2450_v33 = vld [vmem:[#allocation4 + $0x9] sm:$0xff] }
 0x21e   : > { %1446 = vrot.lane.b32.xlu0 %v1352_v10, %s4559_s24  ;;  %2310 = vst.msk [vmem:[#allocation4 + $0x60] sm:$0xff] %vm2296_vm12, %v6893_v19  ;;  %2311 = vst.msk [vmem:[#allocation4 + $0x68] sm:$0xff] %vm2296_vm12, %v6893_v19 }
 0x21f   : > { %v1789_v45 = vpop.permute.xlu1 %1788  ;;  %v1907_v20 = vld [vmem:[#allocation3 + $0x30] sm:$0xff]  ;;  %2312 = vst.msk [vmem:[#allocation4 + $0x70] sm:$0x3] %vm2299_vm13, %v6893_v19  ;;  %2315 = vst.msk [vmem:[#allocation4 + $0x88] sm:$0x3] %vm2299_vm13, %v6893_v19 }
 0x220   : > { %1877 = vst.msk [vmem:[#allocation3 + $0x40] sm:$0xff] %vm1868_vm10, %v1789_v45  ;;  %4429 = vmatprep.mubr.msk.f32.mxu0 %vm1938_vm11, %v1907_v20  ;;  %v1602_v24 = vpop.permute.xlu0 %1601 }
 0x221   : > { %1830 = vrot.lane.b32.xlu1 %v5440_v21, %s4561_s9  ;;  %4430 = vmatmul.mubr.msk.f32.gmra.mrb[6].mxu0 %vm1938_vm11, %v1908_v13  ;;  %1687 = vst.msk [vmem:[#allocation3 + $0x58] sm:$0xff] %vm1675_vm9, %v1602_v24 }
 0x222   : > { %1639 = vrot.lane.b32.xlu0 %v1545_v17, %s4560_s6  ;;  %2313 = vst.msk [vmem:[#allocation4 + $0x78] sm:$0xff] %vm2296_vm12, %v6893_v19  ;;  %2314 = vst.msk [vmem:[#allocation4 + $0x80] sm:$0xff] %vm2296_vm12, %v6893_v19 }
 0x223   : > { %v1600_v34 = vpop.permute.xlu1 %1599  ;;  %2316 = vst.msk [vmem:[#allocation4 + $0x90] sm:$0xff] %vm2296_vm12, %v6893_v19  ;;  %2317 = vst.msk [vmem:[#allocation4 + $0x98] sm:$0xff] %vm2296_vm12, %v6893_v19 }
 0x224   : > { %1686 = vst.msk [vmem:[#allocation3 + $0x50] sm:$0xff] %vm1675_vm9, %v1600_v34  ;;  %v1795_v37 = vpop.permute.xlu0 %1794  ;;  %v1910_v47 = vld [vmem:[#allocation3 + $0x48] sm:$0xff] }
 0x225   : > { %1448 = vrot.lane.b32.xlu1 %v1353_v36, %s4559_s24  ;;  %1880 = vst.msk [vmem:[#allocation3 + $0x58] sm:$0xff] %vm1868_vm10, %v1795_v37 }
 0x226   : > { %2318 = vst.msk [vmem:[#allocation4 + $0xa0] sm:$0x3] %vm2299_vm13, %v6893_v19  ;;  %2321 = vst.msk [vmem:[#allocation4 + $0xb8] sm:$0x3] %vm2299_vm13, %v6893_v19  ;;  %1832 = vrot.lane.b32.xlu0 %v1738_v23, %s4561_s9 }
 0x227   : > { %v1793_v28 = vpop.permute.xlu1 %1792  ;;  %v1909_v21 = vld [vmem:[#allocation3 + $0x40] sm:$0xff]  ;;  %2319 = vst.msk [vmem:[#allocation4 + $0xa8] sm:$0xff] %vm2296_vm12, %v6893_v19  ;;  %2320 = vst.msk [vmem:[#allocation4 + $0xb0] sm:$0xff] %vm2296_vm12, %v6893_v19 }
 0x228   : > { %1879 = vst.msk [vmem:[#allocation3 + $0x50] sm:$0xff] %vm1868_vm10, %v1793_v28  ;;  %4432 = vmatprep.mubr.msk.f32.mxu0 %vm1938_vm11, %v1909_v21  ;;  %v1604_v38 = vpop.permute.xlu0 %1603 }
 0x229   : > { %4433 = vmatmul.mubr.msk.f32.gmra.mrb[8].mxu0 %vm1938_vm11, %v1910_v47  ;;  %1641 = vrot.lane.b32.xlu1 %v1546_v0, %s4560_s6  ;;  %1688 = vst.msk [vmem:[#allocation3 + $0x60] sm:$0xff] %vm1675_vm9, %v1604_v38 }
 0x22a   : > { %2322 = vst.msk [vmem:[#allocation4 + $0xc0] sm:$0xff] %vm2296_vm12, %v6893_v19  ;;  %2323 = vst.msk [vmem:[#allocation4 + $0xc8] sm:$0xff] %vm2296_vm12, %v6893_v19  ;;  %2513 = vrot.lane.b32.xlu0 %v2449_v4, %s4555_s20 }
 0x22b   : > { %v1413_v50 = vpop.permute.xlu1 %1412  ;;  %2324 = vst.msk [vmem:[#allocation4 + $0xd0] sm:$0x3] %vm2299_vm13, %v6893_v19  ;;  %2327 = vst.msk [vmem:[#allocation4 + $0xe8] sm:$0x3] %vm2299_vm13, %v6893_v19 }
 0x22c   : > { %1496 = vst.msk [vmem:[#allocation3 + $0x68] sm:$0xff] %vm1482_vm8, %v1413_v50  ;;  %v1797_v25 = vpop.permute.xlu0 %1796  ;;  %v1912_v54 = vld [vmem:[#allocation3 + $0x58] sm:$0xff] }
 0x22d   : > { %1881 = vst.msk [vmem:[#allocation3 + $0x60] sm:$0xff] %vm1868_vm10, %v1797_v25  ;;  %1834 = vrot.lane.b32.xlu1 %v1739_v49, %s4561_s9 }
 0x22e   : > { %2325 = vst.msk [vmem:[#allocation4 + $0xd8] sm:$0xff] %vm2296_vm12, %v6893_v19  ;;  %2326 = vst.msk [vmem:[#allocation4 + $0xe0] sm:$0xff] %vm2296_vm12, %v6893_v19 }
 0x22f   : > { %v1606_v52 = vpop.permute.xlu1 %1605  ;;  %v1911_v57 = vld [vmem:[#allocation3 + $0x50] sm:$0xff]  ;;  %2328 = vst.msk [vmem:[#allocation4 + $0xf0] sm:$0xff] %vm2296_vm12, %v6893_v19  ;;  %2329 = vst.msk [vmem:[#allocation4 + $0xf8] sm:$0xff] %vm2296_vm12, %v6893_v19 }
 0x230   : > { %1689 = vst.msk [vmem:[#allocation3 + $0x68] sm:$0xff] %vm1675_vm9, %v1606_v52  ;;  %4435 = vmatprep.mubr.msk.f32.mxu0 %vm1938_vm11, %v1911_v57  ;;  %v1415_v55 = vpop.permute.xlu0 %1414 }
 0x231   : > { %4436 = vmatmul.mubr.msk.f32.gmra.mrb[10].mxu0 %vm1938_vm11, %v1912_v54  ;;  %1497 = vst.msk [vmem:[#allocation3 + $0x70] sm:$0xff] %vm1482_vm8, %v1415_v55  ;;  %2515 = vrot.lane.b32.xlu1 %v2450_v33, %s4555_s20 }
 0x232   : > { %2330 = vst.msk [vmem:[#allocation4 + $0x100] sm:$0x3] %vm2299_vm13, %v6893_v19  ;;  %2333 = vst.msk [vmem:[#allocation4 + $0x118] sm:$0x3] %vm2299_vm13, %v6893_v19 }
 0x233   : > { %v1799_v59 = vpop.permute.xlu1 %1798  ;;  %2331 = vst.msk [vmem:[#allocation4 + $0x108] sm:$0xff] %vm2296_vm12, %v6893_v19  ;;  %2332 = vst.msk [vmem:[#allocation4 + $0x110] sm:$0xff] %vm2296_vm12, %v6893_v19 }
 0x234   : > { %1882 = vst.msk [vmem:[#allocation3 + $0x68] sm:$0xff] %vm1868_vm10, %v1799_v59  ;;  %v1608_v58 = vpop.permute.xlu0 %1607  ;;  %v1913_v48 = vld [vmem:[#allocation3 + $0x60] sm:$0xff] }
 0x235   : > { %1690 = vst.msk [vmem:[#allocation3 + $0x70] sm:$0xff] %vm1675_vm9, %v1608_v58  ;;  %4438 = vmatprep.mubr.msk.f32.mxu0 %vm1938_vm11, %v1913_v48 }
 0x236   : > { %2334 = vst.msk [vmem:[#allocation4 + $0x120] sm:$0xff] %vm2296_vm12, %v6893_v19  ;;  %2335 = vst.msk [vmem:[#allocation4 + $0x128] sm:$0xff] %vm2296_vm12, %v6893_v19 }
 0x237   : > { %v1417_v26 = vpop.permute.xlu1 %1416  ;;  %2336 = vst.msk [vmem:[#allocation4 + $0x130] sm:$0x3] %vm2299_vm13, %v6893_v19  ;;  %2339 = vst.msk [vmem:[#allocation4 + $0x148] sm:$0x3] %vm2299_vm13, %v6893_v19 }
 0x238   : > { %1498 = vst.msk [vmem:[#allocation3 + $0x78] sm:$0xff] %vm1482_vm8, %v1417_v26  ;;  %v1801_v60 = vpop.permute.xlu0 %1800 }
 0x239   : > { %1883 = vst.msk [vmem:[#allocation3 + $0x70] sm:$0xff] %vm1868_vm10, %v1801_v60 }
 0x23a   : > { %2337 = vst.msk [vmem:[#allocation4 + $0x138] sm:$0xff] %vm2296_vm12, %v6893_v19  ;;  %2338 = vst.msk [vmem:[#allocation4 + $0x140] sm:$0xff] %vm2296_vm12, %v6893_v19 }
 0x23b   : > { %v1610_v61 = vpop.permute.xlu1 %1609  ;;  %v1914_v27 = vld [vmem:[#allocation3 + $0x68] sm:$0xff]  ;;  %2340 = vst.msk [vmem:[#allocation4 + $0x150] sm:$0xff] %vm2296_vm12, %v6893_v19  ;;  %2341 = vst.msk [vmem:[#allocation4 + $0x158] sm:$0xff] %vm2296_vm12, %v6893_v19 }
 0x23c   : > { %1691 = vst.msk [vmem:[#allocation3 + $0x78] sm:$0xff] %vm1675_vm9, %v1610_v61  ;;  %4439 = vmatmul.mubr.msk.f32.gmra.mrb[12].mxu0 %vm1938_vm11, %v1914_v27  ;;  %v1419_v30 = vpop.permute.xlu0 %1418 }
 0x23d   : > { %1499 = vst.msk [vmem:[#allocation3 + $0x80] sm:$0xff] %vm1482_vm8, %v1419_v30 }
 0x23e   : > { %2342 = vst.msk [vmem:[#allocation4 + $0x160] sm:$0x3] %vm2299_vm13, %v6893_v19  ;;  %2345 = vst.msk [vmem:[#allocation4 + $0x178] sm:$0x3] %vm2299_vm13, %v6893_v19 }
 0x23f   : > { %v1803_v1 = vpop.permute.xlu1 %1802  ;;  %2343 = vst.msk [vmem:[#allocation4 + $0x168] sm:$0xff] %vm2296_vm12, %v6893_v19  ;;  %2344 = vst.msk [vmem:[#allocation4 + $0x170] sm:$0xff] %vm2296_vm12, %v6893_v19 }
 0x240   : > { %1884 = vst.msk [vmem:[#allocation3 + $0x78] sm:$0xff] %vm1868_vm10, %v1803_v1  ;;  %v1612_v62 = vpop.permute.xlu0 %1611  ;;  %v1915_v31 = vld [vmem:[#allocation3 + $0x70] sm:$0xff] }
 0x241   : > { %1692 = vst.msk [vmem:[#allocation3 + $0x80] sm:$0xff] %vm1675_vm9, %v1612_v62  ;;  %4441 = vmatprep.mubr.msk.f32.mxu0 %vm1938_vm11, %v1915_v31 }
 0x242   : > { %2346 = vst.msk [vmem:[#allocation4 + $0x180] sm:$0xff] %vm2296_vm12, %v6893_v19  ;;  %2347 = vst.msk [vmem:[#allocation4 + $0x188] sm:$0xff] %vm2296_vm12, %v6893_v19 }
 0x243   : > { %v1421_v32 = vpop.permute.xlu1 %1420  ;;  %2348 = vst.msk [vmem:[#allocation4 + $0x190] sm:$0x3] %vm2299_vm13, %v6893_v19  ;;  %2351 = vst.msk [vmem:[#allocation4 + $0x1a8] sm:$0x3] %vm2299_vm13, %v6893_v19 }
 0x244   : > { %1500 = vst.msk [vmem:[#allocation3 + $0x88] sm:$0xff] %vm1482_vm8, %v1421_v32  ;;  %v1805_v39 = vpop.permute.xlu0 %1804 }
 0x245   : > { %1885 = vst.msk [vmem:[#allocation3 + $0x80] sm:$0xff] %vm1868_vm10, %v1805_v39 }
 0x246   : > { %2349 = vst.msk [vmem:[#allocation4 + $0x198] sm:$0xff] %vm2296_vm12, %v6893_v19  ;;  %2350 = vst.msk [vmem:[#allocation4 + $0x1a0] sm:$0xff] %vm2296_vm12, %v6893_v19 }
 0x247   : > { %v1614_v3 = vpop.permute.xlu1 %1613  ;;  %v1916_v40 = vld [vmem:[#allocation3 + $0x78] sm:$0xff] }
 0x248   : > { %1693 = vst.msk [vmem:[#allocation3 + $0x88] sm:$0xff] %vm1675_vm9, %v1614_v3  ;;  %4442 = vmatmul.mubr.msk.f32.gmra.mrb[14].mxu0 %vm1938_vm11, %v1916_v40  ;;  %v1423_v2 = vpop.permute.xlu0 %1422  ;;  %v2385_v3 = vld [vmem:[#allocation4] sm:$0xff]  ;;  %v2386_v40 = vld [vmem:[#allocation4 + $0x8] sm:$0xff] }
 0x249   : > { %1501 = vst.msk [vmem:[#allocation3 + $0x90] sm:$0xff] %vm1482_vm8, %v1423_v2 }
 0x24a   : > { %2417 = vst.msk [vmem:[#allocation5] sm:$0xff] %vm2296_vm12, %v2385_v3  ;;  %2418 = vst.msk [vmem:[#allocation5 + $0x8] sm:$0xff] %vm2296_vm12, %v2386_v40 }
 0x24b   : > { %v1807_v41 = vpop.permute.xlu1 %1806 }
 0x24c   : > { %1886 = vst.msk [vmem:[#allocation3 + $0x88] sm:$0xff] %vm1868_vm10, %v1807_v41  ;;  %v1616_v42 = vpop.permute.xlu0 %1615  ;;  %v1917_v43 = vld [vmem:[#allocation3 + $0x80] sm:$0xff] }
 0x24d   : > { %1694 = vst.msk [vmem:[#allocation3 + $0x90] sm:$0xff] %vm1675_vm9, %v1616_v42  ;;  %4444 = vmatprep.mubr.msk.f32.mxu0 %vm1938_vm11, %v1917_v43 }
 0x24f   : > { %v1425_v44 = vpop.permute.xlu1 %1424 }
 0x250   : > { %1502 = vst.msk [vmem:[#allocation3 + $0x98] sm:$0xff] %vm1482_vm8, %v1425_v44  ;;  %v1809_v46 = vpop.permute.xlu0 %1808 }
 0x251   : > { %1887 = vst.msk [vmem:[#allocation3 + $0x90] sm:$0xff] %vm1868_vm10, %v1809_v46 }
 0x253   : > { %v1618_v51 = vpop.permute.xlu1 %1617  ;;  %v1918_v53 = vld [vmem:[#allocation3 + $0x88] sm:$0xff] }
 0x254   : > { %1695 = vst.msk [vmem:[#allocation3 + $0x98] sm:$0xff] %vm1675_vm9, %v1618_v51  ;;  %4445 = vmatmul.mubr.msk.f32.gmra.mrb[16].mxu0 %vm1938_vm11, %v1918_v53  ;;  %v1427_v56 = vpop.permute.xlu0 %1426 }
 0x255   : > { %1503 = vst.msk [vmem:[#allocation3 + $0xa0] sm:$0xff] %vm1482_vm8, %v1427_v56 }
 0x257   : > { %v1811_v63 = vpop.permute.xlu1 %1810 }
 0x258   : > { %1888 = vst.msk [vmem:[#allocation3 + $0x98] sm:$0xff] %vm1868_vm10, %v1811_v63  ;;  %v1620_v11 = vpop.permute.xlu0 %1619  ;;  %v1919_v14 = vld [vmem:[#allocation3 + $0x90] sm:$0xff] }
 0x259   : > { %1696 = vst.msk [vmem:[#allocation3 + $0xa0] sm:$0xff] %vm1675_vm9, %v1620_v11  ;;  %4447 = vmatprep.mubr.msk.f32.mxu0 %vm1938_vm11, %v1919_v14 }
 0x25b   : > { %v1429_v15 = vpop.permute.xlu1 %1428 }
 0x25c   : > { %1504 = vst.msk [vmem:[#allocation3 + $0xa8] sm:$0xff] %vm1482_vm8, %v1429_v15  ;;  %v1813_v18 = vpop.permute.xlu0 %1812 }
 0x25d   : > { %1889 = vst.msk [vmem:[#allocation3 + $0xa0] sm:$0xff] %vm1868_vm10, %v1813_v18 }
 0x25f   : > { %v1622_v22 = vpop.permute.xlu1 %1621  ;;  %v1920_v35 = vld [vmem:[#allocation3 + $0x98] sm:$0xff] }
 0x260   : > { %1697 = vst.msk [vmem:[#allocation3 + $0xa8] sm:$0xff] %vm1675_vm9, %v1622_v22  ;;  %4448 = vmatmul.mubr.msk.f32.gmra.mrb[18].mxu0 %vm1938_vm11, %v1920_v35  ;;  %v1431_v29 = vpop.permute.xlu0 %1430 }
 0x261   : > { %1505 = vst.msk [vmem:[#allocation3 + $0xb0] sm:$0xff] %vm1482_vm8, %v1431_v29 }
 0x263   : > { %v1815_v5 = vpop.permute.xlu1 %1814 }
 0x264   : > { %1890 = vst.msk [vmem:[#allocation3 + $0xa8] sm:$0xff] %vm1868_vm10, %v1815_v5  ;;  %v1624_v7 = vpop.permute.xlu0 %1623  ;;  %v1921_v6 = vld [vmem:[#allocation3 + $0xa0] sm:$0xff] }
 0x265   : > { %1698 = vst.msk [vmem:[#allocation3 + $0xb0] sm:$0xff] %vm1675_vm9, %v1624_v7  ;;  %4450 = vmatprep.mubr.msk.f32.mxu0 %vm1938_vm11, %v1921_v6 }
 0x267   : > { %v1433_v9 = vpop.permute.xlu1 %1432 }
 0x268   : > { %1506 = vst.msk [vmem:[#allocation3 + $0xb8] sm:$0xff] %vm1482_vm8, %v1433_v9  ;;  %v1817_v8 = vpop.permute.xlu0 %1816 }
 0x269   : > { %1891 = vst.msk [vmem:[#allocation3 + $0xb0] sm:$0xff] %vm1868_vm10, %v1817_v8 }
 0x26b   : > { %v1626_v12 = vpop.permute.xlu1 %1625  ;;  %v1922_v10 = vld [vmem:[#allocation3 + $0xa8] sm:$0xff] }
 0x26c   : > { %1699 = vst.msk [vmem:[#allocation3 + $0xb8] sm:$0xff] %vm1675_vm9, %v1626_v12  ;;  %4451 = vmatmul.mubr.msk.f32.gmra.mrb[20].mxu0 %vm1938_vm11, %v1922_v10  ;;  %v1435_v16 = vpop.permute.xlu0 %1434 }
 0x26d   : > { %1507 = vst.msk [vmem:[#allocation3 + $0xc0] sm:$0xff] %vm1482_vm8, %v1435_v16 }
 0x26f   : > { %v1819_v13 = vpop.permute.xlu1 %1818 }
 0x270   : > { %1892 = vst.msk [vmem:[#allocation3 + $0xb8] sm:$0xff] %vm1868_vm10, %v1819_v13  ;;  %v1628_v45 = vpop.permute.xlu0 %1627  ;;  %v1923_v20 = vld [vmem:[#allocation3 + $0xb0] sm:$0xff] }
 0x271   : > { %1700 = vst.msk [vmem:[#allocation3 + $0xc0] sm:$0xff] %vm1675_vm9, %v1628_v45  ;;  %4453 = vmatprep.mubr.msk.f32.mxu0 %vm1938_vm11, %v1923_v20 }
 0x273   : > { %v1437_v17 = vpop.permute.xlu1 %1436 }
 0x274   : > { %1508 = vst.msk [vmem:[#allocation3 + $0xc8] sm:$0xff] %vm1482_vm8, %v1437_v17  ;;  %v1821_v24 = vpop.permute.xlu0 %1820 }
 0x275   : > { %1893 = vst.msk [vmem:[#allocation3 + $0xc0] sm:$0xff] %vm1868_vm10, %v1821_v24 }
 0x277   : > { %v1630_v36 = vpop.permute.xlu1 %1629  ;;  %v1924_v34 = vld [vmem:[#allocation3 + $0xb8] sm:$0xff] }
 0x278   : > { %1701 = vst.msk [vmem:[#allocation3 + $0xc8] sm:$0xff] %vm1675_vm9, %v1630_v36  ;;  %4454 = vmatmul.mubr.msk.f32.gmra.mrb[22].mxu0 %vm1938_vm11, %v1924_v34  ;;  %v1439_v37 = vpop.permute.xlu0 %1438 }
 0x279   : > { %1509 = vst.msk [vmem:[#allocation3 + $0xd0] sm:$0xff] %vm1482_vm8, %v1439_v37 }
 0x27b   : > { %v1823_v47 = vpop.permute.xlu1 %1822 }
 0x27c   : > { %1894 = vst.msk [vmem:[#allocation3 + $0xc8] sm:$0xff] %vm1868_vm10, %v1823_v47  ;;  %v1632_v0 = vpop.permute.xlu0 %1631  ;;  %v1925_v28 = vld [vmem:[#allocation3 + $0xc0] sm:$0xff] }
 0x27d   : > { %1702 = vst.msk [vmem:[#allocation3 + $0xd0] sm:$0xff] %vm1675_vm9, %v1632_v0  ;;  %4456 = vmatprep.mubr.msk.f32.mxu0 %vm1938_vm11, %v1925_v28 }
 0x27f   : > { %v1441_v21 = vpop.permute.xlu1 %1440 }
 0x280   : > { %1510 = vst.msk [vmem:[#allocation3 + $0xd8] sm:$0xff] %vm1482_vm8, %v1441_v21  ;;  %v1825_v38 = vpop.permute.xlu0 %1824 }
 0x281   : > { %1895 = vst.msk [vmem:[#allocation3 + $0xd0] sm:$0xff] %vm1868_vm10, %v1825_v38 }
 0x283   : > { %v1634_v50 = vpop.permute.xlu1 %1633  ;;  %v1926_v25 = vld [vmem:[#allocation3 + $0xc8] sm:$0xff] }
 0x284   : > { %1703 = vst.msk [vmem:[#allocation3 + $0xd8] sm:$0xff] %vm1675_vm9, %v1634_v50  ;;  %4457 = vmatmul.mubr.msk.f32.gmra.mrb[24].mxu0 %vm1938_vm11, %v1926_v25  ;;  %v1443_v54 = vpop.permute.xlu0 %1442 }
 0x285   : > { %1511 = vst.msk [vmem:[#allocation3 + $0xe0] sm:$0xff] %vm1482_vm8, %v1443_v54 }
 0x287   : > { %v1827_v52 = vpop.permute.xlu1 %1826 }
 0x288   : > { %1896 = vst.msk [vmem:[#allocation3 + $0xd8] sm:$0xff] %vm1868_vm10, %v1827_v52  ;;  %v1636_v57 = vpop.permute.xlu0 %1635  ;;  %v1927_v55 = vld [vmem:[#allocation3 + $0xd0] sm:$0xff] }
 0x289   : > { %1704 = vst.msk [vmem:[#allocation3 + $0xe0] sm:$0xff] %vm1675_vm9, %v1636_v57  ;;  %4459 = vmatprep.mubr.msk.f32.mxu0 %vm1938_vm11, %v1927_v55 }
 0x28b   : > { %v1445_v59 = vpop.permute.xlu1 %1444 }
 0x28c   : > { %1512 = vst.msk [vmem:[#allocation3 + $0xe8] sm:$0xff] %vm1482_vm8, %v1445_v59  ;;  %v1829_v58 = vpop.permute.xlu0 %1828 }
 0x28d   : > { %1897 = vst.msk [vmem:[#allocation3 + $0xe0] sm:$0xff] %vm1868_vm10, %v1829_v58 }
 0x28f   : > { %v1638_v48 = vpop.permute.xlu1 %1637  ;;  %v1928_v26 = vld [vmem:[#allocation3 + $0xd8] sm:$0xff] }
 0x290   : > { %1705 = vst.msk [vmem:[#allocation3 + $0xe8] sm:$0xff] %vm1675_vm9, %v1638_v48  ;;  %4460 = vmatmul.mubr.msk.f32.gmra.mrb[26].mxu0 %vm1938_vm11, %v1928_v26  ;;  %v1447_v30 = vpop.permute.xlu0 %1446 }
 0x291   : > { %1513 = vst.msk [vmem:[#allocation3 + $0xf0] sm:$0xff] %vm1482_vm8, %v1447_v30 }
 0x293   : > { %v1831_v60 = vpop.permute.xlu1 %1830 }
 0x294   : > { %1898 = vst.msk [vmem:[#allocation3 + $0xe8] sm:$0xff] %vm1868_vm10, %v1831_v60  ;;  %v1929_v61 = vld [vmem:[#allocation3 + $0xe0] sm:$0xff]  ;;  %v1640_v62 = vpop.permute.xlu0 %1639 }
 0x295   : > { %4462 = vmatprep.mubr.msk.f32.mxu0 %vm1938_vm11, %v1929_v61  ;;  %1706 = vst.msk [vmem:[#allocation3 + $0xf0] sm:$0xff] %vm1675_vm9, %v1640_v62 }
 0x297   : > { %v1449_v1 = vpop.permute.xlu1 %1448 }
 0x298   : > { %1514 = vst.msk [vmem:[#allocation3 + $0xf8] sm:$0xff] %vm1482_vm8, %v1449_v1  ;;  %v1833_v32 = vpop.permute.xlu0 %1832 }
 0x299   : > { %1899 = vst.msk [vmem:[#allocation3 + $0xf0] sm:$0xff] %vm1868_vm10, %v1833_v32 }
 0x29b   : > { %v1930_v27 = vld [vmem:[#allocation3 + $0xe8] sm:$0xff]  ;;  %v1642_v31 = vpop.permute.xlu1 %1641 }
 0x29c   : > { %4463 = vmatmul.mubr.msk.f32.gmra.mrb[28].mxu0 %vm1938_vm11, %v1930_v27  ;;  %1707 = vst.msk [vmem:[#allocation3 + $0xf8] sm:$0xff] %vm1675_vm9, %v1642_v31  ;;  %v2514_v2 = vpop.permute.xlu0 %2513 }
 0x29d   : > { %2610 = vst.msk [vmem:[#allocation5] sm:$0xff] %vm2609_vm14, %v2514_v2 }
 0x29f   : > { %v1835_v39 = vpop.permute.xlu1 %1834 }
 0x2a0   : > { %1900 = vst.msk [vmem:[#allocation3 + $0xf8] sm:$0xff] %vm1868_vm10, %v1835_v39 }
 0x2a3   : > { %v2516_v41 = vpop.permute.xlu1 %2515 }
 0x2a4   : > { %2611 = vst.msk [vmem:[#allocation5 + $0x8] sm:$0xff] %vm2609_vm14, %v2516_v41 }
 0x2dc   : > { %v4422_v42 = vpop.f32.mrb[0].mxu0 }
 0x2dd   : > { %v2265_v43 = vmax.f32 %v4422_v42, 0.0  ;;  %v2105_v44 = vpop.f32.mrb[1].mxu0 }
 0x2de   : > { %v2264_v46 = vmax.f32 %v2105_v44, 0.0 }
 0x2df   : > { %2354 = vst.msk [vmem:[#allocation4 + $0x21] sm:$0xff] %vm2296_vm12, %v2265_v43 }
 0x2e0   : > { %2353 = vst.msk [vmem:[#allocation4 + $0x19] sm:$0xff] %vm2296_vm12, %v2264_v46 }
 0x2e4   : > { %v4425_v51 = vpop.f32.mrb[2].mxu0 }
 0x2e5   : > { %v2267_v53 = vmax.f32 %v4425_v51, 0.0  ;;  %v2115_v56 = vpop.f32.mrb[3].mxu0 }
 0x2e6   : > { %v2266_v63 = vmax.f32 %v2115_v56, 0.0  ;;  %v5870_v11 = vld [vmem:[#allocation4 + $0x21] sm:$0xff] }
 0x2e7   : > { %2356 = vst.msk [vmem:[#allocation4 + $0x39] sm:$0xff] %vm2296_vm12, %v2267_v53  ;;  %2519 = vrot.lane.b32.xlu1 %v5870_v11, %s4555_s20  ;;  %v5875_v14 = vld [vmem:[#allocation4 + $0x19] sm:$0xff] }
 0x2e8   : > { %v5877_v15 = vld [vmem:[#allocation4 + $0x18] sm:$0xff]  ;;  %v5879_v18 = vld [vmem:[#allocation4 + $0x20] sm:$0xff]  ;;  %2355 = vst.msk [vmem:[#allocation4 + $0x31] sm:$0xff] %vm2296_vm12, %v2266_v63  ;;  %2517 = vrot.lane.b32.xlu0 %v5875_v14, %s4555_s20 }
 0x2e9   : > { %2419 = vst.msk [vmem:[#allocation5 + $0x10] sm:$0xff] %vm2296_vm12, %v5877_v15  ;;  %2420 = vst.msk [vmem:[#allocation5 + $0x18] sm:$0xff] %vm2296_vm12, %v5879_v18 }
 0x2ec   : > { %v4428_v19 = vpop.f32.mrb[4].mxu0 }
 0x2ed   : > { %v2269_v22 = vmax.f32 %v4428_v19, 0.0  ;;  %v2125_v35 = vpop.f32.mrb[5].mxu0 }
 0x2ee   : > { %v2268_v23 = vmax.f32 %v2125_v35, 0.0  ;;  %v5888_v49 = vld [vmem:[#allocation4 + $0x39] sm:$0xff] }
 0x2ef   : > { %2358 = vst.msk [vmem:[#allocation4 + $0x51] sm:$0xff] %vm2296_vm12, %v2269_v22  ;;  %2523 = vrot.lane.b32.xlu1 %v5888_v49, %s4555_s20  ;;  %v5893_v29 = vld [vmem:[#allocation4 + $0x31] sm:$0xff] }
 0x2f0   : > { %v5895_v5 = vld [vmem:[#allocation4 + $0x38] sm:$0xff]  ;;  %v5897_v4 = vld [vmem:[#allocation4 + $0x30] sm:$0xff]  ;;  %2357 = vst.msk [vmem:[#allocation4 + $0x49] sm:$0xff] %vm2296_vm12, %v2268_v23  ;;  %2521 = vrot.lane.b32.xlu0 %v5893_v29, %s4555_s20 }
 0x2f1   : > { %2422 = vst.msk [vmem:[#allocation5 + $0x28] sm:$0xff] %vm2296_vm12, %v5895_v5  ;;  %2421 = vst.msk [vmem:[#allocation5 + $0x20] sm:$0xff] %vm2296_vm12, %v5897_v4  ;;  %v1931_v22 = vld [vmem:[#allocation3 + $0xf0] sm:$0xff]  ;;  %v1932_v35 = vld [vmem:[#allocation3 + $0xf8] sm:$0xff] }
 0x2f2   : > { %4465 = vmatprep.mubr.msk.f32.mxu0 %vm1938_vm11, %v1931_v22 }
 0x2f3   : > { %4466 = vmatmul.mubr.msk.f32.gmra.mrb[30].mxu0 %vm1938_vm11, %v1932_v35 }
 0x2f4   : > { %v4431_v33 = vpop.f32.mrb[6].mxu0 }
 0x2f5   : > { %v2271_v7 = vmax.f32 %v4431_v33, 0.0  ;;  %v2135_v6 = vpop.f32.mrb[7].mxu0 }
 0x2f6   : > { %v2270_v9 = vmax.f32 %v2135_v6, 0.0  ;;  %v5906_v8 = vld [vmem:[#allocation4 + $0x51] sm:$0xff] }
 0x2f7   : > { %2360 = vst.msk [vmem:[#allocation4 + $0x69] sm:$0xff] %vm2296_vm12, %v2271_v7  ;;  %2527 = vrot.lane.b32.xlu1 %v5906_v8, %s4555_s20  ;;  %v5911_v12 = vld [vmem:[#allocation4 + $0x49] sm:$0xff] }
 0x2f8   : > { %v5913_v10 = vld [vmem:[#allocation4 + $0x50] sm:$0xff]  ;;  %v5915_v16 = vld [vmem:[#allocation4 + $0x48] sm:$0xff]  ;;  %2359 = vst.msk [vmem:[#allocation4 + $0x61] sm:$0xff] %vm2296_vm12, %v2270_v9  ;;  %2525 = vrot.lane.b32.xlu0 %v5911_v12, %s4555_s20 }
 0x2f9   : > { %2424 = vst.msk [vmem:[#allocation5 + $0x38] sm:$0xff] %vm2296_vm12, %v5913_v10  ;;  %2423 = vst.msk [vmem:[#allocation5 + $0x30] sm:$0xff] %vm2296_vm12, %v5915_v16 }
 0x2fc   : > { %v4434_v13 = vpop.f32.mrb[8].mxu0 }
 0x2fd   : > { %v2273_v45 = vmax.f32 %v4434_v13, 0.0  ;;  %v2145_v20 = vpop.f32.mrb[9].mxu0 }
 0x2fe   : > { %v2272_v17 = vmax.f32 %v2145_v20, 0.0  ;;  %v2458_v24 = vld [vmem:[#allocation4 + $0x69] sm:$0xff] }
 0x2ff   : > { %2362 = vst.msk [vmem:[#allocation4 + $0x81] sm:$0xff] %vm2296_vm12, %v2273_v45  ;;  %2531 = vrot.lane.b32.xlu1 %v2458_v24, %s4555_s20  ;;  %v2457_v36 = vld [vmem:[#allocation4 + $0x61] sm:$0xff] }
 0x300   : > { %v5926_v34 = vld [vmem:[#allocation4 + $0x68] sm:$0xff]  ;;  %v5928_v37 = vld [vmem:[#allocation4 + $0x60] sm:$0xff]  ;;  %2361 = vst.msk [vmem:[#allocation4 + $0x79] sm:$0xff] %vm2296_vm12, %v2272_v17  ;;  %2529 = vrot.lane.b32.xlu0 %v2457_v36, %s4555_s20 }
 0x301   : > { %2426 = vst.msk [vmem:[#allocation5 + $0x48] sm:$0xff] %vm2296_vm12, %v5926_v34  ;;  %2425 = vst.msk [vmem:[#allocation5 + $0x40] sm:$0xff] %vm2296_vm12, %v5928_v37 }
 0x304   : > { %v4437_v47 = vpop.f32.mrb[10].mxu0 }
 0x305   : > { %v2275_v0 = vmax.f32 %v4437_v47, 0.0  ;;  %v2155_v28 = vpop.f32.mrb[11].mxu0 }
 0x306   : > { %v2274_v21 = vmax.f32 %v2155_v28, 0.0  ;;  %v2460_v38 = vld [vmem:[#allocation4 + $0x81] sm:$0xff] }
 0x307   : > { %2364 = vst.msk [vmem:[#allocation4 + $0x99] sm:$0xff] %vm2296_vm12, %v2275_v0  ;;  %2535 = vrot.lane.b32.xlu1 %v2460_v38, %s4555_s20  ;;  %v2459_v50 = vld [vmem:[#allocation4 + $0x79] sm:$0xff] }
 0x308   : > { %v5938_v25 = vld [vmem:[#allocation4 + $0x80] sm:$0xff]  ;;  %v5940_v54 = vld [vmem:[#allocation4 + $0x78] sm:$0xff]  ;;  %2363 = vst.msk [vmem:[#allocation4 + $0x91] sm:$0xff] %vm2296_vm12, %v2274_v21  ;;  %2533 = vrot.lane.b32.xlu0 %v2459_v50, %s4555_s20 }
 0x309   : > { %2428 = vst.msk [vmem:[#allocation5 + $0x58] sm:$0xff] %vm2296_vm12, %v5938_v25  ;;  %2427 = vst.msk [vmem:[#allocation5 + $0x50] sm:$0xff] %vm2296_vm12, %v5940_v54 }
 0x30e   : > { %v2462_v52 = vld [vmem:[#allocation4 + $0x99] sm:$0xff] }
 0x30f   : > { %v4440_v57 = vpop.f32.mrb[12].mxu0  ;;  %2539 = vrot.lane.b32.xlu1 %v2462_v52, %s4555_s20  ;;  %v2461_v55 = vld [vmem:[#allocation4 + $0x91] sm:$0xff] }
 0x310   : > { %v5949_v59 = vld [vmem:[#allocation4 + $0x98] sm:$0xff]  ;;  %v5951_v58 = vld [vmem:[#allocation4 + $0x90] sm:$0xff]  ;;  %v2277_v48 = vmax.f32 %v4440_v57, 0.0  ;;  %v2165_v26 = vpop.f32.mrb[13].mxu0  ;;  %2537 = vrot.lane.b32.xlu0 %v2461_v55, %s4555_s20 }
 0x311   : > { %2430 = vst.msk [vmem:[#allocation5 + $0x68] sm:$0xff] %vm2296_vm12, %v5949_v59  ;;  %2429 = vst.msk [vmem:[#allocation5 + $0x60] sm:$0xff] %vm2296_vm12, %v5951_v58  ;;  %v2276_v60 = vmax.f32 %v2165_v26, 0.0 }
 0x312   : > { %2366 = vst.msk [vmem:[#allocation4 + $0xb1] sm:$0xff] %vm2296_vm12, %v2277_v48 }
 0x313   : > { %2365 = vst.msk [vmem:[#allocation4 + $0xa9] sm:$0xff] %vm2296_vm12, %v2276_v60 }
 0x319   : > { %v2464_v61 = vld [vmem:[#allocation4 + $0xb1] sm:$0xff] }
 0x31a   : > { %2543 = vrot.lane.b32.xlu1 %v2464_v61, %s4555_s20  ;;  %v2463_v27 = vld [vmem:[#allocation4 + $0xa9] sm:$0xff] }
 0x31b   : > { %v5961_v30 = vld [vmem:[#allocation4 + $0xb0] sm:$0xff]  ;;  %v5963_v1 = vld [vmem:[#allocation4 + $0xa8] sm:$0xff]  ;;  %2541 = vrot.lane.b32.xlu0 %v2463_v27, %s4555_s20  ;;  %v4443_v62 = vpop.f32.mrb[14].mxu0 }
 0x31c   : > { %2432 = vst.msk [vmem:[#allocation5 + $0x78] sm:$0xff] %vm2296_vm12, %v5961_v30  ;;  %2431 = vst.msk [vmem:[#allocation5 + $0x70] sm:$0xff] %vm2296_vm12, %v5963_v1  ;;  %v2279_v31 = vmax.f32 %v4443_v62, 0.0  ;;  %v2175_v32 = vpop.f32.mrb[15].mxu0 }
 0x31d   : > { %v2278_v39 = vmax.f32 %v2175_v32, 0.0 }
 0x31e   : > { %2368 = vst.msk [vmem:[#allocation4 + $0xc9] sm:$0xff] %vm2296_vm12, %v2279_v31 }
 0x31f   : > { %2367 = vst.msk [vmem:[#allocation4 + $0xc1] sm:$0xff] %vm2296_vm12, %v2278_v39 }
 0x325   : > { %v2466_v3 = vld [vmem:[#allocation4 + $0xc9] sm:$0xff] }
 0x326   : > { %2547 = vrot.lane.b32.xlu1 %v2466_v3, %s4555_s20  ;;  %v2465_v40 = vld [vmem:[#allocation4 + $0xc1] sm:$0xff] }
 0x327   : > { %v2402_v2 = vld [vmem:[#allocation4 + $0xc8] sm:$0xff]  ;;  %v5973_v41 = vld [vmem:[#allocation4 + $0xc0] sm:$0xff]  ;;  %2545 = vrot.lane.b32.xlu0 %v2465_v40, %s4555_s20  ;;  %v4446_v42 = vpop.f32.mrb[16].mxu0 }
 0x328   : > { %2434 = vst.msk [vmem:[#allocation5 + $0x88] sm:$0xff] %vm2296_vm12, %v2402_v2  ;;  %2433 = vst.msk [vmem:[#allocation5 + $0x80] sm:$0xff] %vm2296_vm12, %v5973_v41  ;;  %v2281_v43 = vmax.f32 %v4446_v42, 0.0  ;;  %v2185_v44 = vpop.f32.mrb[17].mxu0 }
 0x329   : > { %v2280_v46 = vmax.f32 %v2185_v44, 0.0 }
 0x32a   : > { %2370 = vst.msk [vmem:[#allocation4 + $0xe1] sm:$0xff] %vm2296_vm12, %v2281_v43 }
 0x32b   : > { %2369 = vst.msk [vmem:[#allocation4 + $0xd9] sm:$0xff] %vm2296_vm12, %v2280_v46 }
 0x331   : > { %v5981_v51 = vld [vmem:[#allocation4 + $0xe1] sm:$0xff] }
 0x332   : > { %2551 = vrot.lane.b32.xlu1 %v5981_v51, %s4555_s20  ;;  %v5985_v53 = vld [vmem:[#allocation4 + $0xd9] sm:$0xff] }
 0x333   : > { %v5987_v56 = vld [vmem:[#allocation4 + $0xe0] sm:$0xff]  ;;  %2549 = vrot.lane.b32.xlu0 %v5985_v53, %s4555_s20  ;;  %v4449_v63 = vpop.f32.mrb[18].mxu0  ;;  %v5993_v19 = vld [vmem:[#allocation4 + $0xd8] sm:$0xff] }
 0x334   : > { %2436 = vst.msk [vmem:[#allocation5 + $0x98] sm:$0xff] %vm2296_vm12, %v5987_v56  ;;  %v2283_v23 = vmax.f32 %v4449_v63, 0.0  ;;  %v2195_v33 = vpop.f32.mrb[19].mxu0  ;;  %2435 = vst.msk [vmem:[#allocation5 + $0x90] sm:$0xff] %vm2296_vm12, %v5993_v19 }
 0x335   : > { %v2282_v7 = vmax.f32 %v2195_v33, 0.0 }
 0x336   : > { %2372 = vst.msk [vmem:[#allocation4 + $0xf9] sm:$0xff] %vm2296_vm12, %v2283_v23 }
 0x337   : > { %2371 = vst.msk [vmem:[#allocation4 + $0xf1] sm:$0xff] %vm2296_vm12, %v2282_v7 }
 0x33d   : > { %v6001_v6 = vld [vmem:[#allocation4 + $0xf9] sm:$0xff] }
 0x33e   : > { %2555 = vrot.lane.b32.xlu1 %v6001_v6, %s4555_s20  ;;  %v6005_v9 = vld [vmem:[#allocation4 + $0xf1] sm:$0xff] }
 0x33f   : > { %v6007_v13 = vld [vmem:[#allocation4 + $0xf8] sm:$0xff]  ;;  %2553 = vrot.lane.b32.xlu0 %v6005_v9, %s4555_s20  ;;  %v4452_v45 = vpop.f32.mrb[20].mxu0  ;;  %v6013_v20 = vld [vmem:[#allocation4 + $0xf0] sm:$0xff] }
 0x340   : > { %2438 = vst.msk [vmem:[#allocation5 + $0xa8] sm:$0xff] %vm2296_vm12, %v6007_v13  ;;  %v2285_v17 = vmax.f32 %v4452_v45, 0.0  ;;  %v2205_v24 = vpop.f32.mrb[21].mxu0  ;;  %2437 = vst.msk [vmem:[#allocation5 + $0xa0] sm:$0xff] %vm2296_vm12, %v6013_v20 }
 0x341   : > { %v2284_v36 = vmax.f32 %v2205_v24, 0.0 }
 0x342   : > { %2374 = vst.msk [vmem:[#allocation4 + $0x111] sm:$0xff] %vm2296_vm12, %v2285_v17 }
 0x343   : > { %2373 = vst.msk [vmem:[#allocation4 + $0x109] sm:$0xff] %vm2296_vm12, %v2284_v36 }
 0x349   : > { %v6019_v47 = vld [vmem:[#allocation4 + $0x111] sm:$0xff] }
 0x34a   : > { %2559 = vrot.lane.b32.xlu1 %v6019_v47, %s4555_s20  ;;  %v6023_v0 = vld [vmem:[#allocation4 + $0x109] sm:$0xff] }
 0x34b   : > { %v6025_v28 = vld [vmem:[#allocation4 + $0x110] sm:$0xff]  ;;  %2557 = vrot.lane.b32.xlu0 %v6023_v0, %s4555_s20  ;;  %v4455_v21 = vpop.f32.mrb[22].mxu0  ;;  %v6031_v38 = vld [vmem:[#allocation4 + $0x108] sm:$0xff] }
 0x34c   : > { %2440 = vst.msk [vmem:[#allocation5 + $0xb8] sm:$0xff] %vm2296_vm12, %v6025_v28  ;;  %v2287_v50 = vmax.f32 %v4455_v21, 0.0  ;;  %v2215_v52 = vpop.f32.mrb[23].mxu0  ;;  %2439 = vst.msk [vmem:[#allocation5 + $0xb0] sm:$0xff] %vm2296_vm12, %v6031_v38 }
 0x34d   : > { %v2286_v57 = vmax.f32 %v2215_v52, 0.0 }
 0x34e   : > { %2376 = vst.msk [vmem:[#allocation4 + $0x129] sm:$0xff] %vm2296_vm12, %v2287_v50 }
 0x34f   : > { %2375 = vst.msk [vmem:[#allocation4 + $0x121] sm:$0xff] %vm2296_vm12, %v2286_v57 }
 0x355   : > { %v6037_v55 = vld [vmem:[#allocation4 + $0x129] sm:$0xff] }
 0x356   : > { %2563 = vrot.lane.b32.xlu1 %v6037_v55, %s4555_s20  ;;  %v6041_v48 = vld [vmem:[#allocation4 + $0x121] sm:$0xff] }
 0x357   : > { %v6043_v26 = vld [vmem:[#allocation4 + $0x128] sm:$0xff]  ;;  %2561 = vrot.lane.b32.xlu0 %v6041_v48, %s4555_s20  ;;  %v4458_v60 = vpop.f32.mrb[24].mxu0  ;;  %v6049_v61 = vld [vmem:[#allocation4 + $0x120] sm:$0xff] }
 0x358   : > { %2442 = vst.msk [vmem:[#allocation5 + $0xc8] sm:$0xff] %vm2296_vm12, %v6043_v26  ;;  %v2289_v27 = vmax.f32 %v4458_v60, 0.0  ;;  %v2225_v62 = vpop.f32.mrb[25].mxu0  ;;  %2441 = vst.msk [vmem:[#allocation5 + $0xc0] sm:$0xff] %vm2296_vm12, %v6049_v61 }
 0x359   : > { %v2288_v31 = vmax.f32 %v2225_v62, 0.0  ;;  %v2520_v32 = vpop.permute.xlu1 %2519 }
 0x35a   : > { %2378 = vst.msk [vmem:[#allocation4 + $0x141] sm:$0xff] %vm2296_vm12, %v2289_v27  ;;  %v2518_v39 = vpop.permute.xlu0 %2517 }
 0x35b   : > { %2613 = vst.msk [vmem:[#allocation5 + $0x18] sm:$0xff] %vm2609_vm14, %v2520_v32  ;;  %2612 = vst.msk [vmem:[#allocation5 + $0x10] sm:$0xff] %vm2609_vm14, %v2518_v39 }
 0x35c   : > { %2377 = vst.msk [vmem:[#allocation4 + $0x139] sm:$0xff] %vm2296_vm12, %v2288_v31 }
 0x361   : > { %v2476_v3 = vld [vmem:[#allocation4 + $0x141] sm:$0xff]  ;;  %v2524_v40 = vpop.permute.xlu1 %2523 }
 0x362   : > { %2567 = vrot.lane.b32.xlu1 %v2476_v3, %s4555_s20  ;;  %2615 = vst.msk [vmem:[#allocation5 + $0x28] sm:$0xff] %vm2609_vm14, %v2524_v40  ;;  %v2522_v2 = vpop.permute.xlu0 %2521  ;;  %v2643_v3 = vld [vmem:[#allocation4 + $0xa] sm:$0xff] }
 0x363   : > { %v2475_v42 = vld [vmem:[#allocation4 + $0x139] sm:$0xff]  ;;  %2614 = vst.msk [vmem:[#allocation5 + $0x20] sm:$0xff] %vm2609_vm14, %v2522_v2  ;;  %v4461_v44 = vpop.f32.mrb[26].mxu0  ;;  %v2642_v2 = vld [vmem:[#allocation4 + $0x2] sm:$0xff] }
 0x364   : > { %v6059_v43 = vld [vmem:[#allocation4 + $0x140] sm:$0xff]  ;;  %2565 = vrot.lane.b32.xlu0 %v2475_v42, %s4555_s20  ;;  %v6065_v46 = vld [vmem:[#allocation4 + $0x138] sm:$0xff]  ;;  %v2291_v63 = vmax.f32 %v4461_v44, 0.0  ;;  %v2235_v22 = vpop.f32.mrb[27].mxu0 }
 0x365   : > { %2444 = vst.msk [vmem:[#allocation5 + $0xd8] sm:$0xff] %vm2296_vm12, %v6059_v43  ;;  %2443 = vst.msk [vmem:[#allocation5 + $0xd0] sm:$0xff] %vm2296_vm12, %v6065_v46  ;;  %v2290_v35 = vmax.f32 %v2235_v22, 0.0  ;;  %v6101_v42 = vld [vmem:[#allocation4 + $0x22] sm:$0xff]  ;;  %v6106_v22 = vld [vmem:[#allocation4 + $0x1a] sm:$0xff] }
 0x366   : > { %2380 = vst.msk [vmem:[#allocation4 + $0x159] sm:$0xff] %vm2296_vm12, %v2291_v63 }
 0x367   : > { %2379 = vst.msk [vmem:[#allocation4 + $0x151] sm:$0xff] %vm2296_vm12, %v2290_v35  ;;  %v6111_v35 = vld [vmem:[#allocation4 + $0x3a] sm:$0xff] }
 0x369   : > { %v2528_v23 = vpop.permute.xlu1 %2527 }
 0x36a   : > { %2617 = vst.msk [vmem:[#allocation5 + $0x38] sm:$0xff] %vm2609_vm14, %v2528_v23  ;;  %v2526_v33 = vpop.permute.xlu0 %2525  ;;  %v6115_v23 = vld [vmem:[#allocation4 + $0x32] sm:$0xff] }
 0x36b   : > { %2616 = vst.msk [vmem:[#allocation5 + $0x30] sm:$0xff] %vm2609_vm14, %v2526_v33  ;;  %v6119_v33 = vld [vmem:[#allocation4 + $0x52] sm:$0xff] }
 0x36d   : > { %v2478_v7 = vld [vmem:[#allocation4 + $0x159] sm:$0xff] }
 0x36e   : > { %2571 = vrot.lane.b32.xlu1 %v2478_v7, %s4555_s20  ;;  %v2477_v45 = vld [vmem:[#allocation4 + $0x151] sm:$0xff] }
 0x36f   : > { %v6074_v17 = vld [vmem:[#allocation4 + $0x158] sm:$0xff]  ;;  %2569 = vrot.lane.b32.xlu0 %v2477_v45, %s4555_s20  ;;  %v4464_v24 = vpop.f32.mrb[28].mxu0  ;;  %v6079_v36 = vld [vmem:[#allocation4 + $0x150] sm:$0xff] }
 0x370   : > { %6894 = vst [vmem:[#allocation6_spill] sm:$0xff] %v6074_v17  ;;  %2446 = vst.msk [vmem:[#allocation5 + $0xe8] sm:$0xff] %vm2296_vm12, %v6074_v17  ;;  %v2293_v21 = vmax.f32 %v4464_v24, 0.0  ;;  %v2245_v50 = vpop.f32.mrb[29].mxu0  ;;  %v6123_v7 = vld [vmem:[#allocation4 + $0x4a] sm:$0xff]  ;;  %v6198_v17 = vld [vmem:[#allocation4 + $0x152] sm:$0xff] }
 0x371   : > { %6895 = vst [vmem:[#allocation7_spill] sm:$0xff] %v6079_v36  ;;  %2445 = vst.msk [vmem:[#allocation5 + $0xe0] sm:$0xff] %vm2296_vm12, %v6079_v36  ;;  %v2292_v52 = vmax.f32 %v2245_v50, 0.0  ;;  %v2532_v57 = vpop.permute.xlu1 %2531  ;;  %v6133_v50 = vld [vmem:[#allocation4 + $0x62] sm:$0xff] }
 0x372   : > { %2382 = vst.msk [vmem:[#allocation4 + $0x171] sm:$0xff] %vm2296_vm12, %v2293_v21  ;;  %v2530_v60 = vpop.permute.xlu0 %2529  ;;  %v6128_v21 = vld [vmem:[#allocation4 + $0x6a] sm:$0xff] }
 0x373   : > { %2619 = vst.msk [vmem:[#allocation5 + $0x48] sm:$0xff] %vm2609_vm14, %v2532_v57  ;;  %2618 = vst.msk [vmem:[#allocation5 + $0x40] sm:$0xff] %vm2609_vm14, %v2530_v60  ;;  %v6141_v57 = vld [vmem:[#allocation4 + $0x7a] sm:$0xff] }
 0x374   : > { %2381 = vst.msk [vmem:[#allocation4 + $0x169] sm:$0xff] %vm2296_vm12, %v2292_v52  ;;  %v6137_v52 = vld [vmem:[#allocation4 + $0x82] sm:$0xff]  ;;  %v2655_v60 = vld [vmem:[#allocation4 + $0x9a] sm:$0xff] }
 0x375   : > { %6898 = vst [vmem:[#allocation10_spill] sm:$0xff] %v6137_v52 }
 0x379   : > { %v2480_v27 = vld [vmem:[#allocation4 + $0x171] sm:$0xff]  ;;  %v2536_v62 = vpop.permute.xlu1 %2535 }
 0x37a   : > { %2575 = vrot.lane.b32.xlu1 %v2480_v27, %s4555_s20  ;;  %2621 = vst.msk [vmem:[#allocation5 + $0x58] sm:$0xff] %vm2609_vm14, %v2536_v62  ;;  %v2534_v31 = vpop.permute.xlu0 %2533  ;;  %v2654_v27 = vld [vmem:[#allocation4 + $0x92] sm:$0xff] }
 0x37b   : > { %v2479_v32 = vld [vmem:[#allocation4 + $0x169] sm:$0xff]  ;;  %2620 = vst.msk [vmem:[#allocation5 + $0x50] sm:$0xff] %vm2609_vm14, %v2534_v31 }
 0x37c   : > { %v6089_v39 = vld [vmem:[#allocation4 + $0x170] sm:$0xff]  ;;  %2573 = vrot.lane.b32.xlu0 %v2479_v32, %s4555_s20  ;;  %v6095_v40 = vld [vmem:[#allocation4 + $0x168] sm:$0xff] }
 0x37d   : > { %6896 = vst [vmem:[#allocation8_spill] sm:$0xff] %v6089_v39  ;;  %2448 = vst.msk [vmem:[#allocation5 + $0xf8] sm:$0xff] %vm2296_vm12, %v6089_v39  ;;  %v2657_v32 = vld [vmem:[#allocation4 + $0xb2] sm:$0xff]  ;;  %v6193_v39 = vld [vmem:[#allocation4 + $0x13a] sm:$0xff] }
 0x37e   : > { %6897 = vst [vmem:[#allocation9_spill] sm:$0xff] %v6095_v40  ;;  %2447 = vst.msk [vmem:[#allocation5 + $0xf0] sm:$0xff] %vm2296_vm12, %v6095_v40  ;;  %2708 = vrot.lane.b32.xlu1 %v2643_v3, %s4557_s22  ;;  %v2656_v3 = vld [vmem:[#allocation4 + $0xaa] sm:$0xff]  ;;  %v2671_v40 = vld [vmem:[#allocation4 + $0x15a] sm:$0xff] }
 0x380   : > { %2706 = vrot.lane.b32.xlu0 %v2642_v2, %s4557_s22  ;;  %v2659_v2 = vld [vmem:[#allocation4 + $0xca] sm:$0xff] }
 0x381   : > { %v2540_v44 = vpop.permute.xlu1 %2539 }
 0x382   : > { %2712 = vrot.lane.b32.xlu1 %v6101_v42, %s4557_s22  ;;  %2623 = vst.msk [vmem:[#allocation5 + $0x68] sm:$0xff] %vm2609_vm14, %v2540_v44  ;;  %v2538_v63 = vpop.permute.xlu0 %2537  ;;  %v2658_v44 = vld [vmem:[#allocation4 + $0xc2] sm:$0xff] }
 0x383   : > { %2622 = vst.msk [vmem:[#allocation5 + $0x60] sm:$0xff] %vm2609_vm14, %v2538_v63  ;;  %v6153_v63 = vld [vmem:[#allocation4 + $0xe2] sm:$0xff] }
 0x384   : > { %2710 = vrot.lane.b32.xlu0 %v6106_v22, %s4557_s22 }
 0x386   : > { %2716 = vrot.lane.b32.xlu1 %v6111_v35, %s4557_s22 }
 0x388   : > { %2714 = vrot.lane.b32.xlu0 %v6115_v23, %s4557_s22 }
 0x38a   : > { %2720 = vrot.lane.b32.xlu1 %v6119_v33, %s4557_s22 }
 0x38c   : > { %2718 = vrot.lane.b32.xlu0 %v6123_v7, %s4557_s22  ;;  %v2544_v45 = vpop.permute.xlu1 %2543 }
 0x38d   : > { %2625 = vst.msk [vmem:[#allocation5 + $0x78] sm:$0xff] %vm2609_vm14, %v2544_v45  ;;  %v2542_v24 = vpop.permute.xlu0 %2541  ;;  %v6157_v45 = vld [vmem:[#allocation4 + $0xda] sm:$0xff] }
 0x38e   : > { %2624 = vst.msk [vmem:[#allocation5 + $0x70] sm:$0xff] %vm2609_vm14, %v2542_v24  ;;  %2724 = vrot.lane.b32.xlu1 %v6128_v21, %s4557_s22 }
 0x390   : > { %2722 = vrot.lane.b32.xlu0 %v6133_v50, %s4557_s22 }
 0x392   : > { %2728 = vrot.lane.b32.xlu1 %v6137_v52, %s4557_s22 }
 0x394   : > { %2726 = vrot.lane.b32.xlu0 %v6141_v57, %s4557_s22 }
 0x396   : > { %2732 = vrot.lane.b32.xlu1 %v2655_v60, %s4557_s22 }
 0x398   : > { %2730 = vrot.lane.b32.xlu0 %v2654_v27, %s4557_s22  ;;  %v2548_v62 = vpop.permute.xlu1 %2547  ;;  %v6162_v27 = vld [vmem:[#allocation4 + $0xfa] sm:$0xff] }
 0x399   : > { %2627 = vst.msk [vmem:[#allocation5 + $0x88] sm:$0xff] %vm2609_vm14, %v2548_v62  ;;  %v2546_v31 = vpop.permute.xlu0 %2545  ;;  %v6167_v62 = vld [vmem:[#allocation4 + $0xf2] sm:$0xff] }
 0x39a   : > { %2626 = vst.msk [vmem:[#allocation5 + $0x80] sm:$0xff] %vm2609_vm14, %v2546_v31  ;;  %2736 = vrot.lane.b32.xlu1 %v2657_v32, %s4557_s22  ;;  %v6171_v31 = vld [vmem:[#allocation4 + $0x112] sm:$0xff]  ;;  %v6175_v32 = vld [vmem:[#allocation4 + $0x10a] sm:$0xff] }
 0x39c   : > { %2734 = vrot.lane.b32.xlu0 %v2656_v3, %s4557_s22  ;;  %v6179_v3 = vld [vmem:[#allocation4 + $0x12a] sm:$0xff] }
 0x39e   : > { %2740 = vrot.lane.b32.xlu1 %v2659_v2, %s4557_s22  ;;  %v6183_v2 = vld [vmem:[#allocation4 + $0x122] sm:$0xff] }
 0x3a0   : > { %2738 = vrot.lane.b32.xlu0 %v2658_v44, %s4557_s22 }
 0x3a2   : > { %2744 = vrot.lane.b32.xlu1 %v6153_v63, %s4557_s22 }
 0x3a4   : > { %2742 = vrot.lane.b32.xlu0 %v6157_v45, %s4557_s22  ;;  %v2552_v24 = vpop.permute.xlu1 %2551 }
 0x3a5   : > { %2629 = vst.msk [vmem:[#allocation5 + $0x98] sm:$0xff] %vm2609_vm14, %v2552_v24  ;;  %v2550_v60 = vpop.permute.xlu0 %2549 }
 0x3a6   : > { %2628 = vst.msk [vmem:[#allocation5 + $0x90] sm:$0xff] %vm2609_vm14, %v2550_v60  ;;  %2748 = vrot.lane.b32.xlu1 %v6162_v27, %s4557_s22  ;;  %v6188_v60 = vld [vmem:[#allocation4 + $0x142] sm:$0xff] }
 0x3a8   : > { %2746 = vrot.lane.b32.xlu0 %v6167_v62, %s4557_s22 }
 0x3aa   : > { %2752 = vrot.lane.b32.xlu1 %v6171_v31, %s4557_s22 }
 0x3ac   : > { %2750 = vrot.lane.b32.xlu0 %v6175_v32, %s4557_s22 }
 0x3ae   : > { %2756 = vrot.lane.b32.xlu1 %v6179_v3, %s4557_s22 }
 0x3b0   : > { %2754 = vrot.lane.b32.xlu0 %v6183_v2, %s4557_s22  ;;  %v2556_v44 = vpop.permute.xlu1 %2555 }
 0x3b1   : > { %2631 = vst.msk [vmem:[#allocation5 + $0xa8] sm:$0xff] %vm2609_vm14, %v2556_v44  ;;  %v2554_v24 = vpop.permute.xlu0 %2553  ;;  %v2673_v44 = vld [vmem:[#allocation4 + $0x172] sm:$0xff] }
 0x3b2   : > { %2630 = vst.msk [vmem:[#allocation5 + $0xa0] sm:$0xff] %vm2609_vm14, %v2554_v24  ;;  %2760 = vrot.lane.b32.xlu1 %v6188_v60, %s4557_s22  ;;  %v2672_v24 = vld [vmem:[#allocation4 + $0x16a] sm:$0xff] }
 0x3b4   : > { %2758 = vrot.lane.b32.xlu0 %v6193_v39, %s4557_s22 }
 0x3b6   : > { %2764 = vrot.lane.b32.xlu1 %v2671_v40, %s4557_s22 }
 0x3b8   : > { %2762 = vrot.lane.b32.xlu0 %v6198_v17, %s4557_s22 }
 0x3ba   : > { %2768 = vrot.lane.b32.xlu1 %v2673_v44, %s4557_s22 }
 0x3bc   : > { %2766 = vrot.lane.b32.xlu0 %v2672_v24, %s4557_s22  ;;  %v2560_v36 = vpop.permute.xlu1 %2559 }
 0x3bd   : > { %2633 = vst.msk [vmem:[#allocation5 + $0xb8] sm:$0xff] %vm2609_vm14, %v2560_v36  ;;  %v2558_v52 = vpop.permute.xlu0 %2557 }
 0x3be   : > { %2632 = vst.msk [vmem:[#allocation5 + $0xb0] sm:$0xff] %vm2609_vm14, %v2558_v52  ;;  %2901 = vrot.lane.b32.xlu1 %v5879_v18, %s4559_s24 }
 0x3c0   : > { %2899 = vrot.lane.b32.xlu0 %v5877_v15, %s4559_s24 }
 0x3c2   : > { %2905 = vrot.lane.b32.xlu1 %v5895_v5, %s4559_s24 }
 0x3c4   : > { %2903 = vrot.lane.b32.xlu0 %v5897_v4, %s4559_s24 }
 0x3c6   : > { %2909 = vrot.lane.b32.xlu1 %v5913_v10, %s4559_s24  ;;  %v4467_v44 = vpop.f32.mrb[30].mxu0 }
 0x3c7   : > { %v2295_v24 = vmax.f32 %v4467_v44, 0.0 }
 0x3c8   : > { %2907 = vrot.lane.b32.xlu0 %v5915_v16, %s4559_s24  ;;  %v2564_v36 = vpop.permute.xlu1 %2563 }
 0x3c9   : > { %2635 = vst.msk [vmem:[#allocation5 + $0xc8] sm:$0xff] %vm2609_vm14, %v2564_v36  ;;  %v2562_v40 = vpop.permute.xlu0 %2561  ;;  %v2255_v36 = vpop.f32.mrb[31].mxu0 }
 0x3ca   : > { %2634 = vst.msk [vmem:[#allocation5 + $0xc0] sm:$0xff] %vm2609_vm14, %v2562_v40  ;;  %2913 = vrot.lane.b32.xlu1 %v5926_v34, %s4559_s24  ;;  %v2294_v40 = vmax.f32 %v2255_v36, 0.0 }
 0x3cb   : > { %2384 = vst.msk [vmem:[#allocation4 + $0x189] sm:$0xff] %vm2296_vm12, %v2295_v24 }
 0x3cc   : > { %2911 = vrot.lane.b32.xlu0 %v5928_v37, %s4559_s24  ;;  %2383 = vst.msk [vmem:[#allocation4 + $0x181] sm:$0xff] %vm2296_vm12, %v2294_v40 }
 0x3ce   : > { %2917 = vrot.lane.b32.xlu1 %v5938_v25, %s4559_s24 }
 0x3d0   : > { %2915 = vrot.lane.b32.xlu0 %v5940_v54, %s4559_s24 }
 0x3d2   : > { %2921 = vrot.lane.b32.xlu1 %v5949_v59, %s4559_s24 }
 0x3d4   : > { %2919 = vrot.lane.b32.xlu0 %v5951_v58, %s4559_s24  ;;  %v2568_v15 = vpop.permute.xlu1 %2567 }
 0x3d5   : > { %2637 = vst.msk [vmem:[#allocation5 + $0xd8] sm:$0xff] %vm2609_vm14, %v2568_v15 }
 0x3d6   : > { %v2566_v18 = vpop.permute.xlu0 %2565  ;;  %2925 = vrot.lane.b32.xlu1 %v5961_v30, %s4559_s24 }
 0x3d7   : > { %2636 = vst.msk [vmem:[#allocation5 + $0xd0] sm:$0xff] %vm2609_vm14, %v2566_v18 }
 0x3d8   : > { %2923 = vrot.lane.b32.xlu0 %v5963_v1, %s4559_s24 }
 0x3da   : > { %2931 = vrot.lane.b32.xlu1 %v5993_v19, %s4559_s24 }
 0x3dc   : > { %2927 = vrot.lane.b32.xlu0 %v5973_v41, %s4559_s24 }
 0x3de   : > { %3124 = vrot.lane.b32.xlu1 %v5985_v53, %s4561_s9 }
 0x3e0   : > { %2933 = vrot.lane.b32.xlu0 %v5987_v56, %s4559_s24  ;;  %v2572_v59 = vpop.permute.xlu1 %2571 }
 0x3e1   : > { %2639 = vst.msk [vmem:[#allocation5 + $0xe8] sm:$0xff] %vm2609_vm14, %v2572_v59  ;;  %v2570_v58 = vpop.permute.xlu0 %2569 }
 0x3e2   : > { %2638 = vst.msk [vmem:[#allocation5 + $0xe0] sm:$0xff] %vm2609_vm14, %v2570_v58  ;;  %3092 = vrot.lane.b32.xlu1 %v5875_v14, %s4561_s9 }
 0x3e4   : > { %3126 = vrot.lane.b32.xlu0 %v5981_v51, %s4561_s9 }
 0x3e6   : > { %3317 = vrot.lane.b32.xlu1 %v6157_v45, %s4562_s10 }
 0x3e8   : > { %3094 = vrot.lane.b32.xlu0 %v5870_v11, %s4561_s9 }
 0x3ea   : > { %3285 = vrot.lane.b32.xlu1 %v6106_v22, %s4562_s10 }
 0x3ec   : > { %3319 = vrot.lane.b32.xlu0 %v6153_v63, %s4562_s10  ;;  %v2576_v30 = vpop.permute.xlu1 %2575 }
 0x3ed   : > { %2641 = vst.msk [vmem:[#allocation5 + $0xf8] sm:$0xff] %vm2609_vm14, %v2576_v30 }
 0x3ee   : > { %v2574_v14 = vpop.permute.xlu0 %2573  ;;  %3511 = vrot.lane.b32.xlu1 %v6013_v20, %s4563_s11 }
 0x3ef   : > { %2640 = vst.msk [vmem:[#allocation5 + $0xf0] sm:$0xff] %vm2609_vm14, %v2574_v14 }
 0x3f0   : > { %3287 = vrot.lane.b32.xlu0 %v6101_v42, %s4562_s10  ;;  %v2709_v11 = vpop.permute.xlu1 %2708 }
 0x3f1   : > { %2804 = vst.msk [vmem:[#allocation5 + $0x8] sm:$0xff] %vm2802_vm15, %v2709_v11 }
 0x3f2   : > { %v2707_v1 = vpop.permute.xlu0 %2706  ;;  %3479 = vrot.lane.b32.xlu1 %v5897_v4, %s4563_s11 }
 0x3f3   : > { %2803 = vst.msk [vmem:[#allocation5] sm:$0xff] %vm2802_vm15, %v2707_v1 }
 0x3f4   : > { %3513 = vrot.lane.b32.xlu0 %v6007_v13, %s4563_s11  ;;  %v2713_v41 = vpop.permute.xlu1 %2712 }
 0x3f5   : > { %2806 = vst.msk [vmem:[#allocation5 + $0x18] sm:$0xff] %vm2802_vm15, %v2713_v41 }
 0x3f6   : > { %v2711_v51 = vpop.permute.xlu0 %2710  ;;  %3704 = vrot.lane.b32.xlu1 %v6005_v9, %s4564_s14 }
 0x3f7   : > { %2805 = vst.msk [vmem:[#allocation5 + $0x10] sm:$0xff] %vm2802_vm15, %v2711_v51 }
 0x3f8   : > { %3481 = vrot.lane.b32.xlu0 %v5895_v5, %s4563_s11  ;;  %v2717_v53 = vpop.permute.xlu1 %2716 }
 0x3f9   : > { %2808 = vst.msk [vmem:[#allocation5 + $0x28] sm:$0xff] %vm2802_vm15, %v2717_v53 }
 0x3fa   : > { %v2715_v4 = vpop.permute.xlu0 %2714  ;;  %3672 = vrot.lane.b32.xlu1 %v5893_v29, %s4564_s14 }
 0x3fb   : > { %2807 = vst.msk [vmem:[#allocation5 + $0x20] sm:$0xff] %vm2802_vm15, %v2715_v4 }
 0x3fc   : > { %3706 = vrot.lane.b32.xlu0 %v6001_v6, %s4564_s14  ;;  %v2721_v56 = vpop.permute.xlu1 %2720 }
 0x3fd   : > { %2810 = vst.msk [vmem:[#allocation5 + $0x38] sm:$0xff] %vm2802_vm15, %v2721_v56 }
 0x3fe   : > { %v2719_v19 = vpop.permute.xlu0 %2718  ;;  %3897 = vrot.lane.b32.xlu1 %v6167_v62, %s4565_s15 }
 0x3ff   : > { %2809 = vst.msk [vmem:[#allocation5 + $0x30] sm:$0xff] %vm2802_vm15, %v2719_v19 }
 0x400   : > { %3674 = vrot.lane.b32.xlu0 %v5888_v49, %s4564_s14  ;;  %v2725_v5 = vpop.permute.xlu1 %2724 }
 0x401   : > { %2812 = vst.msk [vmem:[#allocation5 + $0x48] sm:$0xff] %vm2802_vm15, %v2725_v5 }
 0x402   : > { %v2723_v42 = vpop.permute.xlu0 %2722  ;;  %3865 = vrot.lane.b32.xlu1 %v6115_v23, %s4565_s15 }
 0x403   : > { %2811 = vst.msk [vmem:[#allocation5 + $0x40] sm:$0xff] %vm2802_vm15, %v2723_v42  ;;  %v3612_v42 = vld [vmem:[#allocation4 + $0x61] sm:$0xff] }
 0x404   : > { %3899 = vrot.lane.b32.xlu0 %v6162_v27, %s4565_s15  ;;  %v2729_v22 = vpop.permute.xlu1 %2728 }
 0x405   : > { %2814 = vst.msk [vmem:[#allocation5 + $0x58] sm:$0xff] %vm2802_vm15, %v2729_v22 }
 0x406   : > { %v2727_v52 = vpop.permute.xlu0 %2726  ;;  %2935 = vrot.lane.b32.xlu1 %v6013_v20, %s4559_s24 }
 0x407   : > { %2813 = vst.msk [vmem:[#allocation5 + $0x50] sm:$0xff] %vm2802_vm15, %v2727_v52 }
 0x408   : > { %3867 = vrot.lane.b32.xlu0 %v6111_v35, %s4565_s15  ;;  %v2733_v63 = vpop.permute.xlu1 %2732 }
 0x409   : > { %2816 = vst.msk [vmem:[#allocation5 + $0x68] sm:$0xff] %vm2802_vm15, %v2733_v63 }
 0x40a   : > { %v2731_v45 = vpop.permute.xlu0 %2730  ;;  %3128 = vrot.lane.b32.xlu1 %v6005_v9, %s4561_s9 }
 0x40b   : > { %2815 = vst.msk [vmem:[#allocation5 + $0x60] sm:$0xff] %vm2802_vm15, %v2731_v45 }
 0x40c   : > { %2937 = vrot.lane.b32.xlu0 %v6007_v13, %s4559_s24  ;;  %v2737_v20 = vpop.permute.xlu1 %2736 }
 0x40d   : > { %2818 = vst.msk [vmem:[#allocation5 + $0x78] sm:$0xff] %vm2802_vm15, %v2737_v20  ;;  %v3051_v20 = vld [vmem:[#allocation4 + $0x129] sm:$0xff] }
 0x40e   : > { %v2735_v15 = vpop.permute.xlu0 %2734  ;;  %3096 = vrot.lane.b32.xlu1 %v5893_v29, %s4561_s9 }
 0x40f   : > { %2817 = vst.msk [vmem:[#allocation5 + $0x70] sm:$0xff] %vm2802_vm15, %v2735_v15 }
 0x410   : > { %3130 = vrot.lane.b32.xlu0 %v6001_v6, %s4561_s9  ;;  %v2741_v9 = vpop.permute.xlu1 %2740 }
 0x411   : > { %2820 = vst.msk [vmem:[#allocation5 + $0x88] sm:$0xff] %vm2802_vm15, %v2741_v9 }
 0x412   : > { %v2739_v13 = vpop.permute.xlu0 %2738  ;;  %3321 = vrot.lane.b32.xlu1 %v6167_v62, %s4562_s10 }
 0x413   : > { %2819 = vst.msk [vmem:[#allocation5 + $0x80] sm:$0xff] %vm2802_vm15, %v2739_v13 }
 0x414   : > { %3098 = vrot.lane.b32.xlu0 %v5888_v49, %s4561_s9  ;;  %v2745_v18 = vpop.permute.xlu1 %2744 }
 0x415   : > { %2822 = vst.msk [vmem:[#allocation5 + $0x98] sm:$0xff] %vm2802_vm15, %v2745_v18 }
 0x416   : > { %v2743_v59 = vpop.permute.xlu0 %2742  ;;  %3289 = vrot.lane.b32.xlu1 %v6115_v23, %s4562_s10 }
 0x417   : > { %2821 = vst.msk [vmem:[#allocation5 + $0x90] sm:$0xff] %vm2802_vm15, %v2743_v59 }
 0x418   : > { %3323 = vrot.lane.b32.xlu0 %v6162_v27, %s4562_s10  ;;  %v2749_v29 = vpop.permute.xlu1 %2748 }
 0x419   : > { %2824 = vst.msk [vmem:[#allocation5 + $0xa8] sm:$0xff] %vm2802_vm15, %v2749_v29  ;;  %v3630_v29 = vld [vmem:[#allocation4 + $0x139] sm:$0xff] }
 0x41a   : > { %v2747_v6 = vpop.permute.xlu0 %2746  ;;  %3515 = vrot.lane.b32.xlu1 %v6031_v38, %s4563_s11 }
 0x41b   : > { %2823 = vst.msk [vmem:[#allocation5 + $0xa0] sm:$0xff] %vm2802_vm15, %v2747_v6  ;;  %v3614_v6 = vld [vmem:[#allocation4 + $0x79] sm:$0xff] }
 0x41c   : > { %3291 = vrot.lane.b32.xlu0 %v6111_v35, %s4562_s10  ;;  %v2753_v49 = vpop.permute.xlu1 %2752 }
 0x41d   : > { %2826 = vst.msk [vmem:[#allocation5 + $0xb8] sm:$0xff] %vm2802_vm15, %v2753_v49 }
 0x41e   : > { %v2751_v62 = vpop.permute.xlu0 %2750  ;;  %3483 = vrot.lane.b32.xlu1 %v5915_v16, %s4563_s11 }
 0x41f   : > { %2825 = vst.msk [vmem:[#allocation5 + $0xb0] sm:$0xff] %vm2802_vm15, %v2751_v62 }
 0x420   : > { %3517 = vrot.lane.b32.xlu0 %v6025_v28, %s4563_s11  ;;  %v2757_v23 = vpop.permute.xlu1 %2756 }
 0x421   : > { %2828 = vst.msk [vmem:[#allocation5 + $0xc8] sm:$0xff] %vm2802_vm15, %v2757_v23 }
 0x422   : > { %v2755_v27 = vpop.permute.xlu0 %2754  ;;  %3708 = vrot.lane.b32.xlu1 %v6023_v0, %s4564_s14 }
 0x423   : > { %2827 = vst.msk [vmem:[#allocation5 + $0xc0] sm:$0xff] %vm2802_vm15, %v2755_v27  ;;  %v3631_v27 = vld [vmem:[#allocation4 + $0x141] sm:$0xff] }
 0x424   : > { %3485 = vrot.lane.b32.xlu0 %v5913_v10, %s4563_s11  ;;  %v2761_v35 = vpop.permute.xlu1 %2760 }
 0x425   : > { %2830 = vst.msk [vmem:[#allocation5 + $0xd8] sm:$0xff] %vm2802_vm15, %v2761_v35 }
 0x426   : > { %v2759_v58 = vpop.permute.xlu0 %2758  ;;  %3676 = vrot.lane.b32.xlu1 %v5911_v12, %s4564_s14 }
 0x427   : > { %2829 = vst.msk [vmem:[#allocation5 + $0xd0] sm:$0xff] %vm2802_vm15, %v2759_v58 }
 0x428   : > { %3710 = vrot.lane.b32.xlu0 %v6019_v47, %s4564_s14  ;;  %v2765_v16 = vpop.permute.xlu1 %2764 }
 0x429   : > { %2832 = vst.msk [vmem:[#allocation5 + $0xe8] sm:$0xff] %vm2802_vm15, %v2765_v16 }
 0x42a   : > { %v2763_v30 = vpop.permute.xlu0 %2762  ;;  %3901 = vrot.lane.b32.xlu1 %v6175_v32, %s4565_s15 }
 0x42b   : > { %2831 = vst.msk [vmem:[#allocation5 + $0xe0] sm:$0xff] %vm2802_vm15, %v2763_v30 }
 0x42c   : > { %3678 = vrot.lane.b32.xlu0 %v5906_v8, %s4564_s14  ;;  %v2769_v10 = vpop.permute.xlu1 %2768 }
 0x42d   : > { %2834 = vst.msk [vmem:[#allocation5 + $0xf8] sm:$0xff] %vm2802_vm15, %v2769_v10  ;;  %v3615_v10 = vld [vmem:[#allocation4 + $0x81] sm:$0xff] }
 0x42e   : > { %v2767_v14 = vpop.permute.xlu0 %2766  ;;  %3869 = vrot.lane.b32.xlu1 %v6123_v7, %s4565_s15 }
 0x42f   : > { %2833 = vst.msk [vmem:[#allocation5 + $0xf0] sm:$0xff] %vm2802_vm15, %v2767_v14 }
 0x430   : > { %3903 = vrot.lane.b32.xlu0 %v6171_v31, %s4565_s15  ;;  %v2902_v12 = vpop.permute.xlu1 %2901 }
 0x431   : > { %2997 = vst.msk [vmem:[#allocation5 + $0x8] sm:$0xff] %vm2995_vm0, %v2902_v12 }
 0x432   : > { %v2900_v11 = vpop.permute.xlu0 %2899  ;;  %2939 = vrot.lane.b32.xlu1 %v6031_v38, %s4559_s24  ;;  %v3032_v38 = vld [vmem:[#allocation4 + $0x49] sm:$0xff] }
 0x433   : > { %2996 = vst.msk [vmem:[#allocation5] sm:$0xff] %vm2995_vm0, %v2900_v11 }
 0x434   : > { %3871 = vrot.lane.b32.xlu0 %v6119_v33, %s4565_s15  ;;  %v2906_v8 = vpop.permute.xlu1 %2905 }
 0x435   : > { %2999 = vst.msk [vmem:[#allocation5 + $0x18] sm:$0xff] %vm2995_vm0, %v2906_v8 }
 0x436   : > { %v2904_v1 = vpop.permute.xlu0 %2903  ;;  %3132 = vrot.lane.b32.xlu1 %v6023_v0, %s4561_s9  ;;  %v3033_v0 = vld [vmem:[#allocation4 + $0x51] sm:$0xff] }
 0x437   : > { %2998 = vst.msk [vmem:[#allocation5 + $0x10] sm:$0xff] %vm2995_vm0, %v2904_v1 }
 0x438   : > { %2941 = vrot.lane.b32.xlu0 %v6025_v28, %s4559_s24  ;;  %v2910_v41 = vpop.permute.xlu1 %2909 }
 0x439   : > { %3001 = vst.msk [vmem:[#allocation5 + $0x28] sm:$0xff] %vm2995_vm0, %v2910_v41  ;;  %v6901_v41 = vld [vmem:[#allocation10_spill] sm:$0xff] }
 0x43a   : > { %v2908_v51 = vpop.permute.xlu0 %2907  ;;  %3100 = vrot.lane.b32.xlu1 %v3032_v38, %s4561_s9 }
 0x43b   : > { %3000 = vst.msk [vmem:[#allocation5 + $0x20] sm:$0xff] %vm2995_vm0, %v2908_v51 }
 0x43c   : > { %3134 = vrot.lane.b32.xlu0 %v6019_v47, %s4561_s9  ;;  %v2914_v53 = vpop.permute.xlu1 %2913 }
 0x43d   : > { %3003 = vst.msk [vmem:[#allocation5 + $0x38] sm:$0xff] %vm2995_vm0, %v2914_v53 }
 0x43e   : > { %v2912_v4 = vpop.permute.xlu0 %2911  ;;  %3325 = vrot.lane.b32.xlu1 %v6175_v32, %s4562_s10 }
 0x43f   : > { %3002 = vst.msk [vmem:[#allocation5 + $0x30] sm:$0xff] %vm2995_vm0, %v2912_v4 }
 0x440   : > { %3102 = vrot.lane.b32.xlu0 %v3033_v0, %s4561_s9  ;;  %v2918_v28 = vpop.permute.xlu1 %2917 }
 0x441   : > { %3005 = vst.msk [vmem:[#allocation5 + $0x48] sm:$0xff] %vm2995_vm0, %v2918_v28  ;;  %v3229_v28 = vld [vmem:[#allocation4 + $0x7a] sm:$0xff] }
 0x442   : > { %v2916_v56 = vpop.permute.xlu0 %2915  ;;  %3293 = vrot.lane.b32.xlu1 %v6123_v7, %s4562_s10 }
 0x443   : > { %3004 = vst.msk [vmem:[#allocation5 + $0x40] sm:$0xff] %vm2995_vm0, %v2916_v56 }
 0x444   : > { %3327 = vrot.lane.b32.xlu0 %v6171_v31, %s4562_s10  ;;  %v2922_v47 = vpop.permute.xlu1 %2921 }
 0x445   : > { %3007 = vst.msk [vmem:[#allocation5 + $0x58] sm:$0xff] %vm2995_vm0, %v2922_v47 }
 0x446   : > { %v2920_v19 = vpop.permute.xlu0 %2919  ;;  %3519 = vrot.lane.b32.xlu1 %v6049_v61, %s4563_s11 }
 0x447   : > { %3006 = vst.msk [vmem:[#allocation5 + $0x50] sm:$0xff] %vm2995_vm0, %v2920_v19  ;;  %v3230_v19 = vld [vmem:[#allocation4 + $0x82] sm:$0xff] }
 0x448   : > { %3295 = vrot.lane.b32.xlu0 %v6119_v33, %s4562_s10  ;;  %v2926_v32 = vpop.permute.xlu1 %2925 }
 0x449   : > { %3009 = vst.msk [vmem:[#allocation5 + $0x68] sm:$0xff] %vm2995_vm0, %v2926_v32 }
 0x44a   : > { %v2924_v5 = vpop.permute.xlu0 %2923  ;;  %3487 = vrot.lane.b32.xlu1 %v5928_v37, %s4563_s11 }
 0x44b   : > { %3008 = vst.msk [vmem:[#allocation5 + $0x60] sm:$0xff] %vm2995_vm0, %v2924_v5 }
 0x44c   : > { %3521 = vrot.lane.b32.xlu0 %v6043_v26, %s4563_s11  ;;  %v2932_v7 = vpop.permute.xlu1 %2931 }
 0x44d   : > { %3012 = vst.msk [vmem:[#allocation5 + $0x80] sm:$0xff] %vm2995_vm0, %v2932_v7  ;;  %v3423_v7 = vld [vmem:[#allocation4 + $0x90] sm:$0xff] }
 0x44e   : > { %v2928_v31 = vpop.permute.xlu0 %2927  ;;  %3712 = vrot.lane.b32.xlu1 %v6041_v48, %s4564_s14 }
 0x44f   : > { %3010 = vst.msk [vmem:[#allocation5 + $0x70] sm:$0xff] %vm2995_vm0, %v2928_v31 }
 0x450   : > { %3489 = vrot.lane.b32.xlu0 %v5926_v34, %s4563_s11  ;;  %v3125_v33 = vpop.permute.xlu1 %3124  ;;  %v3613_v34 = vld [vmem:[#allocation4 + $0x69] sm:$0xff] }
 0x451   : > { %3205 = vst.msk [vmem:[#allocation5 + $0x80] sm:$0xff] %vm3188_vm1, %v3125_v33 }
 0x452   : > { %v2934_v37 = vpop.permute.xlu0 %2933  ;;  %3680 = vrot.lane.b32.xlu1 %v3612_v42, %s4564_s14 }
 0x453   : > { %3013 = vst.msk [vmem:[#allocation5 + $0x88] sm:$0xff] %vm2995_vm0, %v2934_v37  ;;  %v3632_v37 = vld [vmem:[#allocation4 + $0x151] sm:$0xff] }
 0x454   : > { %3714 = vrot.lane.b32.xlu0 %v6037_v55, %s4564_s14  ;;  %v3093_v22 = vpop.permute.xlu1 %3092 }
 0x455   : > { %3189 = vst.msk [vmem:[#allocation5] sm:$0xff] %vm3188_vm1, %v3093_v22 }
 0x456   : > { %v3127_v52 = vpop.permute.xlu0 %3126  ;;  %3905 = vrot.lane.b32.xlu1 %v6183_v2, %s4565_s15 }
 0x457   : > { %3206 = vst.msk [vmem:[#allocation5 + $0x88] sm:$0xff] %vm3188_vm1, %v3127_v52 }
 0x458   : > { %3682 = vrot.lane.b32.xlu0 %v3613_v34, %s4564_s14  ;;  %v3318_v63 = vpop.permute.xlu1 %3317 }
 0x459   : > { %3398 = vst.msk [vmem:[#allocation5 + $0x80] sm:$0xff] %vm3381_vm2, %v3318_v63 }
 0x45a   : > { %v3095_v45 = vpop.permute.xlu0 %3094  ;;  %3873 = vrot.lane.b32.xlu1 %v6133_v50, %s4565_s15 }
 0x45b   : > { %3190 = vst.msk [vmem:[#allocation5 + $0x8] sm:$0xff] %vm3188_vm1, %v3095_v45 }
 0x45c   : > { %3907 = vrot.lane.b32.xlu0 %v6179_v3, %s4565_s15  ;;  %v3286_v55 = vpop.permute.xlu1 %3285 }
 0x45d   : > { %3382 = vst.msk [vmem:[#allocation5] sm:$0xff] %vm3381_vm2, %v3286_v55  ;;  %v3633_v55 = vld [vmem:[#allocation4 + $0x159] sm:$0xff] }
 0x45e   : > { %v3320_v44 = vpop.permute.xlu0 %3319  ;;  %2943 = vrot.lane.b32.xlu1 %v6049_v61, %s4559_s24 }
 0x45f   : > { %3399 = vst.msk [vmem:[#allocation5 + $0x88] sm:$0xff] %vm3381_vm2, %v3320_v44 }
 0x460   : > { %3875 = vrot.lane.b32.xlu0 %v6128_v21, %s4565_s15  ;;  %v3512_v24 = vpop.permute.xlu1 %3511 }
 0x461   : > { %3592 = vst.msk [vmem:[#allocation5 + $0x80] sm:$0xff] %vm3575_vm3, %v3512_v24 }
 0x462   : > { %v3288_v36 = vpop.permute.xlu0 %3287  ;;  %3136 = vrot.lane.b32.xlu1 %v6041_v48, %s4561_s9 }
 0x463   : > { %3383 = vst.msk [vmem:[#allocation5 + $0x8] sm:$0xff] %vm3381_vm2, %v3288_v36 }
 0x464   : > { %2945 = vrot.lane.b32.xlu0 %v6043_v26, %s4559_s24  ;;  %v3480_v40 = vpop.permute.xlu1 %3479 }
 0x465   : > { %3576 = vst.msk [vmem:[#allocation5] sm:$0xff] %vm3575_vm3, %v3480_v40 }
 0x466   : > { %v3514_v61 = vpop.permute.xlu0 %3513  ;;  %3104 = vrot.lane.b32.xlu1 %v3612_v42, %s4561_s9  ;;  %v3424_v42 = vld [vmem:[#allocation4 + $0x98] sm:$0xff] }
 0x467   : > { %3593 = vst.msk [vmem:[#allocation5 + $0x88] sm:$0xff] %vm3575_vm3, %v3514_v61 }
 0x468   : > { %3138 = vrot.lane.b32.xlu0 %v3051_v20, %s4561_s9  ;;  %v3705_v15 = vpop.permute.xlu1 %3704  ;;  %v3617_v20 = vld [vmem:[#allocation4 + $0x99] sm:$0xff] }
 0x469   : > { %3785 = vst.msk [vmem:[#allocation5 + $0x80] sm:$0xff] %vm3768_vm4, %v3705_v15 }
 0x46a   : > { %v3482_v9 = vpop.permute.xlu0 %3481  ;;  %3329 = vrot.lane.b32.xlu1 %v6183_v2, %s4562_s10 }
 0x46b   : > { %3577 = vst.msk [vmem:[#allocation5 + $0x8] sm:$0xff] %vm3575_vm3, %v3482_v9 }
 0x46c   : > { %3106 = vrot.lane.b32.xlu0 %v3613_v34, %s4561_s9  ;;  %v3673_v48 = vpop.permute.xlu1 %3672  ;;  %v3616_v34 = vld [vmem:[#allocation4 + $0x91] sm:$0xff] }
 0x46d   : > { %3769 = vst.msk [vmem:[#allocation5] sm:$0xff] %vm3768_vm4, %v3673_v48 }
 0x46e   : > { %v3707_v26 = vpop.permute.xlu0 %3706  ;;  %3297 = vrot.lane.b32.xlu1 %v6133_v50, %s4562_s10 }
 0x46f   : > { %3786 = vst.msk [vmem:[#allocation5 + $0x88] sm:$0xff] %vm3768_vm4, %v3707_v26  ;;  %v3809_v26 = vld [vmem:[#allocation4 + $0x92] sm:$0xff] }
 0x470   : > { %3331 = vrot.lane.b32.xlu0 %v6179_v3, %s4562_s10  ;;  %v3898_v13 = vpop.permute.xlu1 %3897 }
 0x471   : > { %3978 = vst.msk [vmem:[#allocation5 + $0x80] sm:$0xff] %vm3961_vm5, %v3898_v13  ;;  %v3826_v13 = vld [vmem:[#allocation4 + $0x15a] sm:$0xff] }
 0x472   : > { %v3675_v18 = vpop.permute.xlu0 %3674  ;;  %3523 = vrot.lane.b32.xlu1 %v6065_v46, %s4563_s11 }
 0x473   : > { %3770 = vst.msk [vmem:[#allocation5 + $0x8] sm:$0xff] %vm3768_vm4, %v3675_v18 }
 0x474   : > { %3299 = vrot.lane.b32.xlu0 %v6128_v21, %s4562_s10  ;;  %v3866_v2 = vpop.permute.xlu1 %3865 }
 0x475   : > { %3962 = vst.msk [vmem:[#allocation5] sm:$0xff] %vm3961_vm5, %v3866_v2  ;;  %v3810_v2 = vld [vmem:[#allocation4 + $0x9a] sm:$0xff] }
 0x476   : > { %v3900_v50 = vpop.permute.xlu0 %3899  ;;  %3491 = vrot.lane.b32.xlu1 %v5940_v54, %s4563_s11 }
 0x477   : > { %3979 = vst.msk [vmem:[#allocation5 + $0x88] sm:$0xff] %vm3961_vm5, %v3900_v50 }
 0x478   : > { %3525 = vrot.lane.b32.xlu0 %v6059_v43, %s4563_s11  ;;  %v2936_v3 = vpop.permute.xlu1 %2935  ;;  %v4011_v49 = vld [vmem:[#allocation5 + $0x80] sm:$0xff] }
 0x479   : > { %3014 = vst.msk [vmem:[#allocation5 + $0x90] sm:$0xff] %vm2995_vm0, %v2936_v3 }
 0x47a   : > { %v3868_v59 = vpop.permute.xlu0 %3867  ;;  %3716 = vrot.lane.b32.xlu1 %v3630_v29, %s4564_s14 }
 0x47b   : > { %3963 = vst.msk [vmem:[#allocation5 + $0x8] sm:$0xff] %vm3961_vm5, %v3868_v59 }
 0x47c   : > { %3493 = vrot.lane.b32.xlu0 %v5938_v25, %s4563_s11  ;;  %v3129_v21 = vpop.permute.xlu1 %3128  ;;  %v3995_v16 = vld [vmem:[#allocation5] sm:$0xff] }
 0x47d   : > { %3207 = vst.msk [vmem:[#allocation5 + $0x90] sm:$0xff] %vm3188_vm1, %v3129_v21 }
 0x47e   : > { %v2938_v54 = vpop.permute.xlu0 %2937  ;;  %v4012_v62 = vld [vmem:[#allocation5 + $0x88] sm:$0xff]  ;;  %3684 = vrot.lane.b32.xlu1 %v3614_v6, %s4564_s14 }
 0x47f   : > { %3015 = vst.msk [vmem:[#allocation5 + $0x98] sm:$0xff] %vm2995_vm0, %v2938_v54  ;;  %v4476_v35 = vpack.c.bf16 %v4012_v62, %v4011_v49  ;;  %v3247_v54 = vld [vmem:[#allocation4 + $0x152] sm:$0xff] }
 0x480   : > { %3718 = vrot.lane.b32.xlu0 %v3631_v27, %s4564_s14  ;;  %v3097_v25 = vpop.permute.xlu1 %3096 }
 0x481   : > { %4478 = vmatprep.subr.msk.bf16.mxu1 %vm6473_vm7, %v4476_v35  ;;  %3191 = vst.msk [vmem:[#allocation5 + $0x10] sm:$0xff] %vm3188_vm1, %v3097_v25  ;;  %v6904_v25 = vld [vmem:[#allocation9_spill] sm:$0xff] }
 0x482   : > { %v3131_v58 = vpop.permute.xlu0 %3130  ;;  %v3996_v30 = vld [vmem:[#allocation5 + $0x8] sm:$0xff]  ;;  %3909 = vrot.lane.b32.xlu1 %v6193_v39, %s4565_s15 }
 0x483   : > { %3208 = vst.msk [vmem:[#allocation5 + $0x98] sm:$0xff] %vm3188_vm1, %v3131_v58  ;;  %v4479_v14 = vpack.c.bf16 %v3996_v30, %v3995_v16  ;;  %v3425_v30 = vld [vmem:[#allocation4 + $0xa8] sm:$0xff] }
 0x484   : > { %3686 = vrot.lane.b32.xlu0 %v3615_v10, %s4564_s14  ;;  %v3322_v12 = vpop.permute.xlu1 %3321 }
 0x485   : > { %4481 = vmatpush3.bf16.xpose.msk.msra.mxu1 %vm6473_vm7, %v4479_v14  ;;  %3400 = vst.msk [vmem:[#allocation5 + $0x90] sm:$0xff] %vm3381_vm2, %v3322_v12 }
 0x486   : > { %v3099_v11 = vpop.permute.xlu0 %3098  ;;  %3877 = vrot.lane.b32.xlu1 %v6141_v57, %s4565_s15 }
 0x487   : > { %3192 = vst.msk [vmem:[#allocation5 + $0x18] sm:$0xff] %vm3188_vm1, %v3099_v11  ;;  %v3634_v11 = vld [vmem:[#allocation4 + $0x169] sm:$0xff] }
 0x488   : > { %3911 = vrot.lane.b32.xlu0 %v6188_v60, %s4565_s15  ;;  %v3290_v8 = vpop.permute.xlu1 %3289 }
 0x489   : > { %3384 = vst.msk [vmem:[#allocation5 + $0x10] sm:$0xff] %vm3381_vm2, %v3290_v8  ;;  %v3426_v8 = vld [vmem:[#allocation4 + $0xb0] sm:$0xff] }
 0x48a   : > { %v3324_v1 = vpop.permute.xlu0 %3323  ;;  %2947 = vrot.lane.b32.xlu1 %v6065_v46, %s4559_s24 }
 0x48b   : > { %3401 = vst.msk [vmem:[#allocation5 + $0x98] sm:$0xff] %vm3381_vm2, %v3324_v1 }
 0x48c   : > { %3879 = vrot.lane.b32.xlu0 %v6901_v41, %s4565_s15  ;;  %v3516_v51 = vpop.permute.xlu1 %3515 }
 0x48d   : > { %3594 = vst.msk [vmem:[#allocation5 + $0x90] sm:$0xff] %vm3575_vm3, %v3516_v51  ;;  %v3618_v51 = vld [vmem:[#allocation4 + $0xa9] sm:$0xff] }
 0x48e   : > { %v3292_v38 = vpop.permute.xlu0 %3291  ;;  %3140 = vrot.lane.b32.xlu1 %v3630_v29, %s4561_s9 }
 0x48f   : > { %3385 = vst.msk [vmem:[#allocation5 + $0x18] sm:$0xff] %vm3381_vm2, %v3292_v38 }
 0x490   : > { %2949 = vrot.lane.b32.xlu0 %v6059_v43, %s4559_s24  ;;  %v3484_v57 = vpop.permute.xlu1 %3483 }
 0x491   : > { %3578 = vst.msk [vmem:[#allocation5 + $0x10] sm:$0xff] %vm3575_vm3, %v3484_v57 }
 0x492   : > { %v3518_v53 = vpop.permute.xlu0 %3517  ;;  %3108 = vrot.lane.b32.xlu1 %v3614_v6, %s4561_s9 }
 0x493   : > { %3595 = vst.msk [vmem:[#allocation5 + $0x98] sm:$0xff] %vm3575_vm3, %v3518_v53  ;;  %v3635_v53 = vld [vmem:[#allocation4 + $0x171] sm:$0xff] }
 0x494   : > { %3142 = vrot.lane.b32.xlu0 %v3631_v27, %s4561_s9  ;;  %v3709_v46 = vpop.permute.xlu1 %3708 }
 0x495   : > { %3787 = vst.msk [vmem:[#allocation5 + $0x90] sm:$0xff] %vm3768_vm4, %v3709_v46 }
 0x496   : > { %v3486_v4 = vpop.permute.xlu0 %3485  ;;  %3333 = vrot.lane.b32.xlu1 %v6193_v39, %s4562_s10  ;;  %v6902_v39 = vld [vmem:[#allocation7_spill] sm:$0xff] }
 0x497   : > { %3579 = vst.msk [vmem:[#allocation5 + $0x18] sm:$0xff] %vm3575_vm3, %v3486_v4 }
 0x498   : > { %3110 = vrot.lane.b32.xlu0 %v3615_v10, %s4561_s9  ;;  %v3677_v43 = vpop.permute.xlu1 %3676  ;;  %v6905_v10 = vld [vmem:[#allocation8_spill] sm:$0xff] }
 0x499   : > { %3771 = vst.msk [vmem:[#allocation5 + $0x10] sm:$0xff] %vm3768_vm4, %v3677_v43 }
 0x49a   : > { %v3711_v0 = vpop.permute.xlu0 %3710  ;;  %3301 = vrot.lane.b32.xlu1 %v3229_v28, %s4562_s10 }
 0x49b   : > { %3788 = vst.msk [vmem:[#allocation5 + $0x98] sm:$0xff] %vm3768_vm4, %v3711_v0  ;;  %v3827_v0 = vld [vmem:[#allocation4 + $0x16a] sm:$0xff] }
 0x49c   : > { %3335 = vrot.lane.b32.xlu0 %v6188_v60, %s4562_s10  ;;  %v3902_v56 = vpop.permute.xlu1 %3901  ;;  %v6903_v60 = vld [vmem:[#allocation6_spill] sm:$0xff] }
 0x49d   : > { %3980 = vst.msk [vmem:[#allocation5 + $0x90] sm:$0xff] %vm3961_vm5, %v3902_v56 }
 0x49e   : > { %v3679_v47 = vpop.permute.xlu0 %3678  ;;  %3527 = vrot.lane.b32.xlu1 %v6902_v39, %s4563_s11 }
 0x49f   : > { %3772 = vst.msk [vmem:[#allocation5 + $0x18] sm:$0xff] %vm3768_vm4, %v3679_v47  ;;  %v3619_v47 = vld [vmem:[#allocation4 + $0xb1] sm:$0xff] }
 0x4a0   : > { %3303 = vrot.lane.b32.xlu0 %v3230_v19, %s4562_s10  ;;  %v3870_v32 = vpop.permute.xlu1 %3869 }
 0x4a1   : > { %3964 = vst.msk [vmem:[#allocation5 + $0x10] sm:$0xff] %vm3961_vm5, %v3870_v32 }
 0x4a2   : > { %v3904_v5 = vpop.permute.xlu0 %3903  ;;  %3495 = vrot.lane.b32.xlu1 %v3423_v7, %s4563_s11  ;;  %v3828_v7 = vld [vmem:[#allocation4 + $0x172] sm:$0xff] }
 0x4a3   : > { %3981 = vst.msk [vmem:[#allocation5 + $0x98] sm:$0xff] %vm3961_vm5, %v3904_v5  ;;  %v3811_v5 = vld [vmem:[#allocation4 + $0xaa] sm:$0xff] }
 0x4a4   : > { %3529 = vrot.lane.b32.xlu0 %v6903_v60, %s4563_s11  ;;  %v2940_v31 = vpop.permute.xlu1 %2939  ;;  %v4013_v63 = vld [vmem:[#allocation5 + $0x90] sm:$0xff] }
 0x4a5   : > { %3016 = vst.msk [vmem:[#allocation5 + $0xa0] sm:$0xff] %vm2995_vm0, %v2940_v31 }
 0x4a6   : > { %v3872_v33 = vpop.permute.xlu0 %3871  ;;  %3720 = vrot.lane.b32.xlu1 %v3632_v37, %s4564_s14 }
 0x4a7   : > { %3965 = vst.msk [vmem:[#allocation5 + $0x18] sm:$0xff] %vm3961_vm5, %v3872_v33  ;;  %v2863_v33 = vld [vmem:[#allocation4 + $0x168] sm:$0xff] }
 0x4a8   : > { %3497 = vrot.lane.b32.xlu0 %v3424_v42, %s4563_s11  ;;  %v3133_v22 = vpop.permute.xlu1 %3132  ;;  %v3997_v40 = vld [vmem:[#allocation5 + $0x10] sm:$0xff] }
 0x4a9   : > { %3209 = vst.msk [vmem:[#allocation5 + $0xa0] sm:$0xff] %vm3188_vm1, %v3133_v22 }
 0x4aa   : > { %v2942_v52 = vpop.permute.xlu0 %2941  ;;  %v4014_v45 = vld [vmem:[#allocation5 + $0x98] sm:$0xff]  ;;  %3688 = vrot.lane.b32.xlu1 %v3616_v34, %s4564_s14 }
 0x4ab   : > { %3017 = vst.msk [vmem:[#allocation5 + $0xa8] sm:$0xff] %vm2995_vm0, %v2942_v52  ;;  %v4482_v44 = vpack.c.bf16 %v4014_v45, %v4013_v63  ;;  %v2864_v52 = vld [vmem:[#allocation4 + $0x170] sm:$0xff] }
 0x4ac   : > { %3722 = vrot.lane.b32.xlu0 %v3633_v55, %s4564_s14  ;;  %v3101_v24 = vpop.permute.xlu1 %3100 }
 0x4ad   : > { %4484 = vmatprep.subr.msk.bf16.mxu1 %vm6473_vm7, %v4482_v44  ;;  %3193 = vst.msk [vmem:[#allocation5 + $0x20] sm:$0xff] %vm3188_vm1, %v3101_v24 }
 0x4ae   : > { %v3135_v36 = vpop.permute.xlu0 %3134  ;;  %v3998_v61 = vld [vmem:[#allocation5 + $0x18] sm:$0xff]  ;;  %3913 = vrot.lane.b32.xlu1 %v6198_v17, %s4565_s15 }
 0x4af   : > { %3210 = vst.msk [vmem:[#allocation5 + $0xa8] sm:$0xff] %vm3188_vm1, %v3135_v36  ;;  %v4485_v15 = vpack.c.bf16 %v3998_v61, %v3997_v40  ;;  %v3443_v61 = vld [vmem:[#allocation4 + $0x180] sm:$0xff] }
 0x4b0   : > { %3690 = vrot.lane.b32.xlu0 %v3617_v20, %s4564_s14  ;;  %v3326_v9 = vpop.permute.xlu1 %3325 }
 0x4b1   : > { %4487 = vmatpush3.bf16.xpose.msk.msra.mxu1 %vm6473_vm7, %v4485_v15  ;;  %3402 = vst.msk [vmem:[#allocation5 + $0xa0] sm:$0xff] %vm3381_vm2, %v3326_v9  ;;  %v3427_v9 = vld [vmem:[#allocation4 + $0xc0] sm:$0xff] }
 0x4b2   : > { %v3103_v48 = vpop.permute.xlu0 %3102  ;;  %3881 = vrot.lane.b32.xlu1 %v3809_v26, %s4565_s15 }
 0x4b3   : > { %3194 = vst.msk [vmem:[#allocation5 + $0x28] sm:$0xff] %vm3188_vm1, %v3103_v48  ;;  %v3444_v48 = vld [vmem:[#allocation4 + $0x188] sm:$0xff] }
 0x4b4   : > { %3915 = vrot.lane.b32.xlu0 %v3826_v13, %s4565_s15  ;;  %v3294_v17 = vpop.permute.xlu1 %3293 }
 0x4b5   : > { %3386 = vst.msk [vmem:[#allocation5 + $0x20] sm:$0xff] %vm3381_vm2, %v3294_v17  ;;  %v3636_v17 = vld [vmem:[#allocation4 + $0x181] sm:$0xff] }
 0x4b6   : > { %v3328_v18 = vpop.permute.xlu0 %3327  ;;  %2951 = vrot.lane.b32.xlu1 %v6902_v39, %s4559_s24 }
 0x4b7   : > { %3403 = vst.msk [vmem:[#allocation5 + $0xa8] sm:$0xff] %vm3381_vm2, %v3328_v18  ;;  %v3428_v18 = vld [vmem:[#allocation4 + $0xc8] sm:$0xff] }
 0x4b8   : > { %3883 = vrot.lane.b32.xlu0 %v3810_v2, %s4565_s15  ;;  %v3520_v50 = vpop.permute.xlu1 %3519 }
 0x4b9   : > { %3596 = vst.msk [vmem:[#allocation5 + $0xa0] sm:$0xff] %vm3575_vm3, %v3520_v50 }
 0x4ba   : > { %v3296_v3 = vpop.permute.xlu0 %3295  ;;  %3144 = vrot.lane.b32.xlu1 %v3632_v37, %s4561_s9  ;;  %v3812_v37 = vld [vmem:[#allocation4 + $0xb2] sm:$0xff] }
 0x4bb   : > { %3387 = vst.msk [vmem:[#allocation5 + $0x28] sm:$0xff] %vm3381_vm2, %v3296_v3  ;;  %v3620_v3 = vld [vmem:[#allocation4 + $0xc1] sm:$0xff] }
 0x4bc   : > { %2953 = vrot.lane.b32.xlu0 %v6903_v60, %s4559_s24  ;;  %v3488_v59 = vpop.permute.xlu1 %3487 }
 0x4bd   : > { %3580 = vst.msk [vmem:[#allocation5 + $0x20] sm:$0xff] %vm3575_vm3, %v3488_v59 }
 0x4be   : > { %v3522_v29 = vpop.permute.xlu0 %3521  ;;  %3112 = vrot.lane.b32.xlu1 %v3616_v34, %s4561_s9 }
 0x4bf   : > { %3597 = vst.msk [vmem:[#allocation5 + $0xa8] sm:$0xff] %vm3575_vm3, %v3522_v29 }
 0x4c0   : > { %3146 = vrot.lane.b32.xlu0 %v3633_v55, %s4561_s9  ;;  %v3713_v21 = vpop.permute.xlu1 %3712 }
 0x4c1   : > { %3789 = vst.msk [vmem:[#allocation5 + $0xa0] sm:$0xff] %vm3768_vm4, %v3713_v21  ;;  %v3637_v21 = vld [vmem:[#allocation4 + $0x189] sm:$0xff] }
 0x4c2   : > { %v3490_v6 = vpop.permute.xlu0 %3489  ;;  %3337 = vrot.lane.b32.xlu1 %v3247_v54, %s4562_s10 }
 0x4c3   : > { %3581 = vst.msk [vmem:[#allocation5 + $0x28] sm:$0xff] %vm3575_vm3, %v3490_v6 }
 0x4c4   : > { %3114 = vrot.lane.b32.xlu0 %v3617_v20, %s4561_s9  ;;  %v3681_v49 = vpop.permute.xlu1 %3680 }
 0x4c5   : > { %3773 = vst.msk [vmem:[#allocation5 + $0x20] sm:$0xff] %vm3768_vm4, %v3681_v49 }
 0x4c6   : > { %v3715_v62 = vpop.permute.xlu0 %3714  ;;  %3305 = vrot.lane.b32.xlu1 %v3809_v26, %s4562_s10 }
 0x4c7   : > { %3790 = vst.msk [vmem:[#allocation5 + $0xa8] sm:$0xff] %vm3768_vm4, %v3715_v62  ;;  %v3829_v62 = vld [vmem:[#allocation4 + $0x182] sm:$0xff] }
 0x4c8   : > { %3339 = vrot.lane.b32.xlu0 %v3826_v13, %s4562_s10  ;;  %v3906_v27 = vpop.permute.xlu1 %3905 }
 0x4c9   : > { %3982 = vst.msk [vmem:[#allocation5 + $0xa0] sm:$0xff] %vm3961_vm5, %v3906_v27 }
 0x4ca   : > { %v3683_v35 = vpop.permute.xlu0 %3682  ;;  %3531 = vrot.lane.b32.xlu1 %v6904_v25, %s4563_s11  ;;  %v3621_v25 = vld [vmem:[#allocation4 + $0xc9] sm:$0xff] }
 0x4cb   : > { %3774 = vst.msk [vmem:[#allocation5 + $0x28] sm:$0xff] %vm3768_vm4, %v3683_v35 }
 0x4cc   : > { %3307 = vrot.lane.b32.xlu0 %v3810_v2, %s4562_s10  ;;  %v3874_v58 = vpop.permute.xlu1 %3873 }
 0x4cd   : > { %3966 = vst.msk [vmem:[#allocation5 + $0x20] sm:$0xff] %vm3961_vm5, %v3874_v58 }
 0x4ce   : > { %v3908_v16 = vpop.permute.xlu0 %3907  ;;  %3499 = vrot.lane.b32.xlu1 %v3425_v30, %s4563_s11 }
 0x4cf   : > { %3983 = vst.msk [vmem:[#allocation5 + $0xa8] sm:$0xff] %vm3961_vm5, %v3908_v16 }
 0x4d0   : > { %3533 = vrot.lane.b32.xlu0 %v6905_v10, %s4563_s11  ;;  %v2944_v14 = vpop.permute.xlu1 %2943  ;;  %v4015_v38 = vld [vmem:[#allocation5 + $0xa0] sm:$0xff]  ;;  %v3813_v10 = vld [vmem:[#allocation4 + $0xc2] sm:$0xff] }
 0x4d1   : > { %3018 = vst.msk [vmem:[#allocation5 + $0xb0] sm:$0xff] %vm2995_vm0, %v2944_v14  ;;  %v3830_v14 = vld [vmem:[#allocation4 + $0x18a] sm:$0xff] }
 0x4d2   : > { %v3876_v12 = vpop.permute.xlu0 %3875  ;;  %3724 = vrot.lane.b32.xlu1 %v3634_v11, %s4564_s14 }
 0x4d3   : > { %3967 = vst.msk [vmem:[#allocation5 + $0x28] sm:$0xff] %vm3961_vm5, %v3876_v12 }
 0x4d4   : > { %3501 = vrot.lane.b32.xlu0 %v3426_v8, %s4563_s11  ;;  %v3137_v1 = vpop.permute.xlu1 %3136  ;;  %v3999_v28 = vld [vmem:[#allocation5 + $0x20] sm:$0xff] }
 0x4d5   : > { %3211 = vst.msk [vmem:[#allocation5 + $0xb0] sm:$0xff] %vm3188_vm1, %v3137_v1  ;;  %v3814_v8 = vld [vmem:[#allocation4 + $0xca] sm:$0xff] }
 0x4d6   : > { %v2946_v41 = vpop.permute.xlu0 %2945  ;;  %v4016_v57 = vld [vmem:[#allocation5 + $0xa8] sm:$0xff]  ;;  %3692 = vrot.lane.b32.xlu1 %v3618_v51, %s4564_s14 }
 0x4d7   : > { %3019 = vst.msk [vmem:[#allocation5 + $0xb8] sm:$0xff] %vm2995_vm0, %v2946_v41  ;;  %v4488_v46 = vpack.c.bf16 %v4016_v57, %v4015_v38 }
 0x4d8   : > { %3726 = vrot.lane.b32.xlu0 %v3635_v53, %s4564_s14  ;;  %v3105_v4 = vpop.permute.xlu1 %3104 }
 0x4d9   : > { %4490 = vmatprep.subr.msk.bf16.mxu1 %vm6473_vm7, %v4488_v46  ;;  %3195 = vst.msk [vmem:[#allocation5 + $0x30] sm:$0xff] %vm3188_vm1, %v3105_v4 }
 0x4da   : > { %v3139_v43 = vpop.permute.xlu0 %3138  ;;  %v4000_v56 = vld [vmem:[#allocation5 + $0x28] sm:$0xff]  ;;  %3917 = vrot.lane.b32.xlu1 %v3827_v0, %s4565_s15 }
 0x4db   : > { %3212 = vst.msk [vmem:[#allocation5 + $0xb8] sm:$0xff] %vm3188_vm1, %v3139_v43  ;;  %v4491_v39 = vpack.c.bf16 %v4000_v56, %v3999_v28  ;;  %v3446_v28 = vld [vmem:[#allocation4 + $0x1a0] sm:$0xff] }
 0x4dc   : > { %3694 = vrot.lane.b32.xlu0 %v3619_v47, %s4564_s14  ;;  %v3330_v19 = vpop.permute.xlu1 %3329 }
 0x4dd   : > { %4493 = vmatpush3.bf16.xpose.msk.msra.mxu1 %vm6473_vm7, %v4491_v39  ;;  %3404 = vst.msk [vmem:[#allocation5 + $0xb0] sm:$0xff] %vm3381_vm2, %v3330_v19 }
 0x4de   : > { %v3107_v32 = vpop.permute.xlu0 %3106  ;;  %3885 = vrot.lane.b32.xlu1 %v3811_v5, %s4565_s15 }
 0x4df   : > { %3196 = vst.msk [vmem:[#allocation5 + $0x38] sm:$0xff] %vm3188_vm1, %v3107_v32 }
 0x4e0   : > { %3919 = vrot.lane.b32.xlu0 %v3828_v7, %s4565_s15  ;;  %v3298_v60 = vpop.permute.xlu1 %3297 }
 0x4e1   : > { %3388 = vst.msk [vmem:[#allocation5 + $0x30] sm:$0xff] %vm3381_vm2, %v3298_v60  ;;  %v3639_v60 = vld [vmem:[#allocation4 + $0x1a1] sm:$0xff] }
 0x4e2   : > { %v3332_v31 = vpop.permute.xlu0 %3331  ;;  %2955 = vrot.lane.b32.xlu1 %v2863_v33, %s4559_s24  ;;  %v3638_v33 = vld [vmem:[#allocation4 + $0x199] sm:$0xff] }
 0x4e3   : > { %3405 = vst.msk [vmem:[#allocation5 + $0xb8] sm:$0xff] %vm3381_vm2, %v3332_v31 }
 0x4e4   : > { %3887 = vrot.lane.b32.xlu0 %v3812_v37, %s4565_s15  ;;  %v3524_v42 = vpop.permute.xlu1 %3523 }
 0x4e5   : > { %3598 = vst.msk [vmem:[#allocation5 + $0xb0] sm:$0xff] %vm3575_vm3, %v3524_v42 }
 0x4e6   : > { %v3300_v22 = vpop.permute.xlu0 %3299  ;;  %3148 = vrot.lane.b32.xlu1 %v3634_v11, %s4561_s9 }
 0x4e7   : > { %3389 = vst.msk [vmem:[#allocation5 + $0x38] sm:$0xff] %vm3381_vm2, %v3300_v22 }
 0x4e8   : > { %2957 = vrot.lane.b32.xlu0 %v2864_v52, %s4559_s24  ;;  %v3492_v34 = vpop.permute.xlu1 %3491 }
 0x4e9   : > { %3582 = vst.msk [vmem:[#allocation5 + $0x30] sm:$0xff] %vm3575_vm3, %v3492_v34 }
 0x4ea   : > { %v3526_v63 = vpop.permute.xlu0 %3525  ;;  %3116 = vrot.lane.b32.xlu1 %v3618_v51, %s4561_s9 }
 0x4eb   : > { %3599 = vst.msk [vmem:[#allocation5 + $0xb8] sm:$0xff] %vm3575_vm3, %v3526_v63 }
 0x4ec   : > { %3150 = vrot.lane.b32.xlu0 %v3635_v53, %s4561_s9  ;;  %v3717_v45 = vpop.permute.xlu1 %3716 }
 0x4ed   : > { %3791 = vst.msk [vmem:[#allocation5 + $0xb0] sm:$0xff] %vm3768_vm4, %v3717_v45  ;;  %v3623_v45 = vld [vmem:[#allocation4 + $0xe1] sm:$0xff] }
 0x4ee   : > { %v3494_v55 = vpop.permute.xlu0 %3493  ;;  %3341 = vrot.lane.b32.xlu1 %v3827_v0, %s4562_s10 }
 0x4ef   : > { %3583 = vst.msk [vmem:[#allocation5 + $0x38] sm:$0xff] %vm3575_vm3, %v3494_v55 }
 0x4f0   : > { %3118 = vrot.lane.b32.xlu0 %v3619_v47, %s4561_s9  ;;  %v3685_v44 = vpop.permute.xlu1 %3684  ;;  %v3445_v47 = vld [vmem:[#allocation4 + $0x198] sm:$0xff] }
 0x4f1   : > { %3775 = vst.msk [vmem:[#allocation5 + $0x30] sm:$0xff] %vm3768_vm4, %v3685_v44 }
 0x4f2   : > { %v3719_v24 = vpop.permute.xlu0 %3718  ;;  %3309 = vrot.lane.b32.xlu1 %v3811_v5, %s4562_s10  ;;  %v3430_v5 = vld [vmem:[#allocation4 + $0xe0] sm:$0xff] }
 0x4f3   : > { %3792 = vst.msk [vmem:[#allocation5 + $0xb8] sm:$0xff] %vm3768_vm4, %v3719_v24  ;;  %v3622_v24 = vld [vmem:[#allocation4 + $0xd9] sm:$0xff] }
 0x4f4   : > { %3343 = vrot.lane.b32.xlu0 %v3828_v7, %s4562_s10  ;;  %v3910_v36 = vpop.permute.xlu1 %3909  ;;  %v3429_v7 = vld [vmem:[#allocation4 + $0xd8] sm:$0xff] }
 0x4f5   : > { %3984 = vst.msk [vmem:[#allocation5 + $0xb0] sm:$0xff] %vm3961_vm5, %v3910_v36 }
 0x4f6   : > { %v3687_v40 = vpop.permute.xlu0 %3686  ;;  %3535 = vrot.lane.b32.xlu1 %v3443_v61, %s4563_s11 }
 0x4f7   : > { %3776 = vst.msk [vmem:[#allocation5 + $0x38] sm:$0xff] %vm3768_vm4, %v3687_v40  ;;  %v3832_v40 = vld [vmem:[#allocation4 + $0x1a2] sm:$0xff] }
 0x4f8   : > { %3311 = vrot.lane.b32.xlu0 %v3812_v37, %s4562_s10  ;;  %v3878_v20 = vpop.permute.xlu1 %3877 }
 0x4f9   : > { %3968 = vst.msk [vmem:[#allocation5 + $0x30] sm:$0xff] %vm3961_vm5, %v3878_v20  ;;  %v3831_v20 = vld [vmem:[#allocation4 + $0x19a] sm:$0xff] }
 0x4fa   : > { %v3912_v15 = vpop.permute.xlu0 %3911  ;;  %3503 = vrot.lane.b32.xlu1 %v3427_v9, %s4563_s11 }
 0x4fb   : > { %3985 = vst.msk [vmem:[#allocation5 + $0xb8] sm:$0xff] %vm3961_vm5, %v3912_v15 }
 0x4fc   : > { %3537 = vrot.lane.b32.xlu0 %v3444_v48, %s4563_s11  ;;  %v2948_v26 = vpop.permute.xlu1 %2947  ;;  %v4017_v59 = vld [vmem:[#allocation5 + $0xb0] sm:$0xff] }
 0x4fd   : > { %3020 = vst.msk [vmem:[#allocation5 + $0xc0] sm:$0xff] %vm2995_vm0, %v2948_v26 }
 0x4fe   : > { %v3880_v13 = vpop.permute.xlu0 %3879  ;;  %3728 = vrot.lane.b32.xlu1 %v3636_v17, %s4564_s14 }
 0x4ff   : > { %3969 = vst.msk [vmem:[#allocation5 + $0x38] sm:$0xff] %vm3961_vm5, %v3880_v13  ;;  %v3816_v13 = vld [vmem:[#allocation4 + $0xe2] sm:$0xff] }
 0x500   : > { %3505 = vrot.lane.b32.xlu0 %v3428_v18, %s4563_s11  ;;  %v3141_v2 = vpop.permute.xlu1 %3140  ;;  %v4001_v27 = vld [vmem:[#allocation5 + $0x30] sm:$0xff] }
 0x501   : > { %3213 = vst.msk [vmem:[#allocation5 + $0xc0] sm:$0xff] %vm3188_vm1, %v3141_v2 }
 0x502   : > { %v2950_v50 = vpop.permute.xlu0 %2949  ;;  %v4018_v29 = vld [vmem:[#allocation5 + $0xb8] sm:$0xff]  ;;  %3696 = vrot.lane.b32.xlu1 %v3620_v3, %s4564_s14 }
 0x503   : > { %3021 = vst.msk [vmem:[#allocation5 + $0xc8] sm:$0xff] %vm2995_vm0, %v2950_v50  ;;  %v4494_v6 = vpack.c.bf16 %v4018_v29, %v4017_v59 }
 0x504   : > { %3730 = vrot.lane.b32.xlu0 %v3637_v21, %s4564_s14  ;;  %v3109_v54 = vpop.permute.xlu1 %3108 }
 0x505   : > { %4496 = vmatprep.subr.msk.bf16.mxu1 %vm6473_vm7, %v4494_v6  ;;  %3197 = vst.msk [vmem:[#allocation5 + $0x40] sm:$0xff] %vm3188_vm1, %v3109_v54 }
 0x506   : > { %v3143_v49 = vpop.permute.xlu0 %3142  ;;  %v4002_v35 = vld [vmem:[#allocation5 + $0x38] sm:$0xff]  ;;  %3921 = vrot.lane.b32.xlu1 %v3829_v62, %s4565_s15 }
 0x507   : > { %3214 = vst.msk [vmem:[#allocation5 + $0xc8] sm:$0xff] %vm3188_vm1, %v3143_v49  ;;  %v4497_v58 = vpack.c.bf16 %v4002_v35, %v4001_v27 }
 0x508   : > { %3698 = vrot.lane.b32.xlu0 %v3621_v25, %s4564_s14  ;;  %v3334_v16 = vpop.permute.xlu1 %3333 }
 0x509   : > { %4499 = vmatpush3.bf16.xpose.msk.msra.mxu1 %vm6473_vm7, %v4497_v58  ;;  %3406 = vst.msk [vmem:[#allocation5 + $0xc0] sm:$0xff] %vm3381_vm2, %v3334_v16 }
 0x50a   : > { %v3111_v30 = vpop.permute.xlu0 %3110  ;;  %3889 = vrot.lane.b32.xlu1 %v3813_v10, %s4565_s15 }
 0x50b   : > { %3198 = vst.msk [vmem:[#allocation5 + $0x48] sm:$0xff] %vm3188_vm1, %v3111_v30 }
 0x50c   : > { %3923 = vrot.lane.b32.xlu0 %v3830_v14, %s4565_s15  ;;  %v3302_v12 = vpop.permute.xlu1 %3301 }
 0x50d   : > { %3390 = vst.msk [vmem:[#allocation5 + $0x40] sm:$0xff] %vm3381_vm2, %v3302_v12 }
 0x50e   : > { %v3336_v11 = vpop.permute.xlu0 %3335  ;;  %2959 = vrot.lane.b32.xlu1 %v3443_v61, %s4559_s24 }
 0x50f   : > { %3407 = vst.msk [vmem:[#allocation5 + $0xc8] sm:$0xff] %vm3381_vm2, %v3336_v11 }
 0x510   : > { %3891 = vrot.lane.b32.xlu0 %v3814_v8, %s4565_s15  ;;  %v3528_v1 = vpop.permute.xlu1 %3527 }
 0x511   : > { %3600 = vst.msk [vmem:[#allocation5 + $0xc0] sm:$0xff] %vm3575_vm3, %v3528_v1 }
 0x512   : > { %v3304_v41 = vpop.permute.xlu0 %3303  ;;  %2929 = vrot.lane.b32.xlu1 %v3428_v18, %s4559_s24 }
 0x513   : > { %3391 = vst.msk [vmem:[#allocation5 + $0x48] sm:$0xff] %vm3381_vm2, %v3304_v41 }
 0x514   : > { %2961 = vrot.lane.b32.xlu0 %v3444_v48, %s4559_s24  ;;  %v3496_v51 = vpop.permute.xlu1 %3495  ;;  %v6702_v48 = vld [vmem:[%s6791_s2] sm:$0xf] }
 0x515   : > { %3584 = vst.msk [vmem:[#allocation5 + $0x40] sm:$0xff] %vm3575_vm3, %v3496_v51  ;;  %4408 = vmatprep.mubr.msk.f32.mxu1 %vm4027_vm6, %v6702_v48 }
 0x516   : > { %v3530_v38 = vpop.permute.xlu0 %3529  ;;  %3154 = vrot.lane.b32.xlu1 %v3637_v21, %s4561_s9 }
 0x517   : > { %3601 = vst.msk [vmem:[#allocation5 + $0xc8] sm:$0xff] %vm3575_vm3, %v3530_v38 }
 0x518   : > { %3152 = vrot.lane.b32.xlu0 %v3636_v17, %s4561_s9  ;;  %v3721_v57 = vpop.permute.xlu1 %3720  ;;  %v3815_v17 = vld [vmem:[#allocation4 + $0xda] sm:$0xff] }
 0x519   : > { %3793 = vst.msk [vmem:[#allocation5 + $0xc0] sm:$0xff] %vm3768_vm4, %v3721_v57 }
 0x51a   : > { %v3498_v53 = vpop.permute.xlu0 %3497  ;;  %3122 = vrot.lane.b32.xlu1 %v3621_v25, %s4561_s9 }
 0x51b   : > { %3585 = vst.msk [vmem:[#allocation5 + $0x48] sm:$0xff] %vm3575_vm3, %v3498_v53 }
 0x51c   : > { %3120 = vrot.lane.b32.xlu0 %v3620_v3, %s4561_s9  ;;  %v3689_v46 = vpop.permute.xlu1 %3688 }
 0x51d   : > { %3777 = vst.msk [vmem:[#allocation5 + $0x40] sm:$0xff] %vm3768_vm4, %v3689_v46 }
 0x51e   : > { %v3723_v4 = vpop.permute.xlu0 %3722  ;;  %3347 = vrot.lane.b32.xlu1 %v3830_v14, %s4562_s10 }
 0x51f   : > { %3794 = vst.msk [vmem:[#allocation5 + $0xc8] sm:$0xff] %vm3768_vm4, %v3723_v4 }
 0x520   : > { %3345 = vrot.lane.b32.xlu0 %v3829_v62, %s4562_s10  ;;  %v3914_v43 = vpop.permute.xlu1 %3913 }
 0x521   : > { %3986 = vst.msk [vmem:[#allocation5 + $0xc0] sm:$0xff] %vm3961_vm5, %v3914_v43 }
 0x522   : > { %v3691_v0 = vpop.permute.xlu0 %3690  ;;  %3315 = vrot.lane.b32.xlu1 %v3814_v8, %s4562_s10 }
 0x523   : > { %3778 = vst.msk [vmem:[#allocation5 + $0x48] sm:$0xff] %vm3768_vm4, %v3691_v0 }
 0x524   : > { %3313 = vrot.lane.b32.xlu0 %v3813_v10, %s4562_s10  ;;  %v3882_v56 = vpop.permute.xlu1 %3881 }
 0x525   : > { %3970 = vst.msk [vmem:[#allocation5 + $0x40] sm:$0xff] %vm3961_vm5, %v3882_v56 }
 0x526   : > { %v3916_v39 = vpop.permute.xlu0 %3915  ;;  %3541 = vrot.lane.b32.xlu1 %v3446_v28, %s4563_s11 }
 0x527   : > { %3987 = vst.msk [vmem:[#allocation5 + $0xc8] sm:$0xff] %vm3961_vm5, %v3916_v39 }
 0x528   : > { %3539 = vrot.lane.b32.xlu0 %v3445_v47, %s4563_s11  ;;  %v2952_v19 = vpop.permute.xlu1 %2951  ;;  %v4019_v42 = vld [vmem:[#allocation5 + $0xc0] sm:$0xff] }
 0x529   : > { %3022 = vst.msk [vmem:[#allocation5 + $0xd0] sm:$0xff] %vm2995_vm0, %v2952_v19 }
 0x52a   : > { %v3884_v32 = vpop.permute.xlu0 %3883  ;;  %3509 = vrot.lane.b32.xlu1 %v3430_v5, %s4563_s11 }
 0x52b   : > { %3971 = vst.msk [vmem:[#allocation5 + $0x48] sm:$0xff] %vm3961_vm5, %v3884_v32 }
 0x52c   : > { %3507 = vrot.lane.b32.xlu0 %v3429_v7, %s4563_s11  ;;  %v3145_v31 = vpop.permute.xlu1 %3144  ;;  %v4003_v55 = vld [vmem:[#allocation5 + $0x40] sm:$0xff] }
 0x52d   : > { %3215 = vst.msk [vmem:[#allocation5 + $0xd0] sm:$0xff] %vm3188_vm1, %v3145_v31 }
 0x52e   : > { %v2954_v37 = vpop.permute.xlu0 %2953  ;;  %v4020_v22 = vld [vmem:[#allocation5 + $0xc8] sm:$0xff]  ;;  %3734 = vrot.lane.b32.xlu1 %v3639_v60, %s4564_s14 }
 0x52f   : > { %3023 = vst.msk [vmem:[#allocation5 + $0xd8] sm:$0xff] %vm2995_vm0, %v2954_v37  ;;  %v4500_v52 = vpack.c.bf16 %v4020_v22, %v4019_v42 }
 0x530   : > { %3732 = vrot.lane.b32.xlu0 %v3638_v33, %s4564_s14  ;;  %v3113_v34 = vpop.permute.xlu1 %3112 }
 0x531   : > { %4502 = vmatprep.subr.msk.bf16.mxu1 %vm6473_vm7, %v4500_v52  ;;  %3199 = vst.msk [vmem:[#allocation5 + $0x50] sm:$0xff] %vm3188_vm1, %v3113_v34 }
 0x532   : > { %v3147_v63 = vpop.permute.xlu0 %3146  ;;  %v4004_v44 = vld [vmem:[#allocation5 + $0x48] sm:$0xff]  ;;  %3702 = vrot.lane.b32.xlu1 %v3623_v45, %s4564_s14 }
 0x533   : > { %3216 = vst.msk [vmem:[#allocation5 + $0xd8] sm:$0xff] %vm3188_vm1, %v3147_v63  ;;  %v4503_v36 = vpack.c.bf16 %v4004_v44, %v4003_v55 }
 0x534   : > { %3700 = vrot.lane.b32.xlu0 %v3622_v24, %s4564_s14  ;;  %v3338_v61 = vpop.permute.xlu1 %3337 }
 0x535   : > { %4505 = vmatpush3.bf16.xpose.msk.msra.mxu1 %vm6473_vm7, %v4503_v36  ;;  %3408 = vst.msk [vmem:[#allocation5 + $0xd0] sm:$0xff] %vm3381_vm2, %v3338_v61 }
 0x536   : > { %v3115_v15 = vpop.permute.xlu0 %3114  ;;  %3927 = vrot.lane.b32.xlu1 %v3832_v40, %s4565_s15 }
 0x537   : > { %3200 = vst.msk [vmem:[#allocation5 + $0x58] sm:$0xff] %vm3188_vm1, %v3115_v15 }
 0x538   : > { %3925 = vrot.lane.b32.xlu0 %v3831_v20, %s4565_s15  ;;  %v3306_v9 = vpop.permute.xlu1 %3305 }
 0x539   : > { %3392 = vst.msk [vmem:[#allocation5 + $0x50] sm:$0xff] %vm3381_vm2, %v3306_v9 }
 0x53a   : > { %v3340_v26 = vpop.permute.xlu0 %3339  ;;  %3895 = vrot.lane.b32.xlu1 %v3816_v13, %s4565_s15 }
 0x53b   : > { %3409 = vst.msk [vmem:[#allocation5 + $0xd8] sm:$0xff] %vm3381_vm2, %v3340_v26 }
 0x53c   : > { %3893 = vrot.lane.b32.xlu0 %v3815_v17, %s4565_s15  ;;  %v3532_v18 = vpop.permute.xlu1 %3531 }
 0x53d   : > { %3602 = vst.msk [vmem:[#allocation5 + $0xd0] sm:$0xff] %vm3575_vm3, %v3532_v18 }
 0x53e   : > { %v3308_v2 = vpop.permute.xlu0 %3307 }
 0x53f   : > { %3393 = vst.msk [vmem:[#allocation5 + $0x58] sm:$0xff] %vm3381_vm2, %v3308_v2 }
 0x540   : > { %v3500_v50 = vpop.permute.xlu1 %3499 }
 0x541   : > { %3586 = vst.msk [vmem:[#allocation5 + $0x50] sm:$0xff] %vm3575_vm3, %v3500_v50 }
 0x542   : > { %v3534_v3 = vpop.permute.xlu0 %3533 }
 0x543   : > { %3603 = vst.msk [vmem:[#allocation5 + $0xd8] sm:$0xff] %vm3575_vm3, %v3534_v3 }
 0x544   : > { %v3725_v59 = vpop.permute.xlu1 %3724 }
 0x545   : > { %3795 = vst.msk [vmem:[#allocation5 + $0xd0] sm:$0xff] %vm3768_vm4, %v3725_v59 }
 0x546   : > { %v3502_v29 = vpop.permute.xlu0 %3501 }
 0x547   : > { %3587 = vst.msk [vmem:[#allocation5 + $0x58] sm:$0xff] %vm3575_vm3, %v3502_v29 }
 0x548   : > { %v3693_v21 = vpop.permute.xlu1 %3692 }
 0x549   : > { %3779 = vst.msk [vmem:[#allocation5 + $0x50] sm:$0xff] %vm3768_vm4, %v3693_v21 }
 0x54a   : > { %v3727_v6 = vpop.permute.xlu0 %3726 }
 0x54b   : > { %3796 = vst.msk [vmem:[#allocation5 + $0xd8] sm:$0xff] %vm3768_vm4, %v3727_v6 }
 0x54c   : > { %v3918_v54 = vpop.permute.xlu1 %3917 }
 0x54d   : > { %3988 = vst.msk [vmem:[#allocation5 + $0xd0] sm:$0xff] %vm3961_vm5, %v3918_v54 }
 0x54e   : > { %v3695_v49 = vpop.permute.xlu0 %3694 }
 0x54f   : > { %3780 = vst.msk [vmem:[#allocation5 + $0x58] sm:$0xff] %vm3768_vm4, %v3695_v49 }
 0x550   : > { %v3886_v62 = vpop.permute.xlu1 %3885 }
 0x551   : > { %3972 = vst.msk [vmem:[#allocation5 + $0x50] sm:$0xff] %vm3961_vm5, %v3886_v62 }
 0x552   : > { %v3920_v27 = vpop.permute.xlu0 %3919 }
 0x553   : > { %3989 = vst.msk [vmem:[#allocation5 + $0xd8] sm:$0xff] %vm3961_vm5, %v3920_v27 }
 0x554   : > { %v2956_v35 = vpop.permute.xlu1 %2955  ;;  %v4021_v30 = vld [vmem:[#allocation5 + $0xd0] sm:$0xff] }
 0x555   : > { %3024 = vst.msk [vmem:[#allocation5 + $0xe0] sm:$0xff] %vm2995_vm0, %v2956_v35 }
 0x556   : > { %v3888_v25 = vpop.permute.xlu0 %3887 }
 0x557   : > { %3973 = vst.msk [vmem:[#allocation5 + $0x58] sm:$0xff] %vm3961_vm5, %v3888_v25 }
 0x558   : > { %v3149_v58 = vpop.permute.xlu1 %3148  ;;  %v4005_v8 = vld [vmem:[#allocation5 + $0x50] sm:$0xff] }
 0x559   : > { %3217 = vst.msk [vmem:[#allocation5 + $0xe0] sm:$0xff] %vm3188_vm1, %v3149_v58 }
 0x55a   : > { %v2958_v16 = vpop.permute.xlu0 %2957  ;;  %v4022_v10 = vld [vmem:[#allocation5 + $0xd8] sm:$0xff] }
 0x55b   : > { %3025 = vst.msk [vmem:[#allocation5 + $0xe8] sm:$0xff] %vm2995_vm0, %v2958_v16  ;;  %v4506_v14 = vpack.c.bf16 %v4022_v10, %v4021_v30 }
 0x55c   : > { %v3117_v12 = vpop.permute.xlu1 %3116 }
 0x55d   : > { %4508 = vmatprep.subr.msk.bf16.mxu1 %vm6473_vm7, %v4506_v14  ;;  %3201 = vst.msk [vmem:[#allocation5 + $0x60] sm:$0xff] %vm3188_vm1, %v3117_v12 }
 0x55e   : > { %v3151_v11 = vpop.permute.xlu0 %3150  ;;  %v4006_v1 = vld [vmem:[#allocation5 + $0x58] sm:$0xff] }
 0x55f   : > { %3218 = vst.msk [vmem:[#allocation5 + $0xe8] sm:$0xff] %vm3188_vm1, %v3151_v11  ;;  %v4509_v41 = vpack.c.bf16 %v4006_v1, %v4005_v8 }
 0x560   : > { %v3342_v51 = vpop.permute.xlu1 %3341 }
 0x561   : > { %4511 = vmatpush3.bf16.xpose.msk.msra.mxu1 %vm6473_vm7, %v4509_v41  ;;  %3410 = vst.msk [vmem:[#allocation5 + $0xe0] sm:$0xff] %vm3381_vm2, %v3342_v51 }
 0x562   : > { %v3119_v38 = vpop.permute.xlu0 %3118 }
 0x563   : > { %3202 = vst.msk [vmem:[#allocation5 + $0x68] sm:$0xff] %vm3188_vm1, %v3119_v38 }
 0x564   : > { %v3310_v57 = vpop.permute.xlu1 %3309 }
 0x565   : > { %3394 = vst.msk [vmem:[#allocation5 + $0x60] sm:$0xff] %vm3381_vm2, %v3310_v57 }
 0x566   : > { %v3344_v53 = vpop.permute.xlu0 %3343 }
 0x567   : > { %3411 = vst.msk [vmem:[#allocation5 + $0xe8] sm:$0xff] %vm3381_vm2, %v3344_v53 }
 0x568   : > { %v3536_v46 = vpop.permute.xlu1 %3535 }
 0x569   : > { %3604 = vst.msk [vmem:[#allocation5 + $0xe0] sm:$0xff] %vm3575_vm3, %v3536_v46 }
 0x56a   : > { %v3312_v4 = vpop.permute.xlu0 %3311 }
 0x56b   : > { %3395 = vst.msk [vmem:[#allocation5 + $0x68] sm:$0xff] %vm3381_vm2, %v3312_v4 }
 0x56c   : > { %v3504_v43 = vpop.permute.xlu1 %3503 }
 0x56d   : > { %3588 = vst.msk [vmem:[#allocation5 + $0x60] sm:$0xff] %vm3575_vm3, %v3504_v43 }
 0x56e   : > { %v3538_v0 = vpop.permute.xlu0 %3537 }
 0x56f   : > { %3605 = vst.msk [vmem:[#allocation5 + $0xe8] sm:$0xff] %vm3575_vm3, %v3538_v0 }
 0x570   : > { %v3729_v28 = vpop.permute.xlu1 %3728 }
 0x571   : > { %3797 = vst.msk [vmem:[#allocation5 + $0xe0] sm:$0xff] %vm3768_vm4, %v3729_v28 }
 0x572   : > { %v3506_v56 = vpop.permute.xlu0 %3505 }
 0x573   : > { %3589 = vst.msk [vmem:[#allocation5 + $0x68] sm:$0xff] %vm3575_vm3, %v3506_v56 }
 0x574   : > { %v3697_v47 = vpop.permute.xlu1 %3696 }
 0x575   : > { %3781 = vst.msk [vmem:[#allocation5 + $0x60] sm:$0xff] %vm3768_vm4, %v3697_v47 }
 0x576   : > { %v3731_v39 = vpop.permute.xlu0 %3730 }
 0x577   : > { %3798 = vst.msk [vmem:[#allocation5 + $0xe8] sm:$0xff] %vm3768_vm4, %v3731_v39 }
 0x578   : > { %v3922_v19 = vpop.permute.xlu1 %3921 }
 0x579   : > { %3990 = vst.msk [vmem:[#allocation5 + $0xe0] sm:$0xff] %vm3961_vm5, %v3922_v19 }
 0x57a   : > { %v3699_v32 = vpop.permute.xlu0 %3698 }
 0x57b   : > { %3782 = vst.msk [vmem:[#allocation5 + $0x68] sm:$0xff] %vm3768_vm4, %v3699_v32 }
 0x57c   : > { %v3890_v5 = vpop.permute.xlu1 %3889 }
 0x57d   : > { %3974 = vst.msk [vmem:[#allocation5 + $0x60] sm:$0xff] %vm3961_vm5, %v3890_v5 }
 0x57e   : > { %v3924_v7 = vpop.permute.xlu0 %3923 }
 0x57f   : > { %3991 = vst.msk [vmem:[#allocation5 + $0xe8] sm:$0xff] %vm3961_vm5, %v3924_v7 }
 0x580   : > { %v2960_v60 = vpop.permute.xlu1 %2959  ;;  %v4023_v42 = vld [vmem:[#allocation5 + $0xe0] sm:$0xff] }
 0x581   : > { %3026 = vst.msk [vmem:[#allocation5 + $0xf0] sm:$0xff] %vm2995_vm0, %v2960_v60 }
 0x582   : > { %v3892_v31 = vpop.permute.xlu0 %3891 }
 0x583   : > { %3975 = vst.msk [vmem:[#allocation5 + $0x68] sm:$0xff] %vm3961_vm5, %v3892_v31 }
 0x584   : > { %v2930_v33 = vpop.permute.xlu1 %2929  ;;  %v4007_v45 = vld [vmem:[#allocation5 + $0x60] sm:$0xff] }
 0x585   : > { %3011 = vst.msk [vmem:[#allocation5 + $0x78] sm:$0xff] %vm2995_vm0, %v2930_v33 }
 0x586   : > { %v2962_v37 = vpop.permute.xlu0 %2961  ;;  %v4024_v22 = vld [vmem:[#allocation5 + $0xe8] sm:$0xff] }
 0x587   : > { %3027 = vst.msk [vmem:[#allocation5 + $0xf8] sm:$0xff] %vm2995_vm0, %v2962_v37  ;;  %v4512_v52 = vpack.c.bf16 %v4024_v22, %v4023_v42 }
 0x588   : > { %v3155_v34 = vpop.permute.xlu1 %3154 }
 0x589   : > { %4514 = vmatprep.subr.msk.bf16.mxu1 %vm6473_vm7, %v4512_v52  ;;  %3220 = vst.msk [vmem:[#allocation5 + $0xf8] sm:$0xff] %vm3188_vm1, %v3155_v34 }
 0x58a   : > { %v3153_v63 = vpop.permute.xlu0 %3152  ;;  %v4008_v55 = vld [vmem:[#allocation5 + $0x68] sm:$0xff] }
 0x58b   : > { %3219 = vst.msk [vmem:[#allocation5 + $0xf0] sm:$0xff] %vm3188_vm1, %v3153_v63  ;;  %v4515_v44 = vpack.c.bf16 %v4008_v55, %v4007_v45 }
 0x58c   : > { %v3123_v24 = vpop.permute.xlu1 %3122 }
 0x58d   : > { %4517 = vmatpush3.bf16.xpose.msk.msra.mxu1 %vm6473_vm7, %v4515_v44  ;;  %3204 = vst.msk [vmem:[#allocation5 + $0x78] sm:$0xff] %vm3188_vm1, %v3123_v24 }
 0x58e   : > { %v3121_v36 = vpop.permute.xlu0 %3120 }
 0x58f   : > { %3203 = vst.msk [vmem:[#allocation5 + $0x70] sm:$0xff] %vm3188_vm1, %v3121_v36 }
 0x590   : > { %v3348_v40 = vpop.permute.xlu1 %3347 }
 0x591   : > { %3413 = vst.msk [vmem:[#allocation5 + $0xf8] sm:$0xff] %vm3381_vm2, %v3348_v40 }
 0x592   : > { %v3346_v61 = vpop.permute.xlu0 %3345 }
 0x593   : > { %3412 = vst.msk [vmem:[#allocation5 + $0xf0] sm:$0xff] %vm3381_vm2, %v3346_v61 }
 0x594   : > { %v3316_v20 = vpop.permute.xlu1 %3315 }
 0x595   : > { %3397 = vst.msk [vmem:[#allocation5 + $0x78] sm:$0xff] %vm3381_vm2, %v3316_v20 }
 0x596   : > { %v3314_v15 = vpop.permute.xlu0 %3313 }
 0x597   : > { %3396 = vst.msk [vmem:[#allocation5 + $0x70] sm:$0xff] %vm3381_vm2, %v3314_v15 }
 0x598   : > { %v3542_v9 = vpop.permute.xlu1 %3541 }
 0x599   : > { %3607 = vst.msk [vmem:[#allocation5 + $0xf8] sm:$0xff] %vm3575_vm3, %v3542_v9 }
 0x59a   : > { %v3540_v26 = vpop.permute.xlu0 %3539 }
 0x59b   : > { %3606 = vst.msk [vmem:[#allocation5 + $0xf0] sm:$0xff] %vm3575_vm3, %v3540_v26 }
 0x59c   : > { %v3510_v13 = vpop.permute.xlu1 %3509 }
 0x59d   : > { %3591 = vst.msk [vmem:[#allocation5 + $0x78] sm:$0xff] %vm3575_vm3, %v3510_v13 }
 0x59e   : > { %v3508_v17 = vpop.permute.xlu0 %3507 }
 0x59f   : > { %3590 = vst.msk [vmem:[#allocation5 + $0x70] sm:$0xff] %vm3575_vm3, %v3508_v17 }
 0x5a0   : > { %v3735_v18 = vpop.permute.xlu1 %3734 }
 0x5a1   : > { %3800 = vst.msk [vmem:[#allocation5 + $0xf8] sm:$0xff] %vm3768_vm4, %v3735_v18 }
 0x5a2   : > { %v3733_v2 = vpop.permute.xlu0 %3732 }
 0x5a3   : > { %3799 = vst.msk [vmem:[#allocation5 + $0xf0] sm:$0xff] %vm3768_vm4, %v3733_v2 }
 0x5a4   : > { %v3703_v50 = vpop.permute.xlu1 %3702 }
 0x5a5   : > { %3784 = vst.msk [vmem:[#allocation5 + $0x78] sm:$0xff] %vm3768_vm4, %v3703_v50 }
 0x5a6   : > { %v3701_v3 = vpop.permute.xlu0 %3700 }
 0x5a7   : > { %3783 = vst.msk [vmem:[#allocation5 + $0x70] sm:$0xff] %vm3768_vm4, %v3701_v3 }
 0x5a8   : > { %v3928_v59 = vpop.permute.xlu1 %3927 }
 0x5a9   : > { %3993 = vst.msk [vmem:[#allocation5 + $0xf8] sm:$0xff] %vm3961_vm5, %v3928_v59 }
 0x5aa   : > { %v3926_v29 = vpop.permute.xlu0 %3925 }
 0x5ab   : > { %3992 = vst.msk [vmem:[#allocation5 + $0xf0] sm:$0xff] %vm3961_vm5, %v3926_v29 }
 0x5ac   : > { %v3896_v21 = vpop.permute.xlu1 %3895 }
 0x5ad   : > { %3977 = vst.msk [vmem:[#allocation5 + $0x78] sm:$0xff] %vm3961_vm5, %v3896_v21 }
 0x5ae   : > { %v3894_v6 = vpop.permute.xlu0 %3893 }
 0x5af   : > { %3976 = vst.msk [vmem:[#allocation5 + $0x70] sm:$0xff] %vm3961_vm5, %v3894_v6 }
 0x5b0   : > { %v4026_v54 = vld [vmem:[#allocation5 + $0xf8] sm:$0xff] }
 0x5b2   : > { %v4025_v49 = vld [vmem:[#allocation5 + $0xf0] sm:$0xff] }
 0x5b3   : > { %v4518_v62 = vpack.c.bf16 %v4026_v54, %v4025_v49 }
 0x5b4   : > { %v4010_v27 = vld [vmem:[#allocation5 + $0x78] sm:$0xff] }
 0x5b5   : > { %4520 = vmatprep.subr.msk.bf16.mxu1 %vm6473_vm7, %v4518_v62 }
 0x5b6   : > { %v4009_v35 = vld [vmem:[#allocation5 + $0x70] sm:$0xff] }
 0x5b7   : > { %v4521_v25 = vpack.c.bf16 %v4010_v27, %v4009_v35 }
 0x5b9   : > { %4523 = vmatpush3.bf16.xpose.msk.msra.mxu1 %vm6473_vm7, %v4521_v25 }
 0x5c0   : > { %4409 = vmatmul.mubr.msk.f32.vlgmr.msra.gmra.mrb[0].mxu1 %vm4027_vm6, %v6702_v48 }
 0x693   : > { %v4193_v58 = vpop.f32.mrb[0].mxu1 }
 0x694   : > { %v4198_v16 = vmax.f32 %v4193_v58, 0.0  ;;  %v4195_v30 = vpop.f32.mrb[1].mxu1 }
 0x695   : > { %v4199_v10 = vmax.f32 %v4195_v30, 0.0 }
 0x697   : > { %v4202_v14 = vcombine.low %v4198_v16, %v4199_v10 }
 0x699   : > { %4204 = vst [vmem:[%s170_s21] sm:$0xff] %v4202_v14 }
 0x69a PF: > { %s13_s12 = sadd.s32 1, %s4551_s12  }
 0x69b   : > { %p10_p4 = scmp.ge.s32.totalorder %s13_s12, 4  }
 0x69d   :  { %12 = sbr.rel (!%p10_p4) target bundleno = 1 (0x1), region = 66 }

</bundles_post_ra>
